<compile_context>
chip_gen: v7x
topology: tpu7x:2x2x1
jax: 0.10.0
libtpu: 0.0.40
codegen_flags: <defaults>
</compile_context>

<pallas_src>
import functools

import jax
import jax.numpy as jnp
from jax import lax
from jax.experimental import pallas as pl
from jax.experimental.pallas import tpu as pltpu

BN_EPS = 1e-5
LANE = 128
# Explicit scoped-VMEM budget: above the 16 MiB v5e default, still safe on v7x
# (64 MiB physical). Tiles below are sized well under this.
VMEM_LIMIT = 32 * 1024 * 1024


def _round_up(x, m):
    return (x + m - 1) // m * m


def _pick_row_tile(m, target=256):
    """Largest multiple of 16 that divides m and is <= target (fallback: m).
    For large inputs sweep `target` toward 512-1024 rows / the VMEM budget."""
    t = min(m, target)
    t -= t % 16
    while t >= 16 and m % t:
        t -= 16
    return t if t >= 16 and m % t == 0 else m


# --------------------------- stage 1: ReLU -> conv3x3 ----------------------------
def _stage1_kernel(xpf_ref, w1_ref, b1_ref, mask_ref, y1_ref, s_ref, q_ref, *, wp):
    """Per image: ReLU once, then the 3x3 conv as 9 shifted-tap MXU matmuls over the
    spatially flattened padded tile; emits y1 (W-padded row layout) and its
    per-image sum / sum-of-squares partials for BatchNorm1.

    xpf_ref : (1, Hp*Wp+2, Cp) f32   zero-padded image, flattened (+2 guard rows)
    w1_ref  : (9, Cp, Cp)      bf16  tap weights, tap k -> (dy, dx) = divmod(k, 3)
    b1_ref  : (1, Cp)          f32
    mask_ref: (H*Wp, 1)        f32   1.0 on valid rows, 0.0 on the W-pad rows
    y1_ref  : (H*Wp, Cp)       bf16
    s_ref   : (1, 1, Cp)       f32   sum of y1 over valid rows
    q_ref   : (1, 1, Cp)       f32   sum of y1^2 over valid rows
    """
    rows, _ = y1_ref.shape
    # ReLU once (ReLU(0) = 0 so it commutes with the zero padding).
    h = jnp.maximum(xpf_ref[0], 0.0)
    acc = jnp.zeros(y1_ref.shape, jnp.float32)
    for k in range(9):
        dy, dx = divmod(k, 3)
        off = dy * wp + dx
        # Contiguous 2D slice of the flattened padded tile = the (dy, dx) tap for
        # every output row; cast per tap (cheap VPU) into the bf16 MXU matmul.
        tap = h[off:off + rows, :].astype(jnp.bfloat16)
        acc = acc + jnp.dot(tap, w1_ref[k], preferred_element_type=jnp.float32)
    y1 = (acc + b1_ref[...]) * mask_ref[...]          # zero the W-pad garbage rows
    y1_ref[...] = y1.astype(y1_ref.dtype)
    s_ref[0] = jnp.sum(y1, axis=0, keepdims=True)     # one-pass sum / sumsq (fp32)
    q_ref[0] = jnp.sum(y1 * y1, axis=0, keepdims=True)


# ----------------------- stage 2: BN1 -> ReLU -> conv1x1 -------------------------
def _stage2_kernel(y1_ref, mask_ref, scale1_ref, shift1_ref, w2_ref, b2_ref,
                   y2_ref, s_ref, q_ref):
    y1 = y1_ref[...].astype(jnp.float32)
    h2 = jnp.maximum(y1 * scale1_ref[...] + shift1_ref[...], 0.0)
    y2 = jnp.dot(h2.astype(jnp.bfloat16), w2_ref[...],
                 preferred_element_type=jnp.float32) + b2_ref[...]
    y2_ref[...] = y2
    y2m = y2 * mask_ref[...]                          # exclude W-pad rows from stats
    s_ref[0] = jnp.sum(y2m, axis=0, keepdims=True)
    q_ref[0] = jnp.sum(y2m * y2, axis=0, keepdims=True)


# --------------------------- stage 3: BN2 + residual -----------------------------
def _stage3_kernel(y2_ref, x_ref, scale2_ref, shift2_ref, o_ref):
    o_ref[...] = x_ref[...] + y2_ref[...] * scale2_ref[...] + shift2_ref[...]


@jax.jit
def res_block_batchnorm(x_nchw, params):
    """Forward pass of ResBlockBatchNorm (training-mode BN). NCHW in / NCHW out."""
    N, C, H, W = x_nchw.shape
    Cp = _round_up(C, LANE)
    Hp, Wp = H + 2, W + 2
    M = N * H * W            # true per-channel element count for the BN statistics
    Mr = N * H * Wp          # row count of the W-padded working layout (r = h*Wp+w)

    # ---- layout glue (plain JAX): NCHW -> NHWC, lane-pad channels -----------------
    # TODO(synk): external contract is PyTorch NCHW; with an NHWC pipeline these two
    # transposes (here and at the end) drop out of the hot path.
    x = jnp.transpose(x_nchw, (0, 2, 3, 1)).astype(jnp.float32)
    x = jnp.pad(x, ((0, 0), (0, 0), (0, 0), (0, Cp - C)))           # (N, H, W, Cp)

    # Residual input in the W-padded row layout.
    x_wp = jnp.pad(x, ((0, 0), (0, 0), (0, 2), (0, 0))).reshape(Mr, Cp)
    # Conv input: zero-pad H and W by 1, flatten spatially, +2 guard rows so the
    # (dy=2, dx=2) tap slice stays in bounds.
    x_cf = jnp.pad(x, ((0, 0), (1, 1), (1, 1), (0, 0))).reshape(N, Hp * Wp, Cp)
    x_cf = jnp.pad(x_cf, ((0, 0), (0, 2), (0, 0)))                  # (N, Hp*Wp+2, Cp)

    # Validity mask over the W-padded rows (row r has w = r % Wp; valid iff w < W).
    mask = (jnp.arange(Mr, dtype=jnp.int32) % Wp < W).astype(jnp.float32)
    mask = mask.reshape(Mr, 1)

    # ---- parameters: tap-major conv1 weights, lane-padded, bf16 for the MXU -------
    w1 = jnp.transpose(params["conv1_w"], (2, 3, 1, 0)).reshape(9, C, C)
    w1 = jnp.pad(w1, ((0, 0), (0, Cp - C), (0, Cp - C))).astype(jnp.bfloat16)
    w2 = jnp.transpose(params["conv2_w"][:, :, 0, 0], (1, 0))
    w2 = jnp.pad(w2, ((0, Cp - C), (0, Cp - C))).astype(jnp.bfloat16)

    def cvec(p):
        return jnp.pad(p.astype(jnp.float32), (0, Cp - C)).reshape(1, Cp)

    b1, b2 = cvec(params["conv1_b"]), cvec(params["conv2_b"])
    g1, be1 = cvec(params["bn1_gamma"]), cvec(params["bn1_beta"])
    g2, be2 = cvec(params["bn2_gamma"]), cvec(params["bn2_beta"])

    cparams = pltpu.CompilerParams(dimension_semantics=("parallel",),
                                   vmem_limit_bytes=VMEM_LIMIT)

    # ---- stage 1: ReLU -> conv3x3 -> +b1, per-image sum/sumsq of y1 ---------------
    rows1 = H * Wp
    y1, s1, q1 = pl.pallas_call(
        functools.partial(_stage1_kernel, wp=Wp),
        grid=(N,),
        in_specs=[
            pl.BlockSpec((1, Hp * Wp + 2, Cp), lambda n: (n, 0, 0)),
            pl.BlockSpec((9, Cp, Cp), lambda n: (0, 0, 0)),   # resident weights
            pl.BlockSpec((1, Cp), lambda n: (0, 0)),
            pl.BlockSpec((rows1, 1), lambda n: (n, 0)),
        ],
        out_specs=[
            pl.BlockSpec((rows1, Cp), lambda n: (n, 0)),
            pl.BlockSpec((1, 1, Cp), lambda n: (n, 0, 0)),
            pl.BlockSpec((1, 1, Cp), lambda n: (n, 0, 0)),
        ],
        out_shape=[
            jax.ShapeDtypeStruct((Mr, Cp), jnp.bfloat16),     # y1 spilled bf16
            jax.ShapeDtypeStruct((N, 1, Cp), jnp.float32),
            jax.ShapeDtypeStruct((N, 1, Cp), jnp.float32),
        ],
        compiler_params=cparams,
    )(x_cf, w1, b1, mask)

    # ---- BN1 statistics -> per-channel scale / shift (tiny fp32 glue) -------------
    mean1 = jnp.sum(s1[:, 0, :], axis=0) / M
    var1 = jnp.maximum(jnp.sum(q1[:, 0, :], axis=0) / M - mean1 * mean1, 0.0)
    scl1 = g1[0] * lax.rsqrt(var1 + BN_EPS)
    scale1 = scl1.reshape(1, Cp)
    shift1 = (be1[0] - mean1 * scl1).reshape(1, Cp)

    # ---- stage 2: BN1 -> ReLU -> conv1x1 -> +b2, per-tile sum/sumsq of y2 ---------
    TM = _pick_row_tile(Mr)
    n_tiles = Mr // TM
    y2, s2, q2 = pl.pallas_call(
        _stage2_kernel,
        grid=(n_tiles,),
        in_specs=[
            pl.BlockSpec((TM, Cp), lambda i: (i, 0)),
            pl.BlockSpec((TM, 1), lambda i: (i, 0)),
            pl.BlockSpec((1, Cp), lambda i: (0, 0)),
            pl.BlockSpec((1, Cp), lambda i: (0, 0)),
            pl.BlockSpec((Cp, Cp), lambda i: (0, 0)),         # resident weights
            pl.BlockSpec((1, Cp), lambda i: (0, 0)),
        ],
        out_specs=[
            pl.BlockSpec((TM, Cp), lambda i: (i, 0)),
            pl.BlockSpec((1, 1, Cp), lambda i: (i, 0, 0)),
            pl.BlockSpec((1, 1, Cp), lambda i: (i, 0, 0)),
        ],
        out_shape=[
            jax.ShapeDtypeStruct((Mr, Cp), jnp.float32),      # y2 kept fp32
            jax.ShapeDtypeStruct((n_tiles, 1, Cp), jnp.float32),
            jax.ShapeDtypeStruct((n_tiles, 1, Cp), jnp.float32),
        ],
        compiler_params=cparams,
    )(y1, mask, scale1, shift1, w2, b2)

    # ---- BN2 statistics -> scale / shift -------------------------------------------
    mean2 = jnp.sum(s2[:, 0, :], axis=0) / M
    var2 = jnp.maximum(jnp.sum(q2[:, 0, :], axis=0) / M - mean2 * mean2, 0.0)
    scl2 = g2[0] * lax.rsqrt(var2 + BN_EPS)
    scale2 = scl2.reshape(1, Cp)
    shift2 = (be2[0] - mean2 * scl2).reshape(1, Cp)

    # ---- stage 3: BN2 + residual add ------------------------------------------------
    out_wp = pl.pallas_call(
        _stage3_kernel,
        grid=(n_tiles,),
        in_specs=[
            pl.BlockSpec((TM, Cp), lambda i: (i, 0)),
            pl.BlockSpec((TM, Cp), lambda i: (i, 0)),
            pl.BlockSpec((1, Cp), lambda i: (0, 0)),
            pl.BlockSpec((1, Cp), lambda i: (0, 0)),
        ],
        out_specs=pl.BlockSpec((TM, Cp), lambda i: (i, 0)),
        out_shape=jax.ShapeDtypeStruct((Mr, Cp), jnp.float32),
        compiler_params=cparams,
    )(y2, x_wp, scale2, shift2)

    # ---- drop the W-pad rows and lane padding, back to NCHW --------------------------
    out = out_wp.reshape(N, H, Wp, Cp)[:, :, :W, :C]
    return jnp.transpose(out, (0, 3, 1, 2))


# ----------------------- pure-JAX reference (for checking) -----------------------
def _bn_train(y, gamma, beta):
    mean = jnp.mean(y, axis=(0, 1, 2), keepdims=True)
    var = jnp.mean((y - mean) ** 2, axis=(0, 1, 2), keepdims=True)
    return (y - mean) * lax.rsqrt(var + BN_EPS) * gamma + beta


def _reference(x_nchw, params):
    x = jnp.transpose(x_nchw, (0, 2, 3, 1)).astype(jnp.float32)   # NHWC
    C = x.shape[-1]
    w1_hwio = jnp.transpose(params["conv1_w"], (2, 3, 1, 0))
    w2_hwio = jnp.transpose(params["conv2_w"], (2, 3, 1, 0))
    h = jnp.maximum(x, 0.0)
    y1 = lax.conv_general_dilated(h, w1_hwio, (1, 1), ((1, 1), (1, 1)),
                                  dimension_numbers=("NHWC", "HWIO", "NHWC"),
                                  precision=lax.Precision.HIGHEST)
    y1 = y1 + params["conv1_b"].reshape(1, 1, 1, C)
    y1 = _bn_train(y1, params["bn1_gamma"].reshape(1, 1, 1, C),
                   params["bn1_beta"].reshape(1, 1, 1, C))
    h2 = jnp.maximum(y1, 0.0)
    y2 = lax.conv_general_dilated(h2, w2_hwio, (1, 1), ((0, 0), (0, 0)),
                                  dimension_numbers=("NHWC", "HWIO", "NHWC"),
                                  precision=lax.Precision.HIGHEST)
    y2 = y2 + params["conv2_b"].reshape(1, 1, 1, C)
    y2 = _bn_train(y2, params["bn2_gamma"].reshape(1, 1, 1, C),
                   params["bn2_beta"].reshape(1, 1, 1, C))
    return jnp.transpose(x + y2, (0, 3, 1, 2))


def init_params(key, dim):
    ks = jax.random.split(key, 6)
    return {
        "conv1_w": 0.1 * jax.random.normal(ks[0], (dim, dim, 3, 3), jnp.float32),
        "conv1_b": 0.05 * jax.random.normal(ks[1], (dim,), jnp.float32),
        "conv2_w": 0.1 * jax.random.normal(ks[2], (dim, dim, 1, 1), jnp.float32),
        "conv2_b": 0.05 * jax.random.normal(ks[3], (dim,), jnp.float32),
        "bn1_gamma": 1.0 + 0.1 * jax.random.normal(ks[4], (dim,), jnp.float32),
        "bn1_beta": 0.05 * jax.random.normal(ks[5], (dim,), jnp.float32),
        "bn2_gamma": jnp.ones((dim,), jnp.float32),
        "bn2_beta": jnp.zeros((dim,), jnp.float32),
    }


if __name__ == "__main__":
    key = jax.random.PRNGKey(0)
    k_x, k_p = jax.random.split(key)

    N, C, H, W = 2, 4, 16, 16
    x = jax.random.normal(k_x, (N, C, H, W), jnp.float32)
    params = init_params(k_p, C)

    out = jax.block_until_ready(res_block_batchnorm(x, params))
    ref = jax.block_until_ready(_reference(x, params))

    assert out.shape == (N, C, H, W)
    # Kernel runs its matmuls in bf16 on the MXU and spills y1 in bf16, so compare
    # against the fp32 reference with a bf16-appropriate tolerance.
    if not jnp.allclose(out, ref, rtol=5e-2, atol=5e-2):
        err = float(jnp.max(jnp.abs(out - ref)))
        raise AssertionError(
            f"Pallas kernel does not match pure-JAX reference (max |diff| = {err})")

    print("KERNEL_OK")
</pallas_src>

<mosaic_0001>
module attributes {stable_mosaic.version = 11 : i64} {
  func.func @_stage2_kernel(%arg0: i32, %arg1: memref<192x128xbf16, #tpu.memory_space<vmem>>, %arg2: memref<192x1xf32, #tpu.memory_space<vmem>>, %arg3: memref<1x128xf32, #tpu.memory_space<vmem>>, %arg4: memref<1x128xf32, #tpu.memory_space<vmem>>, %arg5: memref<128x128xbf16, #tpu.memory_space<vmem>>, %arg6: memref<1x128xf32, #tpu.memory_space<vmem>>, %arg7: memref<192x128xf32, #tpu.memory_space<vmem>>, %arg8: memref<1x1x128xf32, #tpu.memory_space<vmem>>, %arg9: memref<1x1x128xf32, #tpu.memory_space<vmem>>) attributes {dimension_semantics = [#tpu.dimension_semantics<parallel>], iteration_bounds = array<i64: 3>, scalar_prefetch = 0 : i64, scratch_operands = 0 : i64, tpu.core_type = #tpu.core_type<tc>, window_params = [{transform_indices = @transform_0, window_bounds = array<i64: 192, 128>}, {transform_indices = @transform_1, window_bounds = array<i64: 192, 1>}, {pipeline_mode = #tpu.pipeline_mode<synchronous>, transform_indices = @transform_2, window_bounds = array<i64: 1, 128>}, {pipeline_mode = #tpu.pipeline_mode<synchronous>, transform_indices = @transform_3, window_bounds = array<i64: 1, 128>}, {pipeline_mode = #tpu.pipeline_mode<synchronous>, transform_indices = @transform_4, window_bounds = array<i64: 128, 128>}, {pipeline_mode = #tpu.pipeline_mode<synchronous>, transform_indices = @transform_5, window_bounds = array<i64: 1, 128>}, {transform_indices = @transform_6, window_bounds = array<i64: 192, 128>}, {transform_indices = @transform_7, window_bounds = array<i64: 1, 1, 128>}, {transform_indices = @transform_8, window_bounds = array<i64: 1, 1, 128>}]} {
    %c0 = arith.constant 0 : index
    %c0_0 = arith.constant 0 : index
    %0 = vector.load %arg1[%c0, %c0_0] : memref<192x128xbf16, #tpu.memory_space<vmem>>, vector<192x128xbf16>
    %1 = arith.extf %0 : vector<192x128xbf16> to vector<192x128xf32>
    %c0_1 = arith.constant 0 : index
    %c0_2 = arith.constant 0 : index
    %2 = vector.load %arg3[%c0_1, %c0_2] : memref<1x128xf32, #tpu.memory_space<vmem>>, vector<1x128xf32>
    %3 = vector.broadcast %2 : vector<1x128xf32> to vector<192x128xf32>
    %4 = arith.mulf %1, %3 : vector<192x128xf32>
    %c0_3 = arith.constant 0 : index
    %c0_4 = arith.constant 0 : index
    %5 = vector.load %arg4[%c0_3, %c0_4] : memref<1x128xf32, #tpu.memory_space<vmem>>, vector<1x128xf32>
    %6 = vector.broadcast %5 : vector<1x128xf32> to vector<192x128xf32>
    %7 = arith.addf %4, %6 : vector<192x128xf32>
    %cst = arith.constant 0.000000e+00 : f32
    %8 = vector.broadcast %cst : f32 to vector<192x128xf32>
    %9 = arith.maximumf %7, %8 : vector<192x128xf32>
    %10 = arith.truncf %9 : vector<192x128xf32> to vector<192x128xbf16>
    %c0_5 = arith.constant 0 : index
    %c0_6 = arith.constant 0 : index
    %11 = vector.load %arg5[%c0_5, %c0_6] : memref<128x128xbf16, #tpu.memory_space<vmem>>, vector<128x128xbf16>
    %cst_7 = arith.constant dense<0.000000e+00> : vector<192x128xf32>
    %12 = tpu.matmul %10, %11, %cst_7 {dimension_numbers = #tpu.dot_dimension_numbers<[1], [0], [0], [1], [0, 0, 1, 1], [], []>} : vector<192x128xbf16>, vector<128x128xbf16>, vector<192x128xf32> -> vector<192x128xf32>
    %c0_8 = arith.constant 0 : index
    %c0_9 = arith.constant 0 : index
    %13 = vector.load %arg6[%c0_8, %c0_9] : memref<1x128xf32, #tpu.memory_space<vmem>>, vector<1x128xf32>
    %14 = vector.broadcast %13 : vector<1x128xf32> to vector<192x128xf32>
    %15 = arith.addf %12, %14 : vector<192x128xf32>
    %c0_10 = arith.constant 0 : index
    %c0_11 = arith.constant 0 : index
    %16 = vector.load %arg7[%c0_10, %c0_11] : memref<192x128xf32, #tpu.memory_space<vmem>>, vector<192x128xf32>
    tpu.vector_store %arg7[%c0_10, %c0_11], %15 {strides = array<i32>} : memref<192x128xf32, #tpu.memory_space<vmem>>, vector<192x128xf32>,
    %c0_12 = arith.constant 0 : index
    %c0_13 = arith.constant 0 : index
    %17 = vector.load %arg2[%c0_12, %c0_13] : memref<192x1xf32, #tpu.memory_space<vmem>>, vector<192x1xf32>
    %18 = vector.broadcast %17 : vector<192x1xf32> to vector<192x128xf32>
    %19 = arith.mulf %15, %18 : vector<192x128xf32>
    %cst_14 = arith.constant dense<0.000000e+00> : vector<128xf32>
    %20 = vector.multi_reduction <add>, %19, %cst_14 [0] : vector<192x128xf32> to vector<128xf32>
    %21 = vector.shape_cast %20 : vector<128xf32> to vector<1x128xf32>
    %c0_15 = arith.constant 0 : index
    %c0_16 = arith.constant 0 : index
    %c0_17 = arith.constant 0 : index
    %22 = vector.load %arg8[%c0_15, %c0_16, %c0_17] : memref<1x1x128xf32, #tpu.memory_space<vmem>>, vector<1x1x128xf32>
    %23 = vector.shape_cast %22 : vector<1x1x128xf32> to vector<1x128xf32>
    %24 = vector.shape_cast %21 : vector<1x128xf32> to vector<1x1x128xf32>
    tpu.vector_store %arg8[%c0_15, %c0_16, %c0_17], %24 {strides = array<i32>} : memref<1x1x128xf32, #tpu.memory_space<vmem>>, vector<1x1x128xf32>,
    %25 = arith.mulf %19, %15 : vector<192x128xf32>
    %cst_18 = arith.constant dense<0.000000e+00> : vector<128xf32>
    %26 = vector.multi_reduction <add>, %25, %cst_18 [0] : vector<192x128xf32> to vector<128xf32>
    %27 = vector.shape_cast %26 : vector<128xf32> to vector<1x128xf32>
    %c0_19 = arith.constant 0 : index
    %c0_20 = arith.constant 0 : index
    %c0_21 = arith.constant 0 : index
    %28 = vector.load %arg9[%c0_19, %c0_20, %c0_21] : memref<1x1x128xf32, #tpu.memory_space<vmem>>, vector<1x1x128xf32>
    %29 = vector.shape_cast %28 : vector<1x1x128xf32> to vector<1x128xf32>
    %30 = vector.shape_cast %27 : vector<1x128xf32> to vector<1x1x128xf32>
    tpu.vector_store %arg9[%c0_19, %c0_20, %c0_21], %30 {strides = array<i32>} : memref<1x1x128xf32, #tpu.memory_space<vmem>>, vector<1x1x128xf32>,
    return
  }
  func.func @transform_0(%arg0: i32) -> (i32, i32) {
    %c0_i32 = arith.constant 0 : i32
    %c0_i32_0 = arith.constant 0 : i32
    return %arg0, %c0_i32 : i32, i32
  }
  func.func @transform_1(%arg0: i32) -> (i32, i32) {
    %c0_i32 = arith.constant 0 : i32
    %c0_i32_0 = arith.constant 0 : i32
    return %arg0, %c0_i32 : i32, i32
  }
  func.func @transform_2(%arg0: i32) -> (i32, i32) {
    %c0_i32 = arith.constant 0 : i32
    %c0_i32_0 = arith.constant 0 : i32
    %c0_i32_1 = arith.constant 0 : i32
    return %c0_i32, %c0_i32_0 : i32, i32
  }
  func.func @transform_3(%arg0: i32) -> (i32, i32) {
    %c0_i32 = arith.constant 0 : i32
    %c0_i32_0 = arith.constant 0 : i32
    %c0_i32_1 = arith.constant 0 : i32
    return %c0_i32, %c0_i32_0 : i32, i32
  }
  func.func @transform_4(%arg0: i32) -> (i32, i32) {
    %c0_i32 = arith.constant 0 : i32
    %c0_i32_0 = arith.constant 0 : i32
    %c0_i32_1 = arith.constant 0 : i32
    return %c0_i32, %c0_i32_0 : i32, i32
  }
  func.func @transform_5(%arg0: i32) -> (i32, i32) {
    %c0_i32 = arith.constant 0 : i32
    %c0_i32_0 = arith.constant 0 : i32
    %c0_i32_1 = arith.constant 0 : i32
    return %c0_i32, %c0_i32_0 : i32, i32
  }
  func.func @transform_6(%arg0: i32) -> (i32, i32) {
    %c0_i32 = arith.constant 0 : i32
    %c0_i32_0 = arith.constant 0 : i32
    return %arg0, %c0_i32 : i32, i32
  }
  func.func @transform_7(%arg0: i32) -> (i32, i32, i32) {
    %c0_i32 = arith.constant 0 : i32
    %c0_i32_0 = arith.constant 0 : i32
    %c0_i32_1 = arith.constant 0 : i32
    return %arg0, %c0_i32, %c0_i32_0 : i32, i32, i32
  }
  func.func @transform_8(%arg0: i32) -> (i32, i32, i32) {
    %c0_i32 = arith.constant 0 : i32
    %c0_i32_0 = arith.constant 0 : i32
    %c0_i32_1 = arith.constant 0 : i32
    return %arg0, %c0_i32, %c0_i32_0 : i32, i32, i32
  }
}

module attributes {stable_mosaic.version = 11 : i64} {
  func.func @_stage1_kernel(%arg0: i32, %arg1: memref<1x326x128xf32, #tpu.memory_space<vmem>>, %arg2: memref<9x128x128xbf16, #tpu.memory_space<vmem>>, %arg3: memref<1x128xf32, #tpu.memory_space<vmem>>, %arg4: memref<288x1xf32, #tpu.memory_space<vmem>>, %arg5: memref<288x128xbf16, #tpu.memory_space<vmem>>, %arg6: memref<1x1x128xf32, #tpu.memory_space<vmem>>, %arg7: memref<1x1x128xf32, #tpu.memory_space<vmem>>) attributes {dimension_semantics = [#tpu.dimension_semantics<parallel>], iteration_bounds = array<i64: 2>, scalar_prefetch = 0 : i64, scratch_operands = 0 : i64, tpu.core_type = #tpu.core_type<tc>, window_params = [{transform_indices = @transform_0, window_bounds = array<i64: 1, 326, 128>}, {pipeline_mode = #tpu.pipeline_mode<synchronous>, transform_indices = @transform_1, window_bounds = array<i64: 9, 128, 128>}, {pipeline_mode = #tpu.pipeline_mode<synchronous>, transform_indices = @transform_2, window_bounds = array<i64: 1, 128>}, {transform_indices = @transform_3, window_bounds = array<i64: 288, 1>}, {transform_indices = @transform_4, window_bounds = array<i64: 288, 128>}, {transform_indices = @transform_5, window_bounds = array<i64: 1, 1, 128>}, {transform_indices = @transform_6, window_bounds = array<i64: 1, 1, 128>}]} {
    %c0 = arith.constant 0 : index
    %c0_0 = arith.constant 0 : index
    %c0_1 = arith.constant 0 : index
    %0 = vector.load %arg1[%c0, %c0_0, %c0_1] : memref<1x326x128xf32, #tpu.memory_space<vmem>>, vector<1x326x128xf32>
    %1 = vector.shape_cast %0 : vector<1x326x128xf32> to vector<326x128xf32>
    %cst = arith.constant 0.000000e+00 : f32
    %2 = vector.broadcast %cst : f32 to vector<326x128xf32>
    %3 = arith.maximumf %1, %2 : vector<326x128xf32>
    %cst_2 = arith.constant 0.000000e+00 : f32
    %4 = vector.broadcast %cst_2 : f32 to vector<288x128xf32>
    %5 = vector.extract_strided_slice %3 {offsets = [0, 0], sizes = [288, 128], strides = [1, 1]} : vector<326x128xf32> to vector<288x128xf32>
    %6 = arith.truncf %5 : vector<288x128xf32> to vector<288x128xbf16>
    %c0_3 = arith.constant 0 : index
    %c0_4 = arith.constant 0 : index
    %c0_5 = arith.constant 0 : index
    %7 = vector.load %arg2[%c0_3, %c0_4, %c0_5] : memref<9x128x128xbf16, #tpu.memory_space<vmem>>, vector<1x128x128xbf16>
    %8 = vector.shape_cast %7 : vector<1x128x128xbf16> to vector<128x128xbf16>
    %cst_6 = arith.constant dense<0.000000e+00> : vector<288x128xf32>
    %9 = tpu.matmul %6, %8, %cst_6 {dimension_numbers = #tpu.dot_dimension_numbers<[1], [0], [0], [1], [0, 0, 1, 1], [], []>} : vector<288x128xbf16>, vector<128x128xbf16>, vector<288x128xf32> -> vector<288x128xf32>
    %10 = arith.addf %4, %9 : vector<288x128xf32>
    %11 = vector.extract_strided_slice %3 {offsets = [1, 0], sizes = [288, 128], strides = [1, 1]} : vector<326x128xf32> to vector<288x128xf32>
    %12 = arith.truncf %11 : vector<288x128xf32> to vector<288x128xbf16>
    %c1 = arith.constant 1 : index
    %c0_7 = arith.constant 0 : index
    %c0_8 = arith.constant 0 : index
    %13 = vector.load %arg2[%c1, %c0_7, %c0_8] : memref<9x128x128xbf16, #tpu.memory_space<vmem>>, vector<1x128x128xbf16>
    %14 = vector.shape_cast %13 : vector<1x128x128xbf16> to vector<128x128xbf16>
    %cst_9 = arith.constant dense<0.000000e+00> : vector<288x128xf32>
    %15 = tpu.matmul %12, %14, %cst_9 {dimension_numbers = #tpu.dot_dimension_numbers<[1], [0], [0], [1], [0, 0, 1, 1], [], []>} : vector<288x128xbf16>, vector<128x128xbf16>, vector<288x128xf32> -> vector<288x128xf32>
    %16 = arith.addf %10, %15 : vector<288x128xf32>
    %17 = vector.extract_strided_slice %3 {offsets = [2, 0], sizes = [288, 128], strides = [1, 1]} : vector<326x128xf32> to vector<288x128xf32>
    %18 = arith.truncf %17 : vector<288x128xf32> to vector<288x128xbf16>
    %c2 = arith.constant 2 : index
    %c0_10 = arith.constant 0 : index
    %c0_11 = arith.constant 0 : index
    %19 = vector.load %arg2[%c2, %c0_10, %c0_11] : memref<9x128x128xbf16, #tpu.memory_space<vmem>>, vector<1x128x128xbf16>
    %20 = vector.shape_cast %19 : vector<1x128x128xbf16> to vector<128x128xbf16>
    %cst_12 = arith.constant dense<0.000000e+00> : vector<288x128xf32>
    %21 = tpu.matmul %18, %20, %cst_12 {dimension_numbers = #tpu.dot_dimension_numbers<[1], [0], [0], [1], [0, 0, 1, 1], [], []>} : vector<288x128xbf16>, vector<128x128xbf16>, vector<288x128xf32> -> vector<288x128xf32>
    %22 = arith.addf %16, %21 : vector<288x128xf32>
    %23 = vector.extract_strided_slice %3 {offsets = [18, 0], sizes = [288, 128], strides = [1, 1]} : vector<326x128xf32> to vector<288x128xf32>
    %24 = arith.truncf %23 : vector<288x128xf32> to vector<288x128xbf16>
    %c3 = arith.constant 3 : index
    %c0_13 = arith.constant 0 : index
    %c0_14 = arith.constant 0 : index
    %25 = vector.load %arg2[%c3, %c0_13, %c0_14] : memref<9x128x128xbf16, #tpu.memory_space<vmem>>, vector<1x128x128xbf16>
    %26 = vector.shape_cast %25 : vector<1x128x128xbf16> to vector<128x128xbf16>
    %cst_15 = arith.constant dense<0.000000e+00> : vector<288x128xf32>
    %27 = tpu.matmul %24, %26, %cst_15 {dimension_numbers = #tpu.dot_dimension_numbers<[1], [0], [0], [1], [0, 0, 1, 1], [], []>} : vector<288x128xbf16>, vector<128x128xbf16>, vector<288x128xf32> -> vector<288x128xf32>
    %28 = arith.addf %22, %27 : vector<288x128xf32>
    %29 = vector.extract_strided_slice %3 {offsets = [19, 0], sizes = [288, 128], strides = [1, 1]} : vector<326x128xf32> to vector<288x128xf32>
    %30 = arith.truncf %29 : vector<288x128xf32> to vector<288x128xbf16>
    %c4 = arith.constant 4 : index
    %c0_16 = arith.constant 0 : index
    %c0_17 = arith.constant 0 : index
    %31 = vector.load %arg2[%c4, %c0_16, %c0_17] : memref<9x128x128xbf16, #tpu.memory_space<vmem>>, vector<1x128x128xbf16>
    %32 = vector.shape_cast %31 : vector<1x128x128xbf16> to vector<128x128xbf16>
    %cst_18 = arith.constant dense<0.000000e+00> : vector<288x128xf32>
    %33 = tpu.matmul %30, %32, %cst_18 {dimension_numbers = #tpu.dot_dimension_numbers<[1], [0], [0], [1], [0, 0, 1, 1], [], []>} : vector<288x128xbf16>, vector<128x128xbf16>, vector<288x128xf32> -> vector<288x128xf32>
    %34 = arith.addf %28, %33 : vector<288x128xf32>
    %35 = vector.extract_strided_slice %3 {offsets = [20, 0], sizes = [288, 128], strides = [1, 1]} : vector<326x128xf32> to vector<288x128xf32>
    %36 = arith.truncf %35 : vector<288x128xf32> to vector<288x128xbf16>
    %c5 = arith.constant 5 : index
    %c0_19 = arith.constant 0 : index
    %c0_20 = arith.constant 0 : index
    %37 = vector.load %arg2[%c5, %c0_19, %c0_20] : memref<9x128x128xbf16, #tpu.memory_space<vmem>>, vector<1x128x128xbf16>
    %38 = vector.shape_cast %37 : vector<1x128x128xbf16> to vector<128x128xbf16>
    %cst_21 = arith.constant dense<0.000000e+00> : vector<288x128xf32>
    %39 = tpu.matmul %36, %38, %cst_21 {dimension_numbers = #tpu.dot_dimension_numbers<[1], [0], [0], [1], [0, 0, 1, 1], [], []>} : vector<288x128xbf16>, vector<128x128xbf16>, vector<288x128xf32> -> vector<288x128xf32>
    %40 = arith.addf %34, %39 : vector<288x128xf32>
    %41 = vector.extract_strided_slice %3 {offsets = [36, 0], sizes = [288, 128], strides = [1, 1]} : vector<326x128xf32> to vector<288x128xf32>
    %42 = arith.truncf %41 : vector<288x128xf32> to vector<288x128xbf16>
    %c6 = arith.constant 6 : index
    %c0_22 = arith.constant 0 : index
    %c0_23 = arith.constant 0 : index
    %43 = vector.load %arg2[%c6, %c0_22, %c0_23] : memref<9x128x128xbf16, #tpu.memory_space<vmem>>, vector<1x128x128xbf16>
    %44 = vector.shape_cast %43 : vector<1x128x128xbf16> to vector<128x128xbf16>
    %cst_24 = arith.constant dense<0.000000e+00> : vector<288x128xf32>
    %45 = tpu.matmul %42, %44, %cst_24 {dimension_numbers = #tpu.dot_dimension_numbers<[1], [0], [0], [1], [0, 0, 1, 1], [], []>} : vector<288x128xbf16>, vector<128x128xbf16>, vector<288x128xf32> -> vector<288x128xf32>
    %46 = arith.addf %40, %45 : vector<288x128xf32>
    %47 = vector.extract_strided_slice %3 {offsets = [37, 0], sizes = [288, 128], strides = [1, 1]} : vector<326x128xf32> to vector<288x128xf32>
    %48 = arith.truncf %47 : vector<288x128xf32> to vector<288x128xbf16>
    %c7 = arith.constant 7 : index
    %c0_25 = arith.constant 0 : index
    %c0_26 = arith.constant 0 : index
    %49 = vector.load %arg2[%c7, %c0_25, %c0_26] : memref<9x128x128xbf16, #tpu.memory_space<vmem>>, vector<1x128x128xbf16>
    %50 = vector.shape_cast %49 : vector<1x128x128xbf16> to vector<128x128xbf16>
    %cst_27 = arith.constant dense<0.000000e+00> : vector<288x128xf32>
    %51 = tpu.matmul %48, %50, %cst_27 {dimension_numbers = #tpu.dot_dimension_numbers<[1], [0], [0], [1], [0, 0, 1, 1], [], []>} : vector<288x128xbf16>, vector<128x128xbf16>, vector<288x128xf32> -> vector<288x128xf32>
    %52 = arith.addf %46, %51 : vector<288x128xf32>
    %53 = vector.extract_strided_slice %3 {offsets = [38, 0], sizes = [288, 128], strides = [1, 1]} : vector<326x128xf32> to vector<288x128xf32>
    %54 = arith.truncf %53 : vector<288x128xf32> to vector<288x128xbf16>
    %c8 = arith.constant 8 : index
    %c0_28 = arith.constant 0 : index
    %c0_29 = arith.constant 0 : index
    %55 = vector.load %arg2[%c8, %c0_28, %c0_29] : memref<9x128x128xbf16, #tpu.memory_space<vmem>>, vector<1x128x128xbf16>
    %56 = vector.shape_cast %55 : vector<1x128x128xbf16> to vector<128x128xbf16>
    %cst_30 = arith.constant dense<0.000000e+00> : vector<288x128xf32>
    %57 = tpu.matmul %54, %56, %cst_30 {dimension_numbers = #tpu.dot_dimension_numbers<[1], [0], [0], [1], [0, 0, 1, 1], [], []>} : vector<288x128xbf16>, vector<128x128xbf16>, vector<288x128xf32> -> vector<288x128xf32>
    %58 = arith.addf %52, %57 : vector<288x128xf32>
    %c0_31 = arith.constant 0 : index
    %c0_32 = arith.constant 0 : index
    %59 = vector.load %arg3[%c0_31, %c0_32] : memref<1x128xf32, #tpu.memory_space<vmem>>, vector<1x128xf32>
    %60 = vector.broadcast %59 : vector<1x128xf32> to vector<288x128xf32>
    %61 = arith.addf %58, %60 : vector<288x128xf32>
    %c0_33 = arith.constant 0 : index
    %c0_34 = arith.constant 0 : index
    %62 = vector.load %arg4[%c0_33, %c0_34] : memref<288x1xf32, #tpu.memory_space<vmem>>, vector<288x1xf32>
    %63 = vector.broadcast %62 : vector<288x1xf32> to vector<288x128xf32>
    %64 = arith.mulf %61, %63 : vector<288x128xf32>
    %65 = arith.truncf %64 : vector<288x128xf32> to vector<288x128xbf16>
    %c0_35 = arith.constant 0 : index
    %c0_36 = arith.constant 0 : index
    %66 = vector.load %arg5[%c0_35, %c0_36] : memref<288x128xbf16, #tpu.memory_space<vmem>>, vector<288x128xbf16>
    tpu.vector_store %arg5[%c0_35, %c0_36], %65 {strides = array<i32>} : memref<288x128xbf16, #tpu.memory_space<vmem>>, vector<288x128xbf16>,
    %cst_37 = arith.constant dense<0.000000e+00> : vector<128xf32>
    %67 = vector.multi_reduction <add>, %64, %cst_37 [0] : vector<288x128xf32> to vector<128xf32>
    %68 = vector.shape_cast %67 : vector<128xf32> to vector<1x128xf32>
    %c0_38 = arith.constant 0 : index
    %c0_39 = arith.constant 0 : index
    %c0_40 = arith.constant 0 : index
    %69 = vector.load %arg6[%c0_38, %c0_39, %c0_40] : memref<1x1x128xf32, #tpu.memory_space<vmem>>, vector<1x1x128xf32>
    %70 = vector.shape_cast %69 : vector<1x1x128xf32> to vector<1x128xf32>
    %71 = vector.shape_cast %68 : vector<1x128xf32> to vector<1x1x128xf32>
    tpu.vector_store %arg6[%c0_38, %c0_39, %c0_40], %71 {strides = array<i32>} : memref<1x1x128xf32, #tpu.memory_space<vmem>>, vector<1x1x128xf32>,
    %72 = arith.mulf %64, %64 : vector<288x128xf32>
    %cst_41 = arith.constant dense<0.000000e+00> : vector<128xf32>
    %73 = vector.multi_reduction <add>, %72, %cst_41 [0] : vector<288x128xf32> to vector<128xf32>
    %74 = vector.shape_cast %73 : vector<128xf32> to vector<1x128xf32>
    %c0_42 = arith.constant 0 : index
    %c0_43 = arith.constant 0 : index
    %c0_44 = arith.constant 0 : index
    %75 = vector.load %arg7[%c0_42, %c0_43, %c0_44] : memref<1x1x128xf32, #tpu.memory_space<vmem>>, vector<1x1x128xf32>
    %76 = vector.shape_cast %75 : vector<1x1x128xf32> to vector<1x128xf32>
    %77 = vector.shape_cast %74 : vector<1x128xf32> to vector<1x1x128xf32>
    tpu.vector_store %arg7[%c0_42, %c0_43, %c0_44], %77 {strides = array<i32>} : memref<1x1x128xf32, #tpu.memory_space<vmem>>, vector<1x1x128xf32>,
    return
  }
  func.func @transform_0(%arg0: i32) -> (i32, i32, i32) {
    %c0_i32 = arith.constant 0 : i32
    %c0_i32_0 = arith.constant 0 : i32
    %c0_i32_1 = arith.constant 0 : i32
    return %arg0, %c0_i32, %c0_i32_0 : i32, i32, i32
  }
  func.func @transform_1(%arg0: i32) -> (i32, i32, i32) {
    %c0_i32 = arith.constant 0 : i32
    %c0_i32_0 = arith.constant 0 : i32
    %c0_i32_1 = arith.constant 0 : i32
    %c0_i32_2 = arith.constant 0 : i32
    return %c0_i32, %c0_i32_0, %c0_i32_1 : i32, i32, i32
  }
  func.func @transform_2(%arg0: i32) -> (i32, i32) {
    %c0_i32 = arith.constant 0 : i32
    %c0_i32_0 = arith.constant 0 : i32
    %c0_i32_1 = arith.constant 0 : i32
    return %c0_i32, %c0_i32_0 : i32, i32
  }
  func.func @transform_3(%arg0: i32) -> (i32, i32) {
    %c0_i32 = arith.constant 0 : i32
    %c0_i32_0 = arith.constant 0 : i32
    return %arg0, %c0_i32 : i32, i32
  }
  func.func @transform_4(%arg0: i32) -> (i32, i32) {
    %c0_i32 = arith.constant 0 : i32
    %c0_i32_0 = arith.constant 0 : i32
    return %arg0, %c0_i32 : i32, i32
  }
  func.func @transform_5(%arg0: i32) -> (i32, i32, i32) {
    %c0_i32 = arith.constant 0 : i32
    %c0_i32_0 = arith.constant 0 : i32
    %c0_i32_1 = arith.constant 0 : i32
    return %arg0, %c0_i32, %c0_i32_0 : i32, i32, i32
  }
  func.func @transform_6(%arg0: i32) -> (i32, i32, i32) {
    %c0_i32 = arith.constant 0 : i32
    %c0_i32_0 = arith.constant 0 : i32
    %c0_i32_1 = arith.constant 0 : i32
    return %arg0, %c0_i32, %c0_i32_0 : i32, i32, i32
  }
}

module attributes {stable_mosaic.version = 11 : i64} {
  func.func @_stage3_kernel(%arg0: i32, %arg1: memref<192x128xf32, #tpu.memory_space<vmem>>, %arg2: memref<192x128xf32, #tpu.memory_space<vmem>>, %arg3: memref<1x128xf32, #tpu.memory_space<vmem>>, %arg4: memref<1x128xf32, #tpu.memory_space<vmem>>, %arg5: memref<192x128xf32, #tpu.memory_space<vmem>>) attributes {dimension_semantics = [#tpu.dimension_semantics<parallel>], iteration_bounds = array<i64: 3>, scalar_prefetch = 0 : i64, scratch_operands = 0 : i64, tpu.core_type = #tpu.core_type<tc>, window_params = [{transform_indices = @transform_0, window_bounds = array<i64: 192, 128>}, {transform_indices = @transform_1, window_bounds = array<i64: 192, 128>}, {pipeline_mode = #tpu.pipeline_mode<synchronous>, transform_indices = @transform_2, window_bounds = array<i64: 1, 128>}, {pipeline_mode = #tpu.pipeline_mode<synchronous>, transform_indices = @transform_3, window_bounds = array<i64: 1, 128>}, {transform_indices = @transform_4, window_bounds = array<i64: 192, 128>}]} {
    %c0 = arith.constant 0 : index
    %c0_0 = arith.constant 0 : index
    %0 = vector.load %arg2[%c0, %c0_0] : memref<192x128xf32, #tpu.memory_space<vmem>>, vector<192x128xf32>
    %c0_1 = arith.constant 0 : index
    %c0_2 = arith.constant 0 : index
    %1 = vector.load %arg1[%c0_1, %c0_2] : memref<192x128xf32, #tpu.memory_space<vmem>>, vector<192x128xf32>
    %c0_3 = arith.constant 0 : index
    %c0_4 = arith.constant 0 : index
    %2 = vector.load %arg3[%c0_3, %c0_4] : memref<1x128xf32, #tpu.memory_space<vmem>>, vector<1x128xf32>
    %3 = vector.broadcast %2 : vector<1x128xf32> to vector<192x128xf32>
    %4 = arith.mulf %1, %3 : vector<192x128xf32>
    %5 = arith.addf %0, %4 : vector<192x128xf32>
    %c0_5 = arith.constant 0 : index
    %c0_6 = arith.constant 0 : index
    %6 = vector.load %arg4[%c0_5, %c0_6] : memref<1x128xf32, #tpu.memory_space<vmem>>, vector<1x128xf32>
    %7 = vector.broadcast %6 : vector<1x128xf32> to vector<192x128xf32>
    %8 = arith.addf %5, %7 : vector<192x128xf32>
    %c0_7 = arith.constant 0 : index
    %c0_8 = arith.constant 0 : index
    %9 = vector.load %arg5[%c0_7, %c0_8] : memref<192x128xf32, #tpu.memory_space<vmem>>, vector<192x128xf32>
    tpu.vector_store %arg5[%c0_7, %c0_8], %8 {strides = array<i32>} : memref<192x128xf32, #tpu.memory_space<vmem>>, vector<192x128xf32>,
    return
  }
  func.func @transform_0(%arg0: i32) -> (i32, i32) {
    %c0_i32 = arith.constant 0 : i32
    %c0_i32_0 = arith.constant 0 : i32
    return %arg0, %c0_i32 : i32, i32
  }
  func.func @transform_1(%arg0: i32) -> (i32, i32) {
    %c0_i32 = arith.constant 0 : i32
    %c0_i32_0 = arith.constant 0 : i32
    return %arg0, %c0_i32 : i32, i32
  }
  func.func @transform_2(%arg0: i32) -> (i32, i32) {
    %c0_i32 = arith.constant 0 : i32
    %c0_i32_0 = arith.constant 0 : i32
    %c0_i32_1 = arith.constant 0 : i32
    return %c0_i32, %c0_i32_0 : i32, i32
  }
  func.func @transform_3(%arg0: i32) -> (i32, i32) {
    %c0_i32 = arith.constant 0 : i32
    %c0_i32_0 = arith.constant 0 : i32
    %c0_i32_1 = arith.constant 0 : i32
    return %c0_i32, %c0_i32_0 : i32, i32
  }
  func.func @transform_4(%arg0: i32) -> (i32, i32) {
    %c0_i32 = arith.constant 0 : i32
    %c0_i32_0 = arith.constant 0 : i32
    return %arg0, %c0_i32 : i32, i32
  }
}

</mosaic_0001>

<bundles_post_ra>
// kernel: res_block_batchnorm.4
= control target key start
LH: loop header
LB: loop body
LE: loop exit
PB: predicated region body
PF: predicated region fallthrough
CT: control target
= control target key end

     0   :  { %s1318_s27 = smov 0   ;;  %s1615_s0 = inlined_call_operand.vmem [shape: bf16[576,128], index: 0, kind: input, shape index: {}]   ;;  %s1616_s1 = inlined_call_operand.vmem [shape: f32[576,1], index: 1, kind: input, shape index: {}]   ;;  %s1617_s2 = inlined_call_operand.vmem [shape: f32[1,128], index: 2, kind: input, shape index: {}]   ;;  %s1618_s3 = inlined_call_operand.vmem [shape: f32[1,128], index: 3, kind: input, shape index: {}]   ;;  %s1619_s4 = inlined_call_operand.vmem [shape: bf16[128,128], index: 4, kind: input, shape index: {}]   ;;  %s1620_s5 = inlined_call_operand.vmem [shape: f32[1,128], index: 5, kind: input, shape index: {}]   ;;  %s1621_s6 = inlined_call_operand.vmem [shape: f32[576,128], index: 6, kind: output, shape index: {0}]   ;;  %s1622_s7 = inlined_call_operand.vmem [shape: f32[3,1,128], index: 7, kind: output, shape index: {1}]   ;;  %s1623_s8 = inlined_call_operand.vmem [shape: f32[3,1,128], index: 8, kind: output, shape index: {2}]  }
   0x1 LB: > { %s1324_s28 = sadd.s32 4294967295, %s1270_s27   ;;  %p1093_p0 = scmp.ge.s32.totalorder %s1270_s27, 1  ;;  %s1270_s27 = sphi %s1318_s27, %s19_s27  }
   0x2   : > { %p279_p1 = scmp.lt.s32.totalorder %s1270_s27, 4 }
   0x4   : > { %p280_p2 = pnand %p1093_p0, %p279_p1 }
   0x5   : > { %v1256_v0 = vld [vmem:[%s1619_s4] sm:$0xff] (!%p280_p2)   ;;  %s324_s9 = smul.u32 (!%p280_p2), 24, %s1324_s28  ;;  %v1257_v1 = vld [vmem:[%s1619_s4 + $0x8] sm:$0xff] (!%p280_p2)   ;;  %v1258_v2 = vld [vmem:[%s1619_s4 + $0x10] sm:$0xff] (!%p280_p2)   ;;  %v1272_v3 = vmov (!%p280_p2), 0   ;;  %p342_p4 = scmp.lt.s32.totalorder (!%p280_p2), %s1324_s28, 2 }
   0x6   : > { %283 = sbr.rel (%p280_p2) target bundleno = 321 (0x141), region = 44  ;;  %1189 = vmatprep.subr.bf16.mxu0 (!%p280_p2), %v1256_v0  ;;  %1229 = vmatprep.subr.bf16.mxu1 (!%p280_p2), %v1256_v0  ;;  %v1259_v4 = vld [vmem:[%s1619_s4 + $0x18] sm:$0xff] (!%p280_p2)   ;;  %v1354_v6 = vld [vmem:[%s1617_s2] ss:$0 sm:$0xff] (!%p280_p2)  ;;  %v1261_v43 = vld [vmem:[%s1619_s4 + $0x28] sm:$0xff] (!%p280_p2)  }
   0x7   : > { %p325_p3 = scmp.lt.s32.totalorder (!%p280_p2), %s324_s9, 71  ;;  %1190 = vmatpush3.bf16.msra.mxu0 (!%p280_p2), %v1256_v0  ;;  %1237 = vmatpush3.bf16.msra.mxu1 (!%p280_p2), %v1256_v0  ;;  %v1369_v12 = vld [vmem:[%s1618_s3] ss:$0 sm:$0xff] (!%p280_p2)  ;;  %v1262_v62 = vld [vmem:[%s1619_s4 + $0x30] sm:$0xff] (!%p280_p2)  }
   0x8   : > { %1191 = vmatprep.subr.bf16.mxu0 (!%p280_p2), %v1257_v1  ;;  %1230 = vmatprep.subr.bf16.mxu1 (!%p280_p2), %v1257_v1  ;;  %v1260_v22 = vld [vmem:[%s1619_s4 + $0x20] sm:$0xff] (!%p280_p2)  }
   0x9   : > { %1254 = vset.pattern.permute.xlu0 (!%p280_p2), %v1272_v3  ;;  %1255 = vset.pattern.permute.xlu1 (!%p280_p2), %v1272_v3 }
   0xb   : > { %1192 = vmatpush3.bf16.msra.mxu0 (!%p280_p2), %v1257_v1  ;;  %1238 = vmatpush3.bf16.msra.mxu1 (!%p280_p2), %v1257_v1 }
   0xc   : > { %1193 = vmatprep.subr.bf16.mxu0 (!%p280_p2), %v1258_v2  ;;  %1231 = vmatprep.subr.bf16.mxu1 (!%p280_p2), %v1258_v2 }
   0xd   : > { %s1625_s9 = smov (!%p325_p3, %s324_s9), 71  ;;  %s1627_s28 = smov (!%p342_p4, %s1324_s28), 2 }
   0xe   : > { %s1094_s14 = sshll.u32 %s1625_s9, 2  ;;  %s1095_s18 = sshll.u32 %s1625_s9, 3 }
   0xf   : > { %s1344_s17 = scalar_lea.vmem %s1615_s0, %s1094_s14  ;;  %s1361_s25 = scalar_lea.vmem %s1616_s1, %s1095_s18  ;;  %1194 = vmatpush3.bf16.msra.mxu0 %v1258_v2  ;;  %1239 = vmatpush3.bf16.msra.mxu1 %v1258_v2 }
  0x10   : > { %v1111_v5 = vld [vmem:[%s1344_s17] sm:$0xff]   ;;  %v1163_v9 = vld [vmem:[%s1344_s17 + $0x30] sm:$0xff]   ;;  %v1158_v10 = vld [vmem:[%s1344_s17 + $0x8] sm:$0xff]   ;;  %1195 = vmatprep.subr.bf16.mxu0 %v1259_v4  ;;  %1232 = vmatprep.subr.bf16.mxu1 %v1259_v4  ;;  %s1484_s22 = scalar_lea.vmem %s1621_s6, %s1095_s18  ;;  %s344_s23 = scalar_lea.vmem %s1622_s7, %s1627_s28 }
  0x11   : > { %v1112_v7 = vunpack.c.l.bf16 %v1111_v5  ;;  %v1113_v8 = vunpack.c.h.bf16 %v1111_v5  ;;  %v1164_v11 = vld [vmem:[%s1344_s17 + $0x38] sm:$0xff]   ;;  %v1136_v13 = vunpack.c.l.bf16 %v1163_v9  ;;  %v1137_v14 = vunpack.c.h.bf16 %v1163_v9  ;;  %v1159_v17 = vld [vmem:[%s1344_s17 + $0x10] sm:$0xff]   ;;  %v719_v27 = vld [vmem:[%s1361_s25] sm:$0xff]  ;;  %s347_s26 = scalar_lea.vmem %s1623_s8, %s1627_s28 }
  0x12   : > { %v1116_v15 = vunpack.c.l.bf16 %v1158_v10  ;;  %v1117_v16 = vunpack.c.h.bf16 %v1158_v10  ;;  %v1140_v20 = vunpack.c.l.bf16 %v1164_v11  ;;  %v1141_v21 = vunpack.c.h.bf16 %v1164_v11  ;;  %745 = vperm.xlu0 %1254, %v719_v27   ;;  %v721_v32 = vld [vmem:[%s1361_s25 + $0x10] sm:$0xff]  ;;  %v720_v37 = vld [vmem:[%s1361_s25 + $0x8] sm:$0xff]  ;;  %v1165_v41 = vld [vmem:[%s1344_s17 + $0x40] sm:$0xff]  }
  0x13   : > { %v404_v18 = vmul.f32 %v1112_v7, %v1354_v6  ;;  %v405_v19 = vmul.f32 %v1113_v8, %v1354_v6  ;;  %v416_v23 = vmul.f32 %v1136_v13, %v1354_v6  ;;  %v417_v24 = vmul.f32 %v1137_v14, %v1354_v6  ;;  %755 = vperm.xlu1 %1255, %v721_v32   ;;  %v722_v42 = vld [vmem:[%s1361_s25 + $0x18] sm:$0xff]  ;;  %v1166_v55 = vld [vmem:[%s1344_s17 + $0x48] sm:$0xff]   ;;  %v723_v60 = vld [vmem:[%s1361_s25 + $0x20] sm:$0xff] }
  0x14   : > { %v406_v25 = vmul.f32 %v1116_v15, %v1354_v6  ;;  %v1120_v26 = vunpack.c.l.bf16 %v1159_v17  ;;  %v407_v30 = vmul.f32 %v1117_v16, %v1354_v6  ;;  %v418_v31 = vmul.f32 %v1140_v20, %v1354_v6  ;;  %1196 = vmatpush3.bf16.msra.mxu0 %v1259_v4  ;;  %1240 = vmatpush3.bf16.msra.mxu1 %v1259_v4  ;;  %v1160_v47 = vld [vmem:[%s1344_s17 + $0x18] sm:$0xff]   ;;  %v724_v61 = vld [vmem:[%s1361_s25 + $0x28] sm:$0xff]  ;;  %v1161_v8 = vld [vmem:[%s1344_s17 + $0x20] sm:$0xff]  }
  0x15   : > { %v435_v28 = vadd.f32 %v1369_v12, %v404_v18  ;;  %v436_v29 = vadd.f32 %v1369_v12, %v405_v19  ;;  %v447_v33 = vadd.f32 %v1369_v12, %v416_v23  ;;  %v448_v34 = vadd.f32 %v1369_v12, %v417_v24  ;;  %1197 = vmatprep.subr.bf16.mxu0 %v1260_v22  ;;  %v725_v15 = vld [vmem:[%s1361_s25 + $0x30] sm:$0xff]  ;;  %v726_v16 = vld [vmem:[%s1361_s25 + $0x38] sm:$0xff] }
  0x16   : > { %v1389_v35 = vadd.f32 %v1369_v12, %v406_v25  ;;  %v419_v36 = vmul.f32 %v1141_v21, %v1354_v6  ;;  %v438_v40 = vadd.f32 %v1369_v12, %v407_v30  ;;  %1233 = vmatprep.subr.bf16.mxu1 %v1260_v22  ;;  %v449_v46 = vadd.f32 %v1369_v12, %v418_v31  ;;  %v1162_v30 = vld [vmem:[%s1344_s17 + $0x28] sm:$0xff]  }
  0x17   : > { %v459_v38 = vmax.f32 %v435_v28, 0.0  ;;  %v460_v39 = vmax.f32 %v436_v29, 0.0  ;;  %v471_v44 = vmax.f32 %v447_v33, 0.0  ;;  %v472_v45 = vmax.f32 %v448_v34, 0.0  ;;  %750 = vperm.xlu0 %1254, %v720_v37   ;;  %760 = vperm.xlu1 %1255, %v722_v42   ;;  %v728_v37 = vld [vmem:[%s1361_s25 + $0x48] sm:$0xff] }
  0x18   : > { %v450_v49 = vadd.f32 %v1369_v12, %v419_v36  ;;  %v1121_v50 = vunpack.c.h.bf16 %v1159_v17  ;;  %v461_v52 = vmax.f32 %v1389_v35, 0.0  ;;  %v408_v53 = vmul.f32 %v1120_v26, %v1354_v6  ;;  %1198 = vmatpush3.bf16.msra.mxu0 %v1260_v22  ;;  %1241 = vmatpush3.bf16.msra.mxu1 %v1260_v22  ;;  %v1263_v17 = vld [vmem:[%s1619_s4 + $0x38] sm:$0xff]   ;;  %v1167_v22 = vld [vmem:[%s1344_s17 + $0x50] sm:$0xff]   ;;  %v727_v36 = vld [vmem:[%s1361_s25 + $0x40] sm:$0xff] }
  0x19   : > { %v483_v48 = vpack.c.bf16 %v460_v39, %v459_v38  ;;  %v489_v51 = vpack.c.bf16 %v472_v45, %v471_v44  ;;  %v1144_v54 = vunpack.c.l.bf16 %v1165_v41  ;;  %v462_v56 = vmax.f32 %v438_v40, 0.0  ;;  %1199 = vmatprep.subr.bf16.mxu0 %v1261_v43  ;;  %1234 = vmatprep.subr.bf16.mxu1 %v1261_v43  ;;  %v1168_v35 = vld [vmem:[%s1344_s17 + $0x58] sm:$0xff]  }
  0x1a   : > { %v409_v57 = vmul.f32 %v1121_v50, %v1354_v6  ;;  %v1145_v58 = vunpack.c.h.bf16 %v1165_v41  ;;  %v1124_v59 = vunpack.c.l.bf16 %v1160_v47  ;;  %v473_v63 = vmax.f32 %v449_v46, 0.0 }
  0x1b   : > { %v439_v0 = vadd.f32 %v1369_v12, %v408_v53  ;;  %v420_v1 = vmul.f32 %v1144_v54, %v1354_v6  ;;  %v1125_v2 = vunpack.c.h.bf16 %v1160_v47  ;;  %1205 = vmatprep.mubr.bf16.mxu0 %v483_v48  ;;  %1217 = vmatprep.mubr.bf16.mxu1 %v489_v51  ;;  %v474_v3 = vmax.f32 %v450_v49, 0.0 }
  0x1c   : > { %v440_v4 = vadd.f32 %v1369_v12, %v409_v57  ;;  %v421_v5 = vmul.f32 %v1145_v58, %v1354_v6  ;;  %v1148_v7 = vunpack.c.l.bf16 %v1166_v55  ;;  %v1149_v10 = vunpack.c.h.bf16 %v1166_v55  ;;  %765 = vperm.xlu0 %1254, %v723_v60   ;;  %770 = vperm.xlu1 %1255, %v724_v61   ;;  %v729_v58 = vld [vmem:[%s1361_s25 + $0x50] sm:$0xff] }
  0x1d   : > { %v451_v9 = vadd.f32 %v1369_v12, %v420_v1  ;;  %1200 = vmatpush3.bf16.msra.mxu0 %v1261_v43  ;;  %1242 = vmatpush3.bf16.msra.mxu1 %v1261_v43  ;;  %v410_v13 = vmul.f32 %v1124_v59, %v1354_v6  ;;  %v411_v14 = vmul.f32 %v1125_v2, %v1354_v6  ;;  %v463_v18 = vmax.f32 %v439_v0, 0.0  ;;  %v730_v59 = vld [vmem:[%s1361_s25 + $0x58] sm:$0xff] }
  0x1e   : > { %v452_v11 = vadd.f32 %v1369_v12, %v421_v5  ;;  %1201 = vmatprep.subr.bf16.mxu0 %v1262_v62  ;;  %1235 = vmatprep.subr.bf16.mxu1 %v1262_v62  ;;  %v464_v19 = vmax.f32 %v440_v4, 0.0  ;;  %v422_v20 = vmul.f32 %v1148_v7, %v1354_v6  ;;  %v1128_v21 = vunpack.c.l.bf16 %v1161_v8  ;;  %v731_v5 = vld [vmem:[%s1361_s25 + $0x60] sm:$0xff]  ;;  %v732_v7 = vld [vmem:[%s1361_s25 + $0x68] sm:$0xff] }
  0x1f   : > { %v484_v23 = vpack.c.bf16 %v462_v56, %v461_v52  ;;  %v490_v24 = vpack.c.bf16 %v474_v3, %v473_v63  ;;  %v423_v25 = vmul.f32 %v1149_v10, %v1354_v6  ;;  %v475_v26 = vmax.f32 %v451_v9, 0.0 }
  0x20   : > { %v476_v27 = vmax.f32 %v452_v11, 0.0  ;;  %v1129_v28 = vunpack.c.h.bf16 %v1161_v8  ;;  %v412_v29 = vmul.f32 %v1128_v21, %v1354_v6  ;;  %775 = vperm.xlu0 %1254, %v725_v15   ;;  %780 = vperm.xlu1 %1255, %v726_v16   ;;  %v441_v31 = vadd.f32 %v1369_v12, %v410_v13  ;;  %v734_v15 = vld [vmem:[%s1361_s25 + $0x78] sm:$0xff] }
  0x21   : > { %1202 = vmatpush3.bf16.msra.mxu0 %v1262_v62  ;;  %1243 = vmatpush3.bf16.msra.mxu1 %v1262_v62  ;;  %v442_v32 = vadd.f32 %v1369_v12, %v411_v14  ;;  %v1152_v33 = vunpack.c.l.bf16 %v1167_v22  ;;  %v1153_v34 = vunpack.c.h.bf16 %v1167_v22  ;;  %v485_v38 = vpack.c.bf16 %v464_v19, %v463_v18  ;;  %v733_v14 = vld [vmem:[%s1361_s25 + $0x70] sm:$0xff] }
  0x22   : > { %1203 = vmatprep.subr.bf16.mxu0 %v1263_v17  ;;  %1236 = vmatprep.subr.bf16.mxu1 %v1263_v17  ;;  %v453_v39 = vadd.f32 %v1369_v12, %v422_v20  ;;  %v413_v40 = vmul.f32 %v1129_v28, %v1354_v6  ;;  %v454_v41 = vadd.f32 %v1369_v12, %v423_v25  ;;  %v1132_v44 = vunpack.c.l.bf16 %v1162_v30  ;;  %v736_v20 = vld [vmem:[%s1361_s25 + $0x88] sm:$0xff]  ;;  %v739_v25 = vld [vmem:[%s1361_s25 + $0xa0] sm:$0xff]  ;;  %v742_v28 = vld [vmem:[%s1361_s25 + $0xb8] sm:$0xff] }
  0x23   : > { %v424_v42 = vmul.f32 %v1152_v33, %v1354_v6  ;;  %v425_v43 = vmul.f32 %v1153_v34, %v1354_v6  ;;  %v491_v45 = vpack.c.bf16 %v476_v27, %v475_v26  ;;  %v443_v46 = vadd.f32 %v1369_v12, %v412_v29  ;;  %v740_v26 = vld [vmem:[%s1361_s25 + $0xa8] sm:$0xff]  ;;  %v741_v27 = vld [vmem:[%s1361_s25 + $0xb0] sm:$0xff] }
  0x24   : > { %v1133_v47 = vunpack.c.h.bf16 %v1162_v30  ;;  %v1156_v48 = vunpack.c.l.bf16 %v1168_v35  ;;  %785 = vperm.xlu0 %1254, %v727_v36   ;;  %790 = vperm.xlu1 %1255, %v728_v37   ;;  %v444_v49 = vadd.f32 %v1369_v12, %v413_v40  ;;  %v1157_v52 = vunpack.c.h.bf16 %v1168_v35  ;;  %v1473_v36 = vld [vmem:[%s1620_s5] ss:$0 sm:$0xff] }
  0x25   : > { %1204 = vmatpush3.bf16.msra.mxu0 %v1263_v17  ;;  %1244 = vmatpush3.bf16.msra.mxu1 %v1263_v17  ;;  %v455_v50 = vadd.f32 %v1369_v12, %v424_v42  ;;  %v456_v51 = vadd.f32 %v1369_v12, %v425_v43  ;;  %v465_v53 = vmax.f32 %v441_v31, 0.0  ;;  %v466_v54 = vmax.f32 %v442_v32, 0.0 }
  0x26   : > { %v477_v55 = vmax.f32 %v453_v39, 0.0  ;;  %v478_v56 = vmax.f32 %v454_v41, 0.0  ;;  %v414_v57 = vmul.f32 %v1132_v44, %v1354_v6  ;;  %v415_v60 = vmul.f32 %v1133_v47, %v1354_v6 }
  0x27   : > { %v426_v61 = vmul.f32 %v1156_v48, %v1354_v6  ;;  %v427_v62 = vmul.f32 %v1157_v52, %v1354_v6  ;;  %v467_v63 = vmax.f32 %v443_v46, 0.0  ;;  %v468_v0 = vmax.f32 %v444_v49, 0.0 }
  0x28   : > { %1206 = vmatmul.mubr.bf16.vlgmr.msra.gmra.mrb[0].mxu0 %v484_v23  ;;  %1218 = vmatmul.mubr.bf16.vlgmr.msra.gmra.mrb[0].mxu1 %v490_v24  ;;  %v479_v1 = vmax.f32 %v455_v50, 0.0  ;;  %v480_v2 = vmax.f32 %v456_v51, 0.0  ;;  %v486_v3 = vpack.c.bf16 %v466_v54, %v465_v53  ;;  %v492_v4 = vpack.c.bf16 %v478_v56, %v477_v55  ;;  %v737_v23 = vld [vmem:[%s1361_s25 + $0x90] sm:$0xff]  ;;  %v738_v24 = vld [vmem:[%s1361_s25 + $0x98] sm:$0xff] }
  0x29   : > { %1209 = vmatprep.mubr.bf16.mxu0 %v485_v38  ;;  %1221 = vmatprep.mubr.bf16.mxu1 %v491_v45  ;;  %v445_v8 = vadd.f32 %v1369_v12, %v414_v57  ;;  %v446_v9 = vadd.f32 %v1369_v12, %v415_v60  ;;  %v457_v6 = vadd.f32 %v1369_v12, %v426_v61 }
  0x2a   : > { %795 = vperm.xlu0 %1254, %v729_v58   ;;  %800 = vperm.xlu1 %1255, %v730_v59   ;;  %v458_v10 = vadd.f32 %v1369_v12, %v427_v62  ;;  %v487_v11 = vpack.c.bf16 %v468_v0, %v467_v63  ;;  %v493_v13 = vpack.c.bf16 %v480_v2, %v479_v1  ;;  %v735_v12 = vld [vmem:[%s1361_s25 + $0x80] sm:$0xff] }
  0x2b   : > { %v469_v16 = vmax.f32 %v445_v8, 0.0  ;;  %v470_v17 = vmax.f32 %v446_v9, 0.0  ;;  %v481_v18 = vmax.f32 %v457_v6, 0.0 }
  0x2c   : > { %v482_v19 = vmax.f32 %v458_v10, 0.0 }
  0x2d   : > { %v488_v21 = vpack.c.bf16 %v470_v17, %v469_v16 }
  0x2e   : > { %805 = vperm.xlu0 %1254, %v731_v5   ;;  %810 = vperm.xlu1 %1255, %v732_v7   ;;  %v494_v22 = vpack.c.bf16 %v482_v19, %v481_v18 }
  0x30   : > { %1210 = vmatmul.mubr.bf16.gmra.mrb[4].mxu0 %v486_v3  ;;  %1222 = vmatmul.mubr.bf16.gmra.mrb[4].mxu1 %v492_v4 }
  0x31   : > { %1213 = vmatprep.mubr.bf16.mxu0 %v487_v11  ;;  %1225 = vmatprep.mubr.bf16.mxu1 %v493_v13 }
  0x32   : > { %815 = vperm.xlu0 %1254, %v733_v14   ;;  %820 = vperm.xlu1 %1255, %v734_v15  }
  0x36   : > { %825 = vperm.xlu0 %1254, %v735_v12   ;;  %830 = vperm.xlu1 %1255, %v736_v20  }
  0x38   : > { %1214 = vmatmul.mubr.bf16.gmra.mrb[8].mxu0 %v488_v21  ;;  %1226 = vmatmul.mubr.bf16.gmra.mrb[8].mxu1 %v494_v22 }
  0x3a   : > { %835 = vperm.xlu0 %1254, %v737_v23   ;;  %840 = vperm.xlu1 %1255, %v738_v24  }
  0x3e   : > { %845 = vperm.xlu0 %1254, %v739_v25   ;;  %850 = vperm.xlu1 %1255, %v740_v26  }
  0x42   : > { %855 = vperm.xlu0 %1254, %v741_v27   ;;  %860 = vperm.xlu1 %1255, %v742_v28  }
  0x91   : > { %v746_v29 = vpop.permute.xlu0 %745 }
  0x92   : > { %v756_v30 = vpop.permute.xlu1 %755 }
  0x96   : > { %v751_v31 = vpop.permute.xlu0 %750  ;;  %v761_v32 = vpop.permute.xlu1 %760 }
  0x9b   : > { %v766_v33 = vpop.permute.xlu0 %765  ;;  %v1466_v34 = vpop.permute.xlu1 %770 }
  0x9f   : > { %v1468_v35 = vpop.permute.xlu0 %775  ;;  %v1475_v37 = vpop.permute.xlu1 %780 }
  0xa3   : > { %v1477_v38 = vpop.permute.xlu0 %785  ;;  %v1514_v58 = vpop.permute.xlu1 %790 }
  0xa9   : > { %v1516_v59 = vpop.permute.xlu0 %795  ;;  %v801_v21 = vpop.permute.xlu1 %800 }
  0xad   : > { %v806_v25 = vpop.permute.xlu0 %805 }
  0xfb   : > { %v1207_v39 = vpop.f32.mrb[0].mxu0  ;;  %v1219_v40 = vpop.f32.mrb[0].mxu1 }
  0xfc   : > { %v609_v41 = vadd.f32 %v1207_v39, %v1473_v36  ;;  %v1488_v42 = vadd.f32 %v1219_v40, %v1473_v36  ;;  %v600_v43 = vpop.f32.mrb[1].mxu0  ;;  %v648_v44 = vpop.f32.mrb[1].mxu1 }
  0xfd   : > { %v601_v45 = vadd.f32 %v1473_v36, %v600_v43  ;;  %v1492_v46 = vadd.f32 %v1473_v36, %v648_v44  ;;  %v1208_v47 = vpop.f32.mrb[2].mxu0  ;;  %v1220_v48 = vpop.f32.mrb[2].mxu1 }
  0xfe   : > { %697 = vst [vmem:[%s1484_s22 + $0x10] sm:$0xff] %v609_v41  ;;  %709 = vst [vmem:[%s1484_s22 + $0x70] sm:$0xff] %v1488_v42  ;;  %v612_v49 = vadd.f32 %v1208_v47, %v1473_v36  ;;  %v1499_v50 = vadd.f32 %v1220_v48, %v1473_v36  ;;  %v603_v51 = vpop.f32.mrb[3].mxu0  ;;  %v651_v52 = vpop.f32.mrb[3].mxu1  ;;  %v865_v56 = vmul.f32 %v756_v30, %v609_v41 }
  0xff   : > { %695 = vst [vmem:[%s1484_s22] sm:$0xff] %v601_v45  ;;  %v863_v53 = vmul.f32 %v746_v29, %v601_v45  ;;  %707 = vst [vmem:[%s1484_s22 + $0x60] sm:$0xff] %v1492_v46  ;;  %v604_v54 = vadd.f32 %v1473_v36, %v603_v51  ;;  %v1506_v55 = vadd.f32 %v1473_v36, %v651_v52  ;;  %v811_v52 = vpop.permute.xlu1 %810 }
 0x100   : > { %698 = vst [vmem:[%s1484_s22 + $0x18] sm:$0xff] %v612_v49  ;;  %710 = vst [vmem:[%s1484_s22 + $0x78] sm:$0xff] %v1499_v50  ;;  %v866_v61 = vmul.f32 %v761_v32, %v612_v49  ;;  %v919_v2 = vmul.f32 %v865_v56, %v609_v41 }
 0x101   : > { %696 = vst [vmem:[%s1484_s22 + $0x8] sm:$0xff] %v604_v54  ;;  %v864_v57 = vmul.f32 %v751_v31, %v604_v54  ;;  %708 = vst [vmem:[%s1484_s22 + $0x68] sm:$0xff] %v1506_v55  ;;  %v917_v60 = vmul.f32 %v863_v53, %v601_v45 }
 0x102   : > { %v920_v18 = vmul.f32 %v866_v61, %v612_v49 }
 0x103   : > { %v887_v62 = vadd.f32 %v864_v57, %v863_v53  ;;  %v918_v63 = vmul.f32 %v864_v57, %v604_v54  ;;  %v1211_v0 = vpop.f32.mrb[4].mxu0  ;;  %v1223_v1 = vpop.f32.mrb[4].mxu1 }
 0x104   : > { %v625_v3 = vadd.f32 %v1211_v0, %v1473_v36  ;;  %v1520_v4 = vadd.f32 %v1223_v1, %v1473_v36  ;;  %v616_v5 = vpop.f32.mrb[5].mxu0  ;;  %v664_v7 = vpop.f32.mrb[5].mxu1 }
 0x105   : > { %v888_v8 = vadd.f32 %v887_v62, %v865_v56  ;;  %v941_v9 = vadd.f32 %v918_v63, %v917_v60  ;;  %v617_v6 = vadd.f32 %v1473_v36, %v616_v5  ;;  %v1524_v10 = vadd.f32 %v1473_v36, %v664_v7  ;;  %v1212_v11 = vpop.f32.mrb[6].mxu0  ;;  %v1224_v13 = vpop.f32.mrb[6].mxu1 }
 0x106   : > { %701 = vst [vmem:[%s1484_s22 + $0x30] sm:$0xff] %v625_v3  ;;  %713 = vst [vmem:[%s1484_s22 + $0x90] sm:$0xff] %v1520_v4  ;;  %v628_v14 = vadd.f32 %v1212_v11, %v1473_v36  ;;  %v1531_v15 = vadd.f32 %v1224_v13, %v1473_v36  ;;  %v619_v16 = vpop.f32.mrb[7].mxu0  ;;  %v667_v17 = vpop.f32.mrb[7].mxu1  ;;  %v869_v31 = vmul.f32 %v1468_v35, %v625_v3 }
 0x107   : > { %v942_v19 = vadd.f32 %v941_v9, %v919_v2  ;;  %699 = vst [vmem:[%s1484_s22 + $0x20] sm:$0xff] %v617_v6  ;;  %v867_v12 = vmul.f32 %v766_v33, %v617_v6  ;;  %v889_v20 = vadd.f32 %v888_v8, %v866_v61  ;;  %711 = vst [vmem:[%s1484_s22 + $0x80] sm:$0xff] %v1524_v10  ;;  %v816_v1 = vpop.permute.xlu0 %815  ;;  %v821_v9 = vpop.permute.xlu1 %820 }
 0x108   : > { %702 = vst [vmem:[%s1484_s22 + $0x38] sm:$0xff] %v628_v14  ;;  %714 = vst [vmem:[%s1484_s22 + $0x98] sm:$0xff] %v1531_v15  ;;  %v620_v26 = vadd.f32 %v1473_v36, %v619_v16  ;;  %v1541_v27 = vadd.f32 %v1473_v36, %v667_v17  ;;  %v870_v43 = vmul.f32 %v1475_v37, %v628_v14 }
 0x109   : > { %v890_v22 = vadd.f32 %v889_v20, %v867_v12  ;;  %v921_v23 = vmul.f32 %v867_v12, %v617_v6  ;;  %v943_v24 = vadd.f32 %v942_v19, %v920_v18  ;;  %v923_v54 = vmul.f32 %v869_v31, %v625_v3 }
 0x10a   : > { %700 = vst [vmem:[%s1484_s22 + $0x28] sm:$0xff] %v620_v26  ;;  %v868_v32 = vmul.f32 %v1466_v34, %v620_v26  ;;  %712 = vst [vmem:[%s1484_s22 + $0x88] sm:$0xff] %v1541_v27  ;;  %v924_v61 = vmul.f32 %v870_v43, %v628_v14  ;;  %v875_v16 = vmul.f32 %v806_v25, %v1492_v46 }
 0x10b   : > { %v944_v28 = vadd.f32 %v943_v24, %v921_v23  ;;  %v1215_v29 = vpop.f32.mrb[8].mxu0  ;;  %v1227_v30 = vpop.f32.mrb[8].mxu1 }
 0x10c   : > { %v641_v33 = vadd.f32 %v1215_v29, %v1473_v36  ;;  %v1550_v39 = vadd.f32 %v1227_v30, %v1473_v36  ;;  %v632_v40 = vpop.f32.mrb[9].mxu0  ;;  %v680_v41 = vpop.f32.mrb[9].mxu1  ;;  %v891_v47 = vadd.f32 %v890_v22, %v868_v32  ;;  %v922_v48 = vmul.f32 %v868_v32, %v620_v26 }
 0x10d   : > { %v633_v44 = vadd.f32 %v1473_v36, %v632_v40  ;;  %v1555_v35 = vadd.f32 %v1473_v36, %v680_v41  ;;  %v1216_v45 = vpop.f32.mrb[10].mxu0  ;;  %v1228_v34 = vpop.f32.mrb[10].mxu1  ;;  %v929_v24 = vmul.f32 %v875_v16, %v1492_v46 }
 0x10e   : > { %705 = vst [vmem:[%s1484_s22 + $0x50] sm:$0xff] %v641_v33  ;;  %717 = vst [vmem:[%s1484_s22 + $0xb0] sm:$0xff] %v1550_v39  ;;  %v635_v49 = vpop.f32.mrb[11].mxu0  ;;  %v683_v51 = vpop.f32.mrb[11].mxu1  ;;  %v644_v53 = vadd.f32 %v1216_v45, %v1473_v36  ;;  %v892_v56 = vadd.f32 %v891_v47, %v869_v31  ;;  %v945_v57 = vadd.f32 %v944_v28, %v922_v48 }
 0x10f   : > { %703 = vst [vmem:[%s1484_s22 + $0x40] sm:$0xff] %v633_v44  ;;  %v871_v37 = vmul.f32 %v1477_v38, %v633_v44  ;;  %715 = vst [vmem:[%s1484_s22 + $0xa0] sm:$0xff] %v1555_v35  ;;  %v1566_v60 = vadd.f32 %v1228_v34, %v1473_v36  ;;  %v636_v38 = vadd.f32 %v1473_v36, %v635_v49  ;;  %v826_v19 = vpop.permute.xlu0 %825  ;;  %v831_v23 = vpop.permute.xlu1 %830 }
 0x110   : > { %706 = vst [vmem:[%s1484_s22 + $0x58] sm:$0xff] %v644_v53  ;;  %v946_v62 = vadd.f32 %v945_v57, %v923_v54  ;;  %v893_v63 = vadd.f32 %v892_v56, %v870_v43  ;;  %v1573_v2 = vadd.f32 %v1473_v36, %v683_v51  ;;  %v873_v3 = vmul.f32 %v1516_v59, %v641_v33 }
 0x111   : > { %v925_v0 = vmul.f32 %v871_v37, %v633_v44  ;;  %718 = vst [vmem:[%s1484_s22 + $0xb8] sm:$0xff] %v1566_v60  ;;  %704 = vst [vmem:[%s1484_s22 + $0x48] sm:$0xff] %v636_v38  ;;  %v872_v8 = vmul.f32 %v1514_v58, %v636_v38  ;;  %v874_v11 = vmul.f32 %v801_v21, %v644_v53 }
 0x112   : > { %v894_v5 = vadd.f32 %v893_v63, %v871_v37  ;;  %v947_v7 = vadd.f32 %v946_v62, %v924_v61  ;;  %716 = vst [vmem:[%s1484_s22 + $0xa8] sm:$0xff] %v1573_v2  ;;  %v927_v17 = vmul.f32 %v873_v3, %v641_v33  ;;  %v876_v59 = vmul.f32 %v811_v52, %v1506_v55 }
 0x113   : > { %v926_v14 = vmul.f32 %v872_v8, %v636_v38  ;;  %v928_v12 = vmul.f32 %v874_v11, %v644_v53  ;;  %v877_v58 = vmul.f32 %v816_v1, %v1488_v42  ;;  %v878_v28 = vmul.f32 %v821_v9, %v1499_v50  ;;  %v836_v31 = vpop.permute.xlu0 %835  ;;  %v841_v43 = vpop.permute.xlu1 %840 }
 0x114   : > { %v948_v6 = vadd.f32 %v947_v7, %v925_v0  ;;  %v895_v13 = vadd.f32 %v894_v5, %v872_v8  ;;  %v930_v25 = vmul.f32 %v876_v59, %v1506_v55  ;;  %v879_v33 = vmul.f32 %v826_v19, %v1524_v10 }
 0x115   : > { %v931_v32 = vmul.f32 %v877_v58, %v1488_v42  ;;  %v932_v44 = vmul.f32 %v878_v28, %v1499_v50  ;;  %v880_v46 = vmul.f32 %v831_v23, %v1541_v27  ;;  %v881_v47 = vmul.f32 %v836_v31, %v1520_v4 }
 0x116   : > { %v896_v18 = vadd.f32 %v895_v13, %v873_v3  ;;  %v949_v36 = vadd.f32 %v948_v6, %v926_v14  ;;  %v933_v55 = vmul.f32 %v879_v33, %v1524_v10  ;;  %v882_v42 = vmul.f32 %v841_v43, %v1531_v15 }
 0x117   : > { %v846_v51 = vpop.permute.xlu0 %845  ;;  %v934_v52 = vmul.f32 %v880_v46, %v1541_v27  ;;  %v851_v54 = vpop.permute.xlu1 %850  ;;  %v935_v50 = vmul.f32 %v881_v47, %v1520_v4 }
 0x118   : > { %v897_v20 = vadd.f32 %v896_v18, %v874_v11  ;;  %v950_v22 = vadd.f32 %v949_v36, %v927_v17  ;;  %v883_v56 = vmul.f32 %v846_v51, %v1555_v35  ;;  %v936_v62 = vmul.f32 %v882_v42, %v1531_v15 }
 0x119   : > { %v884_v10 = vmul.f32 %v851_v54, %v1573_v2 }
 0x11a   : > { %v898_v26 = vadd.f32 %v897_v20, %v875_v16  ;;  %v951_v21 = vadd.f32 %v950_v22, %v928_v12  ;;  %v937_v27 = vmul.f32 %v883_v56, %v1555_v35 }
 0x11b   : > { %v856_v38 = vpop.permute.xlu0 %855  ;;  %v861_v7 = vpop.permute.xlu1 %860  ;;  %v938_v9 = vmul.f32 %v884_v10, %v1573_v2 }
 0x11c   : > { %v899_v29 = vadd.f32 %v898_v26, %v876_v59  ;;  %v952_v30 = vadd.f32 %v951_v21, %v929_v24  ;;  %v885_v1 = vmul.f32 %v856_v38, %v1550_v39  ;;  %v886_v4 = vmul.f32 %v861_v7, %v1566_v60 }
 0x11e   : > { %v900_v40 = vadd.f32 %v899_v29, %v877_v58  ;;  %v953_v41 = vadd.f32 %v952_v30, %v930_v25  ;;  %v939_v6 = vmul.f32 %v885_v1, %v1550_v39  ;;  %v940_v14 = vmul.f32 %v886_v4, %v1566_v60 }
 0x120   : > { %v954_v45 = vadd.f32 %v953_v41, %v931_v32  ;;  %v901_v34 = vadd.f32 %v900_v40, %v878_v28 }
 0x122   : > { %v902_v48 = vadd.f32 %v901_v34, %v879_v33  ;;  %v955_v49 = vadd.f32 %v954_v45, %v932_v44 }
 0x124   : > { %v903_v37 = vadd.f32 %v902_v48, %v880_v46  ;;  %v956_v53 = vadd.f32 %v955_v49, %v933_v55 }
 0x126   : > { %v904_v57 = vadd.f32 %v903_v37, %v881_v47  ;;  %v957_v61 = vadd.f32 %v956_v53, %v934_v52 }
 0x128   : > { %v905_v63 = vadd.f32 %v904_v57, %v882_v42  ;;  %v958_v0 = vadd.f32 %v957_v61, %v935_v50 }
 0x12a   : > { %v906_v3 = vadd.f32 %v905_v63, %v883_v56  ;;  %v959_v5 = vadd.f32 %v958_v0, %v936_v62 }
 0x12c   : > { %v907_v8 = vadd.f32 %v906_v3, %v884_v10  ;;  %v960_v15 = vadd.f32 %v959_v5, %v937_v27 }
 0x12e   : > { %v908_v11 = vadd.f32 %v907_v8, %v885_v1  ;;  %v961_v13 = vadd.f32 %v960_v15, %v938_v9 }
 0x130   : > { %v909_v16 = vadd.f32 %v908_v11, %v886_v4  ;;  %v962_v17 = vadd.f32 %v961_v13, %v939_v6 }
 0x132   : > { %v910_v35 = vrot.slane %v909_v16, 4  ;;  %v963_v18 = vadd.f32 %v962_v17, %v940_v14 }
 0x134   : > { %v911_v36 = vadd.f32 %v910_v35, %v909_v16  ;;  %v964_v19 = vrot.slane %v963_v18, 4 }
 0x136   : > { %v912_v59 = vrot.slane %v911_v36, 2  ;;  %v965_v12 = vadd.f32 %v964_v19, %v963_v18 }
 0x138   : > { %v913_v20 = vadd.f32 %v912_v59, %v911_v36  ;;  %v966_v22 = vrot.slane %v965_v12, 2 }
 0x13a   : > { %v914_v2 = vrot.slane %v913_v20, 1  ;;  %v967_v23 = vadd.f32 %v966_v22, %v965_v12 }
 0x13c   : > { %v915_v39 = vadd.f32 %v914_v2, %v913_v20  ;;  %v968_v60 = vrot.slane %v967_v23, 1 }
 0x13e   : > { %916 = vst [vmem:[%s344_s23] sm:$0x1] %v915_v39  ;;  %v969_v58 = vadd.f32 %v968_v60, %v967_v23 }
 0x140   : > { %970 = vst [vmem:[%s347_s26] sm:$0x1] %v969_v58 }
 0x141 PF: > { %s19_s27 = sadd.s32 1, %s1270_s27  }
 0x142   : > { %p16_p5 = scmp.ge.s32.totalorder %s19_s27, 5  }
 0x144   :  { %18 = sbr.rel (!%p16_p5) target bundleno = 1 (0x1), region = 101 }

// kernel: res_block_batchnorm.3
= control target key start
LH: loop header
LB: loop body
LE: loop exit
PB: predicated region body
PF: predicated region fallthrough
CT: control target
= control target key end

     0   :  { %s5650_s21 = smov 0   ;;  %s6819_s0 = inlined_call_operand.vmem [shape: f32[2,326,128], index: 0, kind: input, shape index: {}]   ;;  %s6820_s1 = inlined_call_operand.vmem [shape: bf16[9,128,128], index: 1, kind: input, shape index: {}]   ;;  %s6821_s2 = inlined_call_operand.vmem [shape: f32[1,128], index: 2, kind: input, shape index: {}]   ;;  %s6822_s3 = inlined_call_operand.vmem [shape: f32[576,1], index: 3, kind: input, shape index: {}]   ;;  %s6823_s4 = inlined_call_operand.vmem [shape: bf16[576,128], index: 4, kind: output, shape index: {0}]   ;;  %s6824_s5 = inlined_call_operand.vmem [shape: f32[2,1,128], index: 5, kind: output, shape index: {1}]   ;;  %s6825_s6 = inlined_call_operand.vmem [shape: f32[2,1,128], index: 6, kind: output, shape index: {2}]  }
   0x1 LB: > { %s5656_s22 = sadd.s32 4294967295, %s5612_s21   ;;  %p4122_p0 = scmp.ge.s32.totalorder %s5612_s21, 1  ;;  %s5612_s21 = sphi %s5650_s21, %s17_s21  }
   0x2   : > { %p228_p1 = scmp.lt.s32.totalorder %s5612_s21, 3 }
   0x4   : > { %p229_p2 = pnand %p4122_p0, %p228_p1 }
   0x6   : > { %232 = sbr.rel (%p229_p2) target bundleno = 609 (0x261), region = 36 }
   0xd   : > { %v5526_v0 = vld [vmem:[%s6820_s1 + $0x40] sm:$0xff]   ;;  %p269_p3 = scmp.lt.s32.totalorder %s5656_s22, 1  ;;  %v5528_v2 = vld [vmem:[%s6820_s1 + $0x48] sm:$0xff]   ;;  %v5530_v4 = vld [vmem:[%s6820_s1 + $0x50] sm:$0xff]   ;;  %vm427_vm0 = vsmask.f32 7424 }
   0xe   : > { %v5527_v1 = vld [vmem:[%s6820_s1 + $0x100] sm:$0xff]   ;;  %4742 = vmatprep.subr.bf16.mxu1 %v5526_v0  ;;  %v5529_v3 = vld [vmem:[%s6820_s1 + $0x108] sm:$0xff]   ;;  %v5531_v5 = vld [vmem:[%s6820_s1 + $0x110] sm:$0xff]   ;;  %vm1702_vm1 = vsmask.f32 6400  ;;  %vm2084_vm2 = vcmask 1045504  }
   0xf   : > { %4950 = vmatprep.subr.bf16.mxu0 %v5527_v1  ;;  %4743 = vmatpush3.bf16.msra.mxu1 %v5526_v0  ;;  %s5680_s11 = scalar_select %p269_p3, %s5656_s22, 1  ;;  %v5532_v6 = vld [vmem:[%s6820_s1 + $0x58] sm:$0xff]   ;;  %v5534_v8 = vld [vmem:[%s6820_s1 + $0x60] sm:$0xff]   ;;  %v5536_v10 = vld [vmem:[%s6820_s1 + $0x68] sm:$0xff]   ;;  %vm2706_vm3 = vsmask.f32 5376 }
  0x10   : > { %4951 = vmatpush3.bf16.msra.mxu0 %v5527_v1  ;;  %4744 = vmatprep.subr.bf16.mxu1 %v5528_v2  ;;  %v5533_v7 = vld [vmem:[%s6820_s1 + $0x118] sm:$0xff]   ;;  %v5535_v9 = vld [vmem:[%s6820_s1 + $0x120] sm:$0xff]   ;;  %v5537_v11 = vld [vmem:[%s6820_s1 + $0x128] sm:$0xff]   ;;  %vm1080_vm4 = vcmask 1046528   ;;  %s274_s19 = smul.u32 36, %s5656_s22  ;;  %vm3088_vm5 = vcmask 1044480  }
  0x11   : > { %4952 = vmatprep.subr.bf16.mxu0 %v5529_v3  ;;  %s5514_s16 = smul.u32 328, %s5680_s11  ;;  %v5538_v21 = vld [vmem:[%s6820_s1 + $0x70] sm:$0xff]   ;;  %v5540_v35 = vld [vmem:[%s6820_s1 + $0x78] sm:$0xff]   ;;  %v5542_v61 = vld [vmem:[%s6820_s1] sm:$0xff]   ;;  %s288_s12 = scalar_lea.vmem %s6824_s5, %s5680_s11 }
  0x12   : > { %v5539_v31 = vld [vmem:[%s6820_s1 + $0x130] sm:$0xff]   ;;  %v5541_v40 = vld [vmem:[%s6820_s1 + $0x138] sm:$0xff]   ;;  %v5543_v1 = vld [vmem:[%s6820_s1 + $0x140] sm:$0xff]   ;;  %p275_p4 = scmp.lt.s32.totalorder %s274_s19, 71  ;;  %s291_s14 = scalar_lea.vmem %s6825_s6, %s5680_s11 }
  0x13   : > { %4745 = vmatpush3.bf16.msra.mxu1 %v5528_v2  ;;  %s5698_s25 = scalar_lea.vmem %s6819_s0, %s5514_s16 }
  0x14   : > { %4953 = vmatpush3.bf16.msra.mxu0 %v5529_v3  ;;  %4746 = vmatprep.subr.bf16.mxu1 %v5530_v4  ;;  %v293_v12 = vld [vmem:[%s5698_s25] sm:$0xff]  ;;  %v294_v13 = vld [vmem:[%s5698_s25 + $0x8] sm:$0xff]  ;;  %v295_v14 = vld [vmem:[%s5698_s25 + $0x10] sm:$0xff]  ;;  %s6902_s19 = smov (!%p275_p4, %s274_s19), 71 }
  0x15   : > { %4954 = vmatprep.subr.bf16.mxu0 %v5531_v5  ;;  %v296_v15 = vld [vmem:[%s5698_s25 + $0x18] sm:$0xff]  ;;  %v334_v16 = vmax.f32 %v293_v12, 0.0  ;;  %v335_v17 = vmax.f32 %v294_v13, 0.0  ;;  %v336_v18 = vmax.f32 %v295_v14, 0.0  ;;  %v297_v19 = vld [vmem:[%s5698_s25 + $0x20] sm:$0xff]  ;;  %v298_v20 = vld [vmem:[%s5698_s25 + $0x28] sm:$0xff] }
  0x16   : > { %v337_v22 = vmax.f32 %v296_v15, 0.0  ;;  %v338_v23 = vmax.f32 %v297_v19, 0.0  ;;  %v339_v24 = vmax.f32 %v298_v20, 0.0  ;;  %v299_v26 = vld [vmem:[%s5698_s25 + $0x30] sm:$0xff]  ;;  %v300_v29 = vld [vmem:[%s5698_s25 + $0x38] sm:$0xff]  ;;  %v301_v43 = vld [vmem:[%s5698_s25 + $0x40] sm:$0xff] }
  0x17   : > { %4747 = vmatpush3.bf16.msra.mxu1 %v5530_v4  ;;  %v5715_v25 = vpack.c.bf16 %v335_v17, %v334_v16  ;;  %v340_v30 = vmax.f32 %v299_v26, 0.0  ;;  %v341_v34 = vmax.f32 %v300_v29, 0.0  ;;  %v302_v48 = vld [vmem:[%s5698_s25 + $0x48] sm:$0xff]  ;;  %v303_v49 = vld [vmem:[%s5698_s25 + $0x50] sm:$0xff]  ;;  %v304_v54 = vld [vmem:[%s5698_s25 + $0x58] sm:$0xff]  ;;  %v342_v58 = vmax.f32 %v301_v43, 0.0 }
  0x18   : > { %4955 = vmatpush3.bf16.msra.mxu0 %v5531_v5  ;;  %4748 = vmatprep.subr.bf16.mxu1 %v5532_v6  ;;  %v5718_v27 = vpack.c.bf16 %v337_v22, %v336_v18  ;;  %v5720_v28 = vpack.c.bf16 %v339_v24, %v338_v23  ;;  %v343_v3 = vmax.f32 %v302_v48, 0.0  ;;  %v344_v5 = vmax.f32 %v303_v49, 0.0  ;;  %v308_v14 = vld [vmem:[%s5698_s25 + $0x78] sm:$0xff]  ;;  %v5544_v15 = vld [vmem:[%s6820_s1 + $0x148] sm:$0xff]   ;;  %v309_v48 = vld [vmem:[%s5698_s25 + $0x80] sm:$0xff]  ;;  %s4124_s22 = sshll.u32 %s6902_s19, 3 }
  0x19   : > { %4956 = vmatprep.subr.bf16.mxu0 %v5533_v7  ;;  %v429_v32 = vshrl.u32 %v5715_v25, 16  ;;  %v431_v33 = vshll.u32 %v5715_v25, 16  ;;  %v5742_v42 = vpack.c.bf16 %v341_v34, %v340_v30  ;;  %v5546_v23 = vld [vmem:[%s6820_s1 + $0x8] sm:$0xff]   ;;  %v349_v24 = vmax.f32 %v308_v14, 0.0  ;;  %s6317_s29 = scalar_lea.vmem %s6822_s3, %s4124_s22  ;;  %s4125_s7 = sshll.u32 %s6902_s19, 2 }
  0x1a   : > { %v436_v36 = vshll.u32 %v5718_v27, 16  ;;  %v440_v37 = vshrl.u32 %v5718_v27, 16  ;;  %v5734_v38 = vshll.u32 %v5720_v28, 16  ;;  %v5737_v39 = vshrl.u32 %v5720_v28, 16  ;;  %s6692_s9 = scalar_lea.vmem %s6823_s4, %s4125_s7 }
  0x1b   : > { %4749 = vmatpush3.bf16.msra.mxu1 %v5532_v6  ;;  %v433_v41 = vrot.slane %v431_v33, 1  ;;  %v5751_v53 = vshll.u32 %v5742_v42, 16  ;;  %v5755_v57 = vshrl.u32 %v5742_v42, 16  ;;  %v345_v6 = vmax.f32 %v304_v54, 0.0 }
  0x1c   : > { %4957 = vmatpush3.bf16.msra.mxu0 %v5533_v7  ;;  %4750 = vmatprep.subr.bf16.mxu1 %v5534_v8  ;;  %v438_v44 = vrot.slane %v436_v36, 1  ;;  %v1703_v45 = vrot.slane %v440_v37, 1  ;;  %v1704_v46 = vrot.slane %v436_v36, 2  ;;  %v1706_v47 = vrot.slane %v5737_v39, 1  ;;  %v305_v7 = vld [vmem:[%s5698_s25 + $0x60] sm:$0xff] }
  0x1d   : > { %4958 = vmatprep.subr.bf16.mxu0 %v5535_v9  ;;  %v434_v50 = vor.u32 %v433_v41, %v429_v32  ;;  %v1707_v51 = vrot.slane %v5734_v38, 2  ;;  %v446_v52 = vrot.slane %v5734_v38, 1  ;;  %v1711_v62 = vrot.slane %v5751_v53, 2 }
  0x1e   : > { %v1705_v55 = vor.u32 %v1704_v46, %v1703_v45  ;;  %v442_v56 = vor.u32 %v440_v37, %v438_v44  ;;  %v1710_v0 = vrot.slane %v5755_v57, 1  ;;  %v454_v2 = vrot.slane %v5751_v53, 1 }
  0x1f   : > { %4751 = vmatpush3.bf16.msra.mxu1 %v5534_v8  ;;  %v439_v59 = vsel %vm427_vm0, %v434_v50, %v438_v44  ;;  %v1708_v60 = vor.u32 %v1707_v51, %v1706_v47  ;;  %v450_v63 = vor.u32 %v5737_v39, %v446_v52  ;;  %v306_v8 = vld [vmem:[%s5698_s25 + $0x68] sm:$0xff]  ;;  %v5774_v13 = vpack.c.bf16 %v343_v3, %v342_v58  ;;  %v5549_v44 = vld [vmem:[%s6820_s1 + $0x10] sm:$0xff]   ;;  %v312_v58 = vld [vmem:[%s5698_s25 + $0x98] sm:$0xff] }
  0x20   : > { %4959 = vmatpush3.bf16.msra.mxu0 %v5535_v9  ;;  %4752 = vmatprep.subr.bf16.mxu1 %v5536_v10  ;;  %v307_v9 = vld [vmem:[%s5698_s25 + $0x70] sm:$0xff]  ;;  %v5780_v16 = vpack.c.bf16 %v345_v6, %v344_v5  ;;  %v346_v17 = vmax.f32 %v305_v7, 0.0  ;;  %v347_v18 = vmax.f32 %v306_v8, 0.0  ;;  %v458_v26 = vor.u32 %v5755_v57, %v454_v2  ;;  %v310_v51 = vld [vmem:[%s5698_s25 + $0x88] sm:$0xff]  ;;  %v313_v3 = vld [vmem:[%s5698_s25 + $0xa0] sm:$0xff] }
  0x21   : > { %4960 = vmatprep.subr.bf16.mxu0 %v5537_v11  ;;  %4758 = vmatprep.mubr.bf16.mxu1 %v439_v59  ;;  %v1709_v4 = vsel %vm1702_vm1, %v1705_v55, %v1708_v60  ;;  %v455_v12 = vsel %vm427_vm0, %v450_v63, %v454_v2  ;;  %v348_v19 = vmax.f32 %v307_v9, 0.0  ;;  %v5787_v22 = vshrl.u32 %v5774_v13, 16  ;;  %v5547_v63 = vld [vmem:[%s6820_s1 + $0x158] sm:$0xff]  }
  0x22   : > { %4966 = vmatprep.mubr.bf16.mxu0 %v1709_v4  ;;  %v5794_v29 = vshll.u32 %v5780_v16, 16  ;;  %v5797_v30 = vshrl.u32 %v5780_v16, 16  ;;  %v350_v2 = vmax.f32 %v309_v48, 0.0  ;;  %v351_v5 = vmax.f32 %v310_v51, 0.0 }
  0x23   : > { %4753 = vmatpush3.bf16.msra.mxu1 %v5536_v10  ;;  %v447_v10 = vsel %vm427_vm0, %v442_v56, %v446_v52  ;;  %v1714_v32 = vrot.slane %v5787_v22, 1  ;;  %v311_v56 = vld [vmem:[%s5698_s25 + $0x90] sm:$0xff]  ;;  %v353_v7 = vmax.f32 %v312_v58, 0.0 }
  0x24   : > { %4961 = vmatpush3.bf16.msra.mxu0 %v5537_v11  ;;  %4754 = vmatprep.subr.bf16.mxu1 %v5538_v21  ;;  %v1712_v11 = vor.u32 %v1711_v62, %v1710_v0  ;;  %v1718_v36 = vrot.slane %v5797_v30, 1  ;;  %v1719_v37 = vrot.slane %v5794_v29, 2  ;;  %v470_v41 = vrot.slane %v5794_v29, 1 }
  0x25   : > { %4962 = vmatprep.subr.bf16.mxu0 %v5539_v31  ;;  %v352_v6 = vmax.f32 %v311_v56, 0.0  ;;  %v5851_v14 = vpack.c.bf16 %v351_v5, %v350_v2  ;;  %v318_v2 = vld [vmem:[%s5698_s25 + $0xc8] sm:$0xff] }
  0x26   : > { %v1713_v20 = vsel %vm1702_vm1, %v1708_v60, %v1712_v11  ;;  %v1720_v49 = vor.u32 %v1719_v37, %v1718_v36  ;;  %v474_v9 = vor.u32 %v5797_v30, %v470_v41 }
  0x27   : > { %4755 = vmatpush3.bf16.msra.mxu1 %v5538_v21  ;;  %v5784_v21 = vshll.u32 %v5774_v13, 16 }
  0x28   : > { %4963 = vmatpush3.bf16.msra.mxu0 %v5539_v31  ;;  %4756 = vmatprep.subr.bf16.mxu1 %v5540_v35  ;;  %v5799_v31 = vpack.c.bf16 %v347_v18, %v346_v17  ;;  %v5548_v18 = vld [vmem:[%s6820_s1 + $0x160] sm:$0xff]  }
  0x29   : > { %4964 = vmatprep.subr.bf16.mxu0 %v5541_v40  ;;  %v1715_v33 = vrot.slane %v5784_v21, 2  ;;  %v462_v34 = vrot.slane %v5784_v21, 1 }
  0x2a   : > { %v5813_v43 = vshll.u32 %v5799_v31, 16  ;;  %v5820_v47 = vshrl.u32 %v5799_v31, 16 }
  0x2b   : > { %4757 = vmatpush3.bf16.msra.mxu1 %v5540_v35  ;;  %v5804_v35 = vpack.c.bf16 %v349_v24, %v348_v19  ;;  %v1716_v45 = vor.u32 %v1715_v33, %v1714_v32  ;;  %v466_v46 = vor.u32 %v5787_v22, %v462_v34  ;;  %v463_v59 = vsel %vm427_vm0, %v458_v26, %v462_v34  ;;  %v315_v24 = vld [vmem:[%s5698_s25 + $0xb0] sm:$0xff]  ;;  %v316_v26 = vld [vmem:[%s5698_s25 + $0xb8] sm:$0xff] }
  0x2c   : > { %4965 = vmatpush3.bf16.msra.mxu0 %v5541_v40  ;;  %4794 = vmatprep.subr.bf16.mxu1 %v5542_v61  ;;  %v5545_v40 = vld [vmem:[%s6820_s1 + $0x150] sm:$0xff]   ;;  %v1723_v50 = vrot.slane %v5813_v43, 2  ;;  %v1722_v54 = vrot.slane %v5820_v47, 1  ;;  %v5863_v32 = vshll.u32 %v5851_v14, 16  ;;  %v5866_v33 = vshrl.u32 %v5851_v14, 16 }
  0x2d   : > { %5002 = vmatprep.subr.bf16.mxu0 %v5543_v1  ;;  %v1717_v52 = vsel %vm1702_vm1, %v1712_v11, %v1716_v45  ;;  %v5828_v55 = vshll.u32 %v5804_v35, 16  ;;  %v471_v60 = vsel %vm427_vm0, %v466_v46, %v470_v41  ;;  %v1721_v62 = vsel %vm1702_vm1, %v1716_v45, %v1720_v49  ;;  %v5552_v11 = vld [vmem:[%s6820_s1 + $0x18] sm:$0xff]   ;;  %v5554_v41 = vld [vmem:[%s6820_s1 + $0x20] sm:$0xff]  }
  0x2e   : > { %4759 = vmatmul.mubr.bf16.vlgmr.msra.gmra.mrb[0].mxu1 %v447_v10  ;;  %v1724_v0 = vor.u32 %v1723_v50, %v1722_v54  ;;  %v478_v10 = vrot.slane %v5813_v43, 1  ;;  %v1731_v45 = vrot.slane %v5863_v32, 2  ;;  %v356_v46 = vmax.f32 %v315_v24, 0.0  ;;  %v5550_v54 = vld [vmem:[%s6820_s1 + $0x168] sm:$0xff]  }
  0x2f   : > { %4967 = vmatmul.mubr.bf16.vlgmr.msra.gmra.mrb[0].mxu0 %v1713_v20  ;;  %4795 = vmatpush3.bf16.msra.mxu1 %v5542_v61  ;;  %v5835_v61 = vshrl.u32 %v5804_v35, 16  ;;  %v486_v20 = vrot.slane %v5828_v55, 1  ;;  %v357_v48 = vmax.f32 %v316_v26, 0.0 }
  0x30   : > { %5003 = vmatpush3.bf16.msra.mxu0 %v5543_v1  ;;  %4762 = vmatprep.mubr.bf16.mxu1 %v455_v12  ;;  %v1727_v1 = vrot.slane %v5828_v55, 2  ;;  %v1725_v8 = vsel %vm1702_vm1, %v1720_v49, %v1724_v0  ;;  %v314_v12 = vld [vmem:[%s5698_s25 + $0xa8] sm:$0xff]  ;;  %v482_v19 = vor.u32 %v5820_v47, %v478_v10  ;;  %v479_v37 = vsel %vm427_vm0, %v474_v9, %v478_v10  ;;  %v319_v10 = vld [vmem:[%s5698_s25 + $0xd0] sm:$0xff] }
  0x31   : > { %5004 = vmatprep.subr.bf16.mxu0 %v5544_v15  ;;  %4796 = vmatprep.subr.bf16.mxu1 %v5546_v23  ;;  %v1726_v4 = vrot.slane %v5835_v61, 1  ;;  %v355_v36 = vmax.f32 %v314_v12, 0.0  ;;  %v5558_v12 = vld [vmem:[%s6820_s1 + $0x30] sm:$0xff]  }
  0x32   : > { %4970 = vmatprep.mubr.bf16.mxu0 %v1717_v52  ;;  %v487_v50 = vsel %vm427_vm0, %v482_v19, %v486_v20 }
  0x33   : > { %4797 = vmatpush3.bf16.msra.mxu1 %v5546_v23  ;;  %v1728_v17 = vor.u32 %v1727_v1, %v1726_v4  ;;  %v354_v23 = vmax.f32 %v313_v3, 0.0  ;;  %v317_v1 = vld [vmem:[%s5698_s25 + $0xc0] sm:$0xff]  ;;  %v5551_v4 = vld [vmem:[%s6820_s1 + $0x170] sm:$0xff]  }
  0x34   : > { %5005 = vmatpush3.bf16.msra.mxu0 %v5544_v15  ;;  %4798 = vmatprep.subr.bf16.mxu1 %v5549_v44  ;;  %v5853_v15 = vpack.c.bf16 %v353_v7, %v352_v6  ;;  %v2085_v7 = vrot.slane %v5718_v27, 2 }
  0x35   : > { %5006 = vmatprep.subr.bf16.mxu0 %v5545_v40  ;;  %v1729_v49 = vsel %vm1702_vm1, %v1724_v0, %v1728_v17  ;;  %v5887_v58 = vpack.c.bf16 %v355_v36, %v354_v23  ;;  %v5895_v0 = vpack.c.bf16 %v357_v48, %v356_v46  ;;  %v360_v36 = vmax.f32 %v319_v10, 0.0  ;;  %v5560_v48 = vld [vmem:[%s6820_s1 + $0x38] sm:$0xff]  }
  0x36   : > { %4763 = vmatmul.mubr.bf16.gmra.mrb[4].mxu1 %v463_v59  ;;  %v5869_v34 = vshll.u32 %v5853_v15, 16  ;;  %v494_v59 = vrot.slane %v5863_v32, 1 }
  0x37   : > { %4971 = vmatmul.mubr.bf16.gmra.mrb[4].mxu0 %v1721_v62  ;;  %4766 = vmatprep.mubr.bf16.mxu1 %v471_v60  ;;  %v5556_v60 = vld [vmem:[%s6820_s1 + $0x28] sm:$0xff]   ;;  %v5909_v9 = vshll.u32 %v5887_v58, 16  ;;  %v5921_v23 = vshll.u32 %v5895_v0, 16 }
  0x38   : > { %5007 = vmatpush3.bf16.msra.mxu0 %v5545_v40  ;;  %4974 = vmatprep.mubr.bf16.mxu0 %v1725_v8  ;;  %v5873_v40 = vshrl.u32 %v5853_v15, 16  ;;  %v1735_v52 = vrot.slane %v5869_v34, 2  ;;  %v498_v5 = vor.u32 %v5866_v33, %v494_v59  ;;  %v502_v6 = vrot.slane %v5869_v34, 1 }
  0x39   : > { %5008 = vmatprep.subr.bf16.mxu0 %v5547_v63  ;;  %4799 = vmatpush3.bf16.msra.mxu1 %v5549_v44  ;;  %v1730_v44 = vrot.slane %v5866_v33, 1  ;;  %v2086_v8 = vrot.slane %v5720_v28, 2  ;;  %6860 = vst [vmem:[#allocation3_spill] sm:$0xff] %v5909_v9  ;;  %6861 = vst [vmem:[#allocation4_spill] sm:$0xff] %v5921_v23 }
  0x3a   : > { %4800 = vmatprep.subr.bf16.mxu1 %v5552_v11  ;;  %v1734_v51 = vrot.slane %v5873_v40, 1  ;;  %v503_v26 = vsel %vm427_vm0, %v498_v5, %v502_v6 }
  0x3b   : > { %v1732_v56 = vor.u32 %v1731_v45, %v1730_v44  ;;  %v2087_v44 = vsel %vm2084_vm2, %v2085_v7, %v2086_v8  ;;  %v510_v45 = vrot.slane %v5909_v9, 1 }
  0x3c   : > { %5009 = vmatpush3.bf16.msra.mxu0 %v5547_v63  ;;  %v490_v63 = vor.u32 %v5835_v61, %v486_v20  ;;  %v5899_v3 = vor.u32 %v1735_v52, %v1734_v51  ;;  %v5918_v20 = vshrl.u32 %v5887_v58, 16  ;;  %v518_v52 = vrot.slane %v5921_v23, 1  ;;  %v331_v23 = vld [vmem:[%s5698_s25 + $0x130] sm:$0xff] }
  0x3d   : > { %5010 = vmatprep.subr.bf16.mxu0 %v5548_v18  ;;  %4801 = vmatpush3.bf16.msra.mxu1 %v5552_v11  ;;  %v1733_v62 = vsel %vm1702_vm1, %v1728_v17, %v1732_v56  ;;  %v320_v11 = vld [vmem:[%s5698_s25 + $0xd8] sm:$0xff]  ;;  %v358_v17 = vmax.f32 %v317_v1, 0.0 }
  0x3e   : > { %4767 = vmatmul.mubr.bf16.gmra.mrb[8].mxu1 %v479_v37  ;;  %4802 = vmatprep.subr.bf16.mxu1 %v5554_v41  ;;  %6859 = vst [vmem:[#allocation2_spill] sm:$0xff] %v5899_v3  ;;  %v495_v19 = vsel %vm427_vm0, %v490_v63, %v494_v59  ;;  %v1737_v24 = vsel %vm1702_vm1, %v1732_v56, %v5899_v3  ;;  %v361_v37 = vmax.f32 %v320_v11, 0.0  ;;  %v321_v56 = vld [vmem:[%s5698_s25 + $0xe0] sm:$0xff]  ;;  %v322_v59 = vld [vmem:[%s5698_s25 + $0xe8] sm:$0xff]  ;;  %v2090_v63 = vrot.slane %v5774_v13, 2  ;;  %v324_v1 = vld [vmem:[%s5698_s25 + $0xf8] sm:$0xff] }
  0x3f   : > { %4975 = vmatmul.mubr.bf16.gmra.mrb[8].mxu0 %v1729_v49  ;;  %4770 = vmatprep.mubr.bf16.mxu1 %v487_v50  ;;  %v506_v49 = vor.u32 %v5873_v40, %v502_v6  ;;  %v2088_v50 = vrot.slane %v5742_v42, 2  ;;  %v514_v51 = vor.u32 %v5918_v20, %v510_v45  ;;  %v362_v5 = vmax.f32 %v321_v56, 0.0 }
  0x40   : > { %5011 = vmatpush3.bf16.msra.mxu0 %v5548_v18  ;;  %4978 = vmatprep.mubr.bf16.mxu0 %v1733_v62  ;;  %v359_v18 = vmax.f32 %v318_v2, 0.0  ;;  %v323_v62 = vld [vmem:[%s5698_s25 + $0xf0] sm:$0xff]  ;;  %v363_v6 = vmax.f32 %v322_v59, 0.0  ;;  %v2094_v56 = vrot.slane %v5799_v31, 2 }
  0x41   : > { %5012 = vmatprep.subr.bf16.mxu0 %v5550_v54  ;;  %4803 = vmatpush3.bf16.msra.mxu1 %v5554_v41  ;;  %v5553_v41 = vld [vmem:[%s6820_s1 + $0x178] sm:$0xff]   ;;  %v511_v7 = vsel %vm427_vm0, %v506_v49, %v510_v45  ;;  %v5960_v10 = vsel %vm2084_vm2, %v2086_v8, %v2088_v50  ;;  %v519_v11 = vsel %vm427_vm0, %v514_v51, %v518_v52  ;;  %v5557_v8 = vld [vmem:[%s6820_s1 + $0x188] sm:$0xff]   ;;  %v2092_v49 = vrot.slane %v5780_v16, 2 }
  0x42   : > { %4804 = vmatprep.subr.bf16.mxu1 %v5556_v60  ;;  %v5931_v46 = vpack.c.bf16 %v359_v18, %v358_v17 }
  0x44   : > { %5013 = vmatpush3.bf16.msra.mxu0 %v5550_v54  ;;  %v5555_v54 = vld [vmem:[%s6820_s1 + $0x180] sm:$0xff]   ;;  %v5951_v2 = vshll.u32 %v5931_v46, 16  ;;  %v5967_v17 = vshrl.u32 %v5931_v46, 16 }
  0x45   : > { %5014 = vmatprep.subr.bf16.mxu0 %v5551_v4  ;;  %4805 = vmatpush3.bf16.msra.mxu1 %v5556_v60  ;;  %v5945_v60 = vpack.c.bf16 %v361_v37, %v360_v36  ;;  %v325_v36 = vld [vmem:[%s5698_s25 + $0x100] sm:$0xff] }
  0x46   : > { %4771 = vmatmul.mubr.bf16.gmra.mrb[12].mxu1 %v495_v19  ;;  %4806 = vmatprep.subr.bf16.mxu1 %v5558_v12  ;;  %6862 = vst [vmem:[#allocation5_spill] sm:$0xff] %v5951_v2  ;;  %6864 = vst [vmem:[#allocation7_spill] sm:$0xff] %v5967_v17  ;;  %v364_v19 = vmax.f32 %v323_v62, 0.0  ;;  %v526_v37 = vrot.slane %v5951_v2, 1  ;;  %v327_v62 = vld [vmem:[%s5698_s25 + $0x110] sm:$0xff] }
  0x47   : > { %4979 = vmatmul.mubr.bf16.gmra.mrb[12].mxu0 %v1737_v24  ;;  %4774 = vmatprep.mubr.bf16.mxu1 %v503_v26  ;;  %v5970_v18 = vshll.u32 %v5945_v60, 16  ;;  %v365_v24 = vmax.f32 %v324_v1, 0.0  ;;  %v5973_v26 = vsel %vm2084_vm2, %v2088_v50, %v2090_v63  ;;  %v328_v1 = vld [vmem:[%s5698_s25 + $0x118] sm:$0xff] }
  0x48   : > { %5015 = vmatpush3.bf16.msra.mxu0 %v5551_v4  ;;  %5018 = vmatprep.mubr.bf16.mxu0 %v2087_v44  ;;  %v5956_v4 = vld [vmem:[%s6820_s1 + $0x80] sm:$0xff]   ;;  %v326_v44 = vld [vmem:[%s5698_s25 + $0x108] sm:$0xff]  ;;  %v530_v50 = vor.u32 %v5967_v17, %v526_v37  ;;  %v369_v3 = vmax.f32 %v328_v1, 0.0 }
  0x49   : > { %5016 = vmatprep.subr.bf16.mxu0 %v5553_v41  ;;  %4807 = vmatpush3.bf16.msra.mxu1 %v5558_v12  ;;  %v5964_v12 = vshrl.u32 %v5895_v0, 16  ;;  %6865 = vst [vmem:[#allocation8_spill] sm:$0xff] %v5970_v18  ;;  %v534_v51 = vrot.slane %v5970_v18, 1  ;;  %v5994_v59 = vpack.c.bf16 %v365_v24, %v364_v19  ;;  %v6006_v18 = vsel %vm2084_vm2, %v2090_v63, %v2092_v49  ;;  %v5561_v63 = vld [vmem:[%s6820_s1 + $0x198] sm:$0xff]   ;;  %v330_v1 = vld [vmem:[%s5698_s25 + $0x128] sm:$0xff] }
  0x4a   : > { %4808 = vmatprep.subr.bf16.mxu1 %v5560_v48 }
  0x4b   : > { %6863 = vst [vmem:[#allocation6_spill] sm:$0xff] %v5964_v12  ;;  %v522_v45 = vor.u32 %v5964_v12, %v518_v52  ;;  %v366_v52 = vmax.f32 %v325_v36, 0.0  ;;  %v535_v19 = vsel %vm427_vm0, %v530_v50, %v534_v51  ;;  %v6013_v36 = vshll.u32 %v5994_v59, 16 }
  0x4c   : > { %5017 = vmatpush3.bf16.msra.mxu0 %v5553_v41  ;;  %v5980_v41 = vpack.c.bf16 %v363_v6, %v362_v5  ;;  %v367_v5 = vmax.f32 %v326_v44, 0.0 }
  0x4d   : > { %5054 = vmatprep.subr.bf16.mxu0 %v5555_v54  ;;  %4809 = vmatpush3.bf16.msra.mxu1 %v5560_v48  ;;  %v5559_v48 = vld [vmem:[%s6820_s1 + $0x190] sm:$0xff]   ;;  %6869 = vst [vmem:[#allocation12_spill] sm:$0xff] %v6013_v36 }
  0x4e   : > { %4775 = vmatmul.mubr.bf16.gmra.mrb[16].mxu1 %v511_v7  ;;  %4846 = vmatprep.subr.bf16.mxu1 %v5956_v4  ;;  %v5999_v6 = vshll.u32 %v5980_v41, 16  ;;  %v527_v7 = vsel %vm427_vm0, %v522_v45, %v526_v37  ;;  %v6010_v24 = vshrl.u32 %v5980_v41, 16  ;;  %v6016_v37 = vsel %vm2084_vm2, %v2092_v49, %v2094_v56 }
  0x4f   : > { %5019 = vmatmul.mubr.bf16.vlgmr.msra.gmra.mrb[0].mxu0 %v5960_v10  ;;  %4778 = vmatprep.mubr.bf16.mxu1 %v519_v11  ;;  %v368_v11 = vmax.f32 %v327_v62, 0.0  ;;  %v6018_v44 = vpack.c.bf16 %v367_v5, %v366_v52  ;;  %v2096_v62 = vrot.slane %v5804_v35, 2  ;;  %v550_v5 = vrot.slane %v6013_v36, 1 }
  0x50   : > { %5022 = vmatprep.mubr.bf16.mxu0 %v5973_v26  ;;  %5055 = vmatpush3.bf16.msra.mxu0 %v5555_v54  ;;  %6866 = vst [vmem:[#allocation9_spill] sm:$0xff] %v5999_v6  ;;  %v6003_v54 = vshrl.u32 %v5945_v60, 16  ;;  %6868 = vst [vmem:[#allocation11_spill] sm:$0xff] %v6010_v24  ;;  %v542_v45 = vrot.slane %v5999_v6, 1  ;;  %v6036_v6 = vshrl.u32 %v5994_v59, 16 }
  0x51   : > { %5056 = vmatprep.subr.bf16.mxu0 %v5557_v8  ;;  %6870 = vst [vmem:[#allocation13_spill] sm:$0xff] %v6018_v44  ;;  %v6028_v49 = vpack.c.bf16 %v369_v3, %v368_v11  ;;  %v5563_v3 = vld [vmem:[%s6820_s1 + $0x1a0] sm:$0xff]   ;;  %v6046_v36 = vshrl.u32 %v6018_v44, 16 }
  0x52   : > { %6867 = vst [vmem:[#allocation10_spill] sm:$0xff] %v6003_v54  ;;  %v538_v50 = vor.u32 %v6003_v54, %v534_v51  ;;  %v546_v52 = vor.u32 %v6010_v24, %v542_v45  ;;  %6872 = vst [vmem:[#allocation15_spill] sm:$0xff] %v6036_v6  ;;  %v371_v24 = vmax.f32 %v330_v1, 0.0  ;;  %v6052_v54 = vsel %vm2084_vm2, %v2094_v56, %v2096_v62  ;;  %v5565_v1 = vld [vmem:[%s6820_s1 + $0x1a8] sm:$0xff]  }
  0x53   : > { %6871 = vst [vmem:[#allocation14_spill] sm:$0xff] %v6028_v49  ;;  %6874 = vst [vmem:[#allocation17_spill] sm:$0xff] %v6046_v36  ;;  %v554_v17 = vor.u32 %v6036_v6, %v550_v5 }
  0x54   : > { %5057 = vmatpush3.bf16.msra.mxu0 %v5557_v8  ;;  %v329_v8 = vld [vmem:[%s5698_s25 + $0x120] sm:$0xff]  ;;  %v543_v11 = vsel %vm427_vm0, %v538_v50, %v542_v45  ;;  %v2100_v50 = vrot.slane %v5853_v15, 2 }
  0x55   : > { %5058 = vmatprep.subr.bf16.mxu0 %v5559_v48  ;;  %v370_v51 = vmax.f32 %v329_v8, 0.0  ;;  %v551_v8 = vsel %vm427_vm0, %v546_v52, %v550_v5 }
  0x56   : > { %4779 = vmatmul.mubr.bf16.gmra.mrb[20].mxu1 %v527_v7  ;;  %v2098_v7 = vrot.slane %v5851_v14, 2 }
  0x57   : > { %5023 = vmatmul.mubr.bf16.gmra.mrb[4].mxu0 %v6006_v18  ;;  %4782 = vmatprep.mubr.bf16.mxu1 %v535_v19  ;;  %v6039_v19 = vshll.u32 %v6018_v44, 16  ;;  %v6065_v56 = vpack.c.bf16 %v370_v51, %v370_v51 }
  0x58   : > { %5026 = vmatprep.mubr.bf16.mxu0 %v6016_v37  ;;  %5059 = vmatpush3.bf16.msra.mxu0 %v5559_v48  ;;  %v6049_v48 = vshll.u32 %v6028_v49, 16  ;;  %v6056_v2 = vsel %vm2084_vm2, %v2096_v62, %v2098_v7  ;;  %v332_v62 = vld [vmem:[%s5698_s25 + $0x138] sm:$0xff]  ;;  %v6078_v12 = vsel %vm2084_vm2, %v2098_v7, %v2100_v50 }
  0x59   : > { %6873 = vst [vmem:[#allocation16_spill] sm:$0xff] %v6039_v19  ;;  %5060 = vmatprep.subr.bf16.mxu0 %v5561_v63  ;;  %v558_v45 = vrot.slane %v6039_v19, 1  ;;  %6876 = vst [vmem:[#allocation19_spill] sm:$0xff] %v6065_v56  ;;  %v6074_v19 = vmax.f32 %v331_v23, 0.0  ;;  %v373_v6 = vmax.f32 %v332_v62, 0.0  ;;  %v2710_v62 = vrot.slane %v5755_v57, 2 }
  0x5a   : > { %6875 = vst [vmem:[#allocation18_spill] sm:$0xff] %v6049_v48  ;;  %v566_v5 = vrot.slane %v6049_v48, 1  ;;  %v2711_v48 = vrot.slane %v5751_v53, 3  ;;  %v2715_v53 = vrot.slane %v5784_v21, 3  ;;  %v2719_v21 = vrot.slane %v5794_v29, 3 }
  0x5b   : > { %v562_v52 = vor.u32 %v6046_v36, %v558_v45  ;;  %v6089_v23 = vpack.c.bf16 %v373_v6, %v6074_v19  ;;  %v2714_v6 = vrot.slane %v5787_v22, 2  ;;  %v2718_v22 = vrot.slane %v5797_v30, 2 }
  0x5c   : > { %5061 = vmatpush3.bf16.msra.mxu0 %v5561_v63  ;;  %v6068_v63 = vpack.c.bf16 %v371_v24, %v370_v51  ;;  %v5567_v24 = vld [vmem:[%s6820_s1 + $0x1b0] sm:$0xff]   ;;  %v6085_v51 = vshrl.u32 %v6028_v49, 16  ;;  %v2712_v57 = vor.u32 %v2711_v48, %v2710_v62  ;;  %v2722_v30 = vrot.slane %v5820_v47, 2 }
  0x5d   : > { %5062 = vmatprep.subr.bf16.mxu0 %v5563_v3  ;;  %v567_v36 = vsel %vm427_vm0, %v562_v52, %v566_v5  ;;  %v6856_v9 = vrot.slane %v6089_v23, 2  ;;  %v2716_v48 = vor.u32 %v2715_v53, %v2714_v6  ;;  %v2720_v29 = vor.u32 %v2719_v21, %v2718_v22 }
  0x5e   : > { %4783 = vmatmul.mubr.bf16.gmra.mrb[24].mxu1 %v543_v11  ;;  %v559_v11 = vsel %vm427_vm0, %v554_v17, %v558_v45  ;;  %v2707_v17 = vrot.slane %v5737_v39, 2  ;;  %v6093_v7 = vrot.slane %v6068_v63, 2  ;;  %v2708_v45 = vrot.slane %v5734_v38, 3  ;;  %v5569_v38 = vld [vmem:[%s6820_s1 + $0x1b8] sm:$0xff]  }
  0x5f   : > { %5027 = vmatmul.mubr.bf16.gmra.mrb[8].mxu0 %v6052_v54  ;;  %4786 = vmatprep.mubr.bf16.mxu1 %v551_v8  ;;  %v2102_v8 = vrot.slane %v5887_v58, 2  ;;  %v2726_v62 = vrot.slane %v5835_v61, 2  ;;  %v6138_v47 = vsel %vm2706_vm3, %v2716_v48, %v2720_v29  ;;  %v2731_v53 = vrot.slane %v5863_v32, 3 }
  0x60   : > { %5030 = vmatprep.mubr.bf16.mxu0 %v6056_v2  ;;  %5063 = vmatpush3.bf16.msra.mxu0 %v5563_v3  ;;  %v572_v3 = vshll.u32 %v6065_v56, 16  ;;  %v2709_v39 = vor.u32 %v2708_v45, %v2707_v17  ;;  %v2723_v45 = vrot.slane %v5813_v43, 3  ;;  %v2730_v43 = vrot.slane %v5866_v33, 2 }
  0x61   : > { %5064 = vmatprep.subr.bf16.mxu0 %v5565_v1  ;;  %v6102_v56 = vsel %vm2084_vm2, %v2100_v50, %v2102_v8  ;;  %v570_v50 = vor.u32 %v6085_v51, %v566_v5  ;;  %v6132_v5 = vsel %vm2706_vm3, %v2712_v57, %v2716_v48  ;;  %v2734_v33 = vrot.slane %v5873_v40, 2 }
  0x62   : > { %v574_v52 = vrot.slane %v572_v3, 1  ;;  %v6118_v17 = vsel %vm2706_vm3, %v2709_v39, %v2712_v57  ;;  %v2106_v3 = vrot.slane %v5931_v46, 2  ;;  %v2724_v6 = vor.u32 %v2723_v45, %v2722_v30 }
  0x63   : > { %v2727_v39 = vrot.slane %v5828_v55, 3  ;;  %v2732_v55 = vor.u32 %v2731_v53, %v2730_v43  ;;  %v2112_v40 = vrot.slane %v5994_v59, 2  ;;  %v2114_v45 = vrot.slane %v6018_v44, 2 }
  0x64   : > { %5065 = vmatpush3.bf16.msra.mxu0 %v5565_v1  ;;  %v6112_v1 = vsel %vm2084_vm2, %v6093_v7, %v6856_v9  ;;  %v6146_v57 = vsel %vm2706_vm3, %v2720_v29, %v2724_v6  ;;  %v6212_v43 = vpack.c.bf16 %v6074_v19, %v6074_v19 }
  0x65   : > { %5066 = vmatprep.subr.bf16.mxu0 %v5567_v24  ;;  %v2728_v61 = vor.u32 %v2727_v39, %v2726_v62  ;;  %v5568_v62 = vld [vmem:[%s6820_s1 + $0x98] sm:$0xff]   ;;  %v5570_v39 = vld [vmem:[%s6820_s1 + $0xa0] sm:$0xff]  }
  0x66   : > { %4787 = vmatmul.mubr.bf16.gmra.mrb[28].mxu1 %v559_v11  ;;  %v2104_v11 = vrot.slane %v5895_v0, 2  ;;  %v2120_v19 = vrot.slane %v6212_v43, 2 }
  0x67   : > { %5031 = vmatmul.mubr.bf16.gmra.mrb[12].mxu0 %v6078_v12  ;;  %4790 = vmatprep.mubr.bf16.mxu1 %v567_v36  ;;  %v6129_v36 = vld [vmem:[%s6820_s1 + $0x1c0] sm:$0xff]   ;;  %v6158_v32 = vsel %vm2706_vm3, %v2728_v61, %v2732_v55 }
  0x68   : > { %5034 = vmatprep.mubr.bf16.mxu0 %v6102_v56  ;;  %5067 = vmatpush3.bf16.msra.mxu0 %v5567_v24  ;;  %v575_v24 = vsel %vm427_vm0, %v570_v50, %v574_v52  ;;  %v6143_v9 = vsel %vm2084_vm2, %v2102_v8, %v2104_v11  ;;  %v6149_v22 = vsel %vm2084_vm2, %v2104_v11, %v2106_v3  ;;  %v2735_v8 = vrot.slane %v5869_v34, 3  ;;  %v5564_v34 = vld [vmem:[%s6820_s1 + $0x88] sm:$0xff]  }
  0x69   : > { %5068 = vmatprep.subr.bf16.mxu0 %v5569_v38  ;;  %v6153_v52 = vsel %vm2706_vm3, %v2724_v6, %v2728_v61  ;;  %v2110_v50 = vrot.slane %v5980_v41, 2  ;;  %v2116_v6 = vrot.slane %v6028_v49, 2  ;;  %v5572_v61 = vld [vmem:[%s6820_s1 + $0xa8] sm:$0xff]  }
  0x6a   : > { %v6165_v48 = vor.u32 %v2735_v8, %v2734_v33  ;;  %v2121_v33 = vsel %vm2084_vm2, %v6093_v7, %v2120_v19  ;;  %v5576_v8 = vld [vmem:[%s6820_s1 + $0xb8] sm:$0xff]  }
  0x6b   : > { %v6191_v29 = vsel %vm2084_vm2, %v2110_v50, %v2112_v40  ;;  %v6216_v53 = vsel %vm2084_vm2, %v2116_v6, %v6093_v7  ;;  %v5573_v7 = vld [vmem:[%s6820_s1 + $0x1c8] sm:$0xff]   ;;  %v5584_v19 = vld [vmem:[%s6820_s1 + $0xd8] sm:$0xff]  }
  0x6c   : > { %5069 = vmatpush3.bf16.msra.mxu0 %v5569_v38  ;;  %v2108_v38 = vrot.slane %v5945_v60, 2  ;;  %v6169_v21 = vsel %vm2706_vm3, %v2732_v55, %v6165_v48  ;;  %v5574_v55 = vld [vmem:[%s6820_s1 + $0xb0] sm:$0xff]  }
  0x6d   : > { %5106 = vmatprep.subr.bf16.mxu0 %v6129_v36 }
  0x6e   : > { %4791 = vmatmul.mubr.bf16.gmra.mrb[32].mxu1 %v575_v24  ;;  %v6172_v11 = vsel %vm2084_vm2, %v2106_v3, %v2108_v38  ;;  %v6175_v30 = vsel %vm2084_vm2, %v2108_v38, %v2110_v50  ;;  %v5566_v3 = vld [vmem:[%s6820_s1 + $0x90] sm:$0xff]   ;;  %v6208_v24 = vsel %vm2084_vm2, %v2114_v45, %v2116_v6  ;;  %v5578_v38 = vld [vmem:[%s6820_s1 + $0xc0] sm:$0xff]   ;;  %v5577_v50 = vld [vmem:[%s6820_s1 + $0x1d8] sm:$0xff]  }
  0x6f   : > { %5035 = vmatmul.mubr.bf16.gmra.mrb[16].mxu0 %v6143_v9  ;;  %4810 = vmatprep.mubr.bf16.mxu1 %v5715_v25  ;;  %v3449_v6 = vld [vmem:[%s6317_s29 + $0x8] sm:$0xff] }
  0x70   : > { %5038 = vmatprep.mubr.bf16.mxu0 %v6149_v22 }
  0x76   : > { %4811 = vmatmul.mubr.bf16.vlgmr.msra.gmra.mrb[0].mxu1 %v5718_v27 }
  0x77   : > { %5039 = vmatmul.mubr.bf16.gmra.mrb[20].mxu0 %v6172_v11  ;;  %4847 = vmatpush3.bf16.msra.mxu1 %v5956_v4  ;;  %v6194_v4 = vsel %vm2084_vm2, %v2112_v40, %v2114_v45  ;;  %v5580_v40 = vld [vmem:[%s6820_s1 + $0xc8] sm:$0xff]   ;;  %v3448_v45 = vld [vmem:[%s6317_s29] sm:$0xff] }
  0x78   : > { %4814 = vmatprep.mubr.bf16.mxu1 %v5720_v28  ;;  %5042 = vmatprep.mubr.bf16.mxu0 %v6175_v30 }
  0x79   : > { %4848 = vmatprep.subr.bf16.mxu1 %v5564_v34 }
  0x7b   : > { %4849 = vmatpush3.bf16.msra.mxu1 %v5564_v34 }
  0x7c   : > { %4850 = vmatprep.subr.bf16.mxu1 %v5566_v3 }
  0x7e   : > { %4815 = vmatmul.mubr.bf16.gmra.mrb[4].mxu1 %v5742_v42 }
  0x7f   : > { %5043 = vmatmul.mubr.bf16.gmra.mrb[24].mxu0 %v6191_v29  ;;  %4818 = vmatprep.mubr.bf16.mxu1 %v5774_v13 }
  0x80   : > { %5046 = vmatprep.mubr.bf16.mxu0 %v6194_v4  ;;  %4851 = vmatpush3.bf16.msra.mxu1 %v5566_v3  ;;  %v5582_v3 = vld [vmem:[%s6820_s1 + $0xd0] sm:$0xff]  }
  0x81   : > { %4852 = vmatprep.subr.bf16.mxu1 %v5568_v62 }
  0x84   : > { %4853 = vmatpush3.bf16.msra.mxu1 %v5568_v62 }
  0x85   : > { %4854 = vmatprep.subr.bf16.mxu1 %v5570_v39 }
  0x86   : > { %4819 = vmatmul.mubr.bf16.gmra.mrb[8].mxu1 %v5780_v16 }
  0x87   : > { %5047 = vmatmul.mubr.bf16.gmra.mrb[28].mxu0 %v6208_v24  ;;  %4822 = vmatprep.mubr.bf16.mxu1 %v5799_v31 }
  0x88   : > { %5050 = vmatprep.mubr.bf16.mxu0 %v6216_v53  ;;  %4855 = vmatpush3.bf16.msra.mxu1 %v5570_v39 }
  0x89   : > { %4856 = vmatprep.subr.bf16.mxu1 %v5572_v61 }
  0x8c   : > { %4857 = vmatpush3.bf16.msra.mxu1 %v5572_v61  ;;  %v333_v61 = vld [vmem:[%s5698_s25 + $0x140] sm:$0x3f] }
  0x8d   : > { %4858 = vmatprep.subr.bf16.mxu1 %v5574_v55 }
  0x8e   : > { %4823 = vmatmul.mubr.bf16.gmra.mrb[12].mxu1 %v5804_v35 }
  0x8f   : > { %5051 = vmatmul.mubr.bf16.gmra.mrb[32].mxu0 %v2121_v33  ;;  %4826 = vmatprep.mubr.bf16.mxu1 %v5851_v14  ;;  %v3451_v33 = vld [vmem:[%s6317_s29 + $0x18] sm:$0xff] }
  0x90   : > { %5070 = vmatprep.mubr.bf16.mxu0 %v5960_v10  ;;  %4859 = vmatpush3.bf16.msra.mxu1 %v5574_v55  ;;  %v5575_v10 = vld [vmem:[%s6820_s1 + $0x1d0] sm:$0xff]   ;;  %v1092_v55 = vrot.slane %v5799_v31, 1 }
  0x91   : > { %4860 = vmatprep.subr.bf16.mxu1 %v5576_v8 }
  0x94   : > { %4861 = vmatpush3.bf16.msra.mxu1 %v5576_v8  ;;  %v3452_v8 = vld [vmem:[%s6317_s29 + $0x20] sm:$0xff] }
  0x95   : > { %4898 = vmatprep.subr.bf16.mxu1 %v5578_v38 }
  0x96   : > { %4827 = vmatmul.mubr.bf16.gmra.mrb[16].mxu1 %v5853_v15 }
  0x97   : > { %5071 = vmatmul.mubr.bf16.vlgmr.msra.gmra.mrb[0].mxu0 %v5973_v26  ;;  %4830 = vmatprep.mubr.bf16.mxu1 %v5887_v58  ;;  %v5581_v26 = vld [vmem:[%s6820_s1 + $0x1e8] sm:$0xff]  }
  0x98   : > { %5074 = vmatprep.mubr.bf16.mxu0 %v6006_v18  ;;  %5107 = vmatpush3.bf16.msra.mxu0 %v6129_v36  ;;  %v5579_v18 = vld [vmem:[%s6820_s1 + $0x1e0] sm:$0xff]  }
  0x99   : > { %5108 = vmatprep.subr.bf16.mxu0 %v5573_v7  ;;  %v6283_v36 = vld [vmem:[%s6820_s1 + $0x200] sm:$0xff]  }
  0x9c   : > { %5109 = vmatpush3.bf16.msra.mxu0 %v5573_v7  ;;  %v374_v7 = vmax.f32 %v333_v61, 0.0  ;;  %v1102_v61 = vrot.slane %v5895_v0, 1 }
  0x9d   : > { %5110 = vmatprep.subr.bf16.mxu0 %v5575_v10 }
  0x9e   : > { %4831 = vmatmul.mubr.bf16.gmra.mrb[20].mxu1 %v5895_v0 }
  0x9f   : > { %5075 = vmatmul.mubr.bf16.gmra.mrb[4].mxu0 %v6016_v37  ;;  %4834 = vmatprep.mubr.bf16.mxu1 %v5931_v46  ;;  %v5585_v37 = vld [vmem:[%s6820_s1 + $0x1f8] sm:$0xff]  }
  0xa0   : > { %5078 = vmatprep.mubr.bf16.mxu0 %v6052_v54  ;;  %5111 = vmatpush3.bf16.msra.mxu0 %v5575_v10  ;;  %v5583_v54 = vld [vmem:[%s6820_s1 + $0x1f0] sm:$0xff]   ;;  %v5586_v10 = vld [vmem:[%s6820_s1 + $0xe0] sm:$0xff]  }
  0xa1   : > { %5112 = vmatprep.subr.bf16.mxu0 %v5577_v50 }
  0xa4   : > { %5113 = vmatpush3.bf16.msra.mxu0 %v5577_v50 }
  0xa5   : > { %5114 = vmatprep.subr.bf16.mxu0 %v5579_v18 }
  0xa6   : > { %4835 = vmatmul.mubr.bf16.gmra.mrb[24].mxu1 %v5945_v60 }
  0xa7   : > { %5079 = vmatmul.mubr.bf16.gmra.mrb[8].mxu0 %v6056_v2  ;;  %4838 = vmatprep.mubr.bf16.mxu1 %v5980_v41  ;;  %v1081_v2 = vrot.slane %v5715_v25, 1  ;;  %v1084_v25 = vrot.slane %v5720_v28, 1 }
  0xa8   : > { %5082 = vmatprep.mubr.bf16.mxu0 %v6078_v12  ;;  %5115 = vmatpush3.bf16.msra.mxu0 %v5579_v18  ;;  %v1082_v12 = vrot.slane %v5718_v27, 1  ;;  %v1086_v27 = vrot.slane %v5742_v42, 1  ;;  %v3454_v18 = vld [vmem:[%s6317_s29 + $0x30] sm:$0xff] }
  0xa9   : > { %5116 = vmatprep.subr.bf16.mxu0 %v5581_v26 }
  0xaa   : > { %v1083_v34 = vsel %vm1080_vm4, %v1081_v2, %v1082_v12  ;;  %v3455_v2 = vld [vmem:[%s6317_s29 + $0x38] sm:$0xff] }
  0xac   : > { %5117 = vmatpush3.bf16.msra.mxu0 %v5581_v26  ;;  %v6351_v26 = vpack.c.bf16 %v374_v7, %v374_v7  ;;  %v1104_v7 = vrot.slane %v5931_v46, 1 }
  0xad   : > { %5118 = vmatprep.subr.bf16.mxu0 %v5583_v54 }
  0xae   : > { %4839 = vmatmul.mubr.bf16.gmra.mrb[28].mxu1 %v5994_v59 }
  0xaf   : > { %5083 = vmatmul.mubr.bf16.gmra.mrb[12].mxu0 %v6102_v56  ;;  %4842 = vmatprep.mubr.bf16.mxu1 %v6018_v44  ;;  %v6297_v56 = vsel %vm1080_vm4, %v1084_v25, %v1086_v27 }
  0xb0   : > { %5086 = vmatprep.mubr.bf16.mxu0 %v6143_v9  ;;  %5119 = vmatpush3.bf16.msra.mxu0 %v5583_v54  ;;  %v6294_v9 = vsel %vm1080_vm4, %v1082_v12, %v1084_v25  ;;  %v5588_v54 = vld [vmem:[%s6820_s1 + $0xe8] sm:$0xff]   ;;  %v3456_v12 = vld [vmem:[%s6317_s29 + $0x40] sm:$0xff]  ;;  %v1098_v25 = vrot.slane %v5853_v15, 1 }
  0xb1   : > { %5120 = vmatprep.subr.bf16.mxu0 %v5585_v37 }
  0xb4   : > { %5121 = vmatpush3.bf16.msra.mxu0 %v5585_v37  ;;  %v1096_v37 = vrot.slane %v5851_v14, 1 }
  0xb5   : > { %5158 = vmatprep.subr.bf16.mxu0 %v6283_v36 }
  0xb6   : > { %4843 = vmatmul.mubr.bf16.gmra.mrb[32].mxu1 %v6028_v49 }
  0xb7   : > { %5087 = vmatmul.mubr.bf16.gmra.mrb[16].mxu0 %v6149_v22  ;;  %4862 = vmatprep.mubr.bf16.mxu1 %v1083_v34  ;;  %v1088_v22 = vrot.slane %v5774_v13, 1  ;;  %v2424_v34 = vrot.slane %v6351_v26, 2 }
  0xb8   : > { %5090 = vmatprep.mubr.bf16.mxu0 %v6172_v11  ;;  %v1090_v11 = vrot.slane %v5780_v16, 1 }
  0xb9   : > { %v6322_v62 = vsel %vm1080_vm4, %v1086_v27, %v1088_v22  ;;  %v5590_v27 = vld [vmem:[%s6820_s1 + $0xf0] sm:$0xff]  }
  0xba   : > { %v6326_v39 = vsel %vm1080_vm4, %v1088_v22, %v1090_v11  ;;  %v6345_v50 = vsel %vm1080_vm4, %v1090_v11, %v1092_v55  ;;  %v3458_v22 = vld [vmem:[%s6317_s29 + $0x50] sm:$0xff] }
  0xbe   : > { %4863 = vmatmul.mubr.bf16.vlgmr.msra.gmra.mrb[0].mxu1 %v6294_v9 }
  0xbf   : > { %5091 = vmatmul.mubr.bf16.gmra.mrb[20].mxu0 %v6175_v30  ;;  %4899 = vmatpush3.bf16.msra.mxu1 %v5578_v38  ;;  %v5614_v30 = vmov 0   ;;  %v1094_v38 = vrot.slane %v5804_v35, 1 }
  0xc0   : > { %4866 = vmatprep.mubr.bf16.mxu1 %v6297_v56  ;;  %5094 = vmatprep.mubr.bf16.mxu0 %v6191_v29  ;;  %v3450_v29 = vld [vmem:[%s6317_s29 + $0x10] sm:$0xff] }
  0xc1   : > { %4900 = vmatprep.subr.bf16.mxu1 %v5580_v40  ;;  %5524 = vset.pattern.permute.xlu0 %v5614_v30 }
  0xc2   : > { %3486 = vperm.xlu0 %5524, %v3448_v45   ;;  %5525 = vset.pattern.permute.xlu1 %v5614_v30  ;;  %v5592_v30 = vld [vmem:[%s6820_s1 + $0xf8] sm:$0xff]   ;;  %v1100_v45 = vrot.slane %v5887_v58, 1 }
  0xc3   : > { %4901 = vmatpush3.bf16.msra.mxu1 %v5580_v40  ;;  %3496 = vperm.xlu1 %5525, %v3450_v29   ;;  %v6370_v40 = vsel %vm1080_vm4, %v1094_v38, %v1096_v37  ;;  %v3459_v29 = vld [vmem:[%s6317_s29 + $0x58] sm:$0xff] }
  0xc4   : > { %4902 = vmatprep.subr.bf16.mxu1 %v5582_v3 }
  0xc6   : > { %4867 = vmatmul.mubr.bf16.gmra.mrb[4].mxu1 %v6322_v62  ;;  %3491 = vperm.xlu0 %5524, %v3449_v6   ;;  %v3460_v6 = vld [vmem:[%s6317_s29 + $0x60] sm:$0xff] }
  0xc7   : > { %5095 = vmatmul.mubr.bf16.gmra.mrb[24].mxu0 %v6194_v4  ;;  %4870 = vmatprep.mubr.bf16.mxu1 %v6326_v39  ;;  %v3453_v4 = vld [vmem:[%s6317_s29 + $0x28] sm:$0xff] }
  0xc8   : > { %5098 = vmatprep.mubr.bf16.mxu0 %v6208_v24  ;;  %4903 = vmatpush3.bf16.msra.mxu1 %v5582_v3  ;;  %v6349_v24 = vsel %vm1080_vm4, %v1092_v55, %v1094_v38  ;;  %v6377_v3 = vsel %vm1080_vm4, %v1096_v37, %v1098_v25  ;;  %v6391_v55 = vsel %vm1080_vm4, %v1098_v25, %v1100_v45  ;;  %v6403_v38 = vld [vmem:[%s6820_s1 + $0x100] sm:$0xff]  }
  0xc9   : > { %4904 = vmatprep.subr.bf16.mxu1 %v5584_v19  ;;  %3501 = vperm.xlu1 %5525, %v3451_v33   ;;  %v3462_v33 = vld [vmem:[%s6317_s29 + $0x70] sm:$0xff]  ;;  %v6420_v37 = vsel %vm1080_vm4, %v1102_v61, %v1104_v7  ;;  %v3468_v25 = vld [vmem:[%s6317_s29 + $0xa0] sm:$0xff] }
  0xca   : > { %3506 = vperm.xlu0 %5524, %v3452_v8   ;;  %v6395_v8 = vsel %vm1080_vm4, %v1100_v45, %v1102_v61  ;;  %v6880_v61 = vld [vmem:[#allocation4_spill] sm:$0xff] }
  0xcc   : > { %4905 = vmatpush3.bf16.msra.mxu1 %v5584_v19  ;;  %v3461_v19 = vld [vmem:[%s6317_s29 + $0x68] sm:$0xff] }
  0xcd   : > { %4906 = vmatprep.subr.bf16.mxu1 %v5586_v10  ;;  %3511 = vperm.xlu1 %5525, %v3453_v4   ;;  %v3464_v4 = vld [vmem:[%s6317_s29 + $0x80] sm:$0xff] }
  0xce   : > { %4871 = vmatmul.mubr.bf16.gmra.mrb[8].mxu1 %v6345_v50  ;;  %3516 = vperm.xlu0 %5524, %v3454_v18   ;;  %v1106_v18 = vrot.slane %v5945_v60, 1 }
  0xcf   : > { %5099 = vmatmul.mubr.bf16.gmra.mrb[28].mxu0 %v6216_v53  ;;  %4874 = vmatprep.mubr.bf16.mxu1 %v6349_v24  ;;  %v3457_v53 = vld [vmem:[%s6317_s29 + $0x48] sm:$0xff] }
  0xd0   : > { %5102 = vmatprep.mubr.bf16.mxu0 %v6112_v1  ;;  %4907 = vmatpush3.bf16.msra.mxu1 %v5586_v10  ;;  %v6877_v1 = vrot.slane %v6089_v23, 2  ;;  %v3463_v10 = vld [vmem:[%s6317_s29 + $0x78] sm:$0xff] }
  0xd1   : > { %4908 = vmatprep.subr.bf16.mxu1 %v5588_v54  ;;  %3521 = vperm.xlu1 %5525, %v3455_v2   ;;  %v3466_v2 = vld [vmem:[%s6317_s29 + $0x90] sm:$0xff] }
  0xd2   : > { %3526 = vperm.xlu0 %5524, %v3456_v12   ;;  %v2425_v11 = vsel %vm2084_vm2, %v6877_v1, %v2424_v34  ;;  %v1108_v12 = vrot.slane %v5980_v41, 1  ;;  %v3467_v34 = vld [vmem:[%s6317_s29 + $0x98] sm:$0xff]  ;;  %v3470_v1 = vld [vmem:[%s6317_s29 + $0xb0] sm:$0xff] }
  0xd4   : > { %4909 = vmatpush3.bf16.msra.mxu1 %v5588_v54  ;;  %v5591_v54 = vld [vmem:[%s6820_s1 + $0x210] sm:$0xff]  }
  0xd5   : > { %4910 = vmatprep.subr.bf16.mxu1 %v5590_v27  ;;  %3531 = vperm.xlu1 %5525, %v3457_v53   ;;  %v5594_v53 = vld [vmem:[%s6820_s1 + $0x220] sm:$0xff]  }
  0xd6   : > { %4875 = vmatmul.mubr.bf16.gmra.mrb[12].mxu1 %v6370_v40  ;;  %3536 = vperm.xlu0 %5524, %v3458_v22   ;;  %v6442_v22 = vsel %vm1080_vm4, %v1106_v18, %v1108_v12 }
  0xd7   : > { %5103 = vmatmul.mubr.bf16.gmra.mrb[32].mxu0 %v2425_v11  ;;  %4878 = vmatprep.mubr.bf16.mxu1 %v6377_v3 }
  0xd8   : > { %5122 = vmatprep.mubr.bf16.mxu0 %v6118_v17  ;;  %4911 = vmatpush3.bf16.msra.mxu1 %v5590_v27  ;;  %v5589_v17 = vld [vmem:[%s6820_s1 + $0x208] sm:$0xff]   ;;  %v1110_v27 = vrot.slane %v5994_v59, 1 }
  0xd9   : > { %4912 = vmatprep.subr.bf16.mxu1 %v5592_v30  ;;  %3541 = vperm.xlu1 %5525, %v3459_v29   ;;  %v6879_v29 = vld [vmem:[#allocation6_spill] sm:$0xff] }
  0xda   : > { %3546 = vperm.xlu0 %5524, %v3460_v6   ;;  %v6446_v11 = vsel %vm1080_vm4, %v1108_v12, %v1110_v27  ;;  %v2742_v6 = vrot.slane %v6879_v29, 2 }
  0xdc   : > { %4913 = vmatpush3.bf16.msra.mxu1 %v5592_v30  ;;  %v6878_v30 = vld [vmem:[#allocation3_spill] sm:$0xff] }
  0xdd   : > { %5210 = vmatprep.subr.bf16.mxu1 %v6403_v38  ;;  %3551 = vperm.xlu1 %5525, %v3461_v19   ;;  %v2739_v45 = vrot.slane %v6878_v30, 3  ;;  %v2743_v19 = vrot.slane %v6880_v61, 3 }
  0xde   : > { %4879 = vmatmul.mubr.bf16.gmra.mrb[16].mxu1 %v6391_v55  ;;  %3556 = vperm.xlu0 %5524, %v3462_v33   ;;  %v5595_v33 = vld [vmem:[%s6820_s1 + $0x228] sm:$0xff]  }
  0xdf   : > { %5123 = vmatmul.mubr.bf16.vlgmr.msra.gmra.mrb[0].mxu0 %v6132_v5  ;;  %4882 = vmatprep.mubr.bf16.mxu1 %v6395_v8  ;;  %v3465_v5 = vld [vmem:[%s6317_s29 + $0x88] sm:$0xff] }
  0xe0   : > { %5126 = vmatprep.mubr.bf16.mxu0 %v6138_v47  ;;  %5159 = vmatpush3.bf16.msra.mxu0 %v6283_v36  ;;  %v6424_v47 = vsel %vm1080_vm4, %v1104_v7, %v1106_v18  ;;  %v5593_v36 = vld [vmem:[%s6820_s1 + $0x218] sm:$0xff]   ;;  %v1112_v7 = vrot.slane %v6018_v44, 1  ;;  %v6463_v18 = vrot.slane %v6028_v49, 1  ;;  %v3478_v49 = vld [vmem:[%s6317_s29 + $0xf0] sm:$0xff]  ;;  %v6886_v44 = vld [vmem:[#allocation11_spill] sm:$0xff] }
  0xe1   : > { %5160 = vmatprep.subr.bf16.mxu0 %v5589_v17  ;;  %3561 = vperm.xlu1 %5525, %v3463_v10   ;;  %v3472_v10 = vld [vmem:[%s6317_s29 + $0xc0] sm:$0xff] }
  0xe2   : > { %3566 = vperm.xlu0 %5524, %v3464_v4   ;;  %v6477_v12 = vsel %vm1080_vm4, %v1112_v7, %v6463_v18 }
  0xe4   : > { %5161 = vmatpush3.bf16.msra.mxu0 %v5589_v17  ;;  %v3471_v17 = vld [vmem:[%s6317_s29 + $0xb8] sm:$0xff] }
  0xe5   : > { %5162 = vmatprep.subr.bf16.mxu0 %v5591_v54  ;;  %3571 = vperm.xlu1 %5525, %v3465_v5   ;;  %v5596_v5 = vld [vmem:[%s6820_s1 + $0x230] sm:$0xff]  }
  0xe6   : > { %4883 = vmatmul.mubr.bf16.gmra.mrb[20].mxu1 %v6420_v37  ;;  %3576 = vperm.xlu0 %5524, %v3466_v2   ;;  %v6470_v2 = vsel %vm1080_vm4, %v1110_v27, %v1112_v7  ;;  %v6884_v27 = vld [vmem:[#allocation8_spill] sm:$0xff]  ;;  %v3476_v7 = vld [vmem:[%s6317_s29 + $0xe0] sm:$0xff] }
  0xe7   : > { %5127 = vmatmul.mubr.bf16.gmra.mrb[4].mxu0 %v6146_v57  ;;  %4886 = vmatprep.mubr.bf16.mxu1 %v6424_v47  ;;  %v3469_v57 = vld [vmem:[%s6317_s29 + $0xa8] sm:$0xff] }
  0xe8   : > { %5130 = vmatprep.mubr.bf16.mxu0 %v6153_v52  ;;  %5163 = vmatpush3.bf16.msra.mxu0 %v5591_v54  ;;  %v2738_v52 = vrot.slane %v5918_v20, 2  ;;  %v2744_v54 = vor.u32 %v2743_v19, %v2742_v6  ;;  %v2751_v6 = vrot.slane %v6884_v27, 3  ;;  %v3475_v19 = vld [vmem:[%s6317_s29 + $0xd8] sm:$0xff]  ;;  %v2754_v27 = vrot.slane %v6886_v44, 2 }
  0xe9   : > { %5164 = vmatprep.subr.bf16.mxu0 %v5593_v36  ;;  %3581 = vperm.xlu1 %5525, %v3467_v34   ;;  %v6881_v34 = vld [vmem:[#allocation7_spill] sm:$0xff] }
  0xea   : > { %3586 = vperm.xlu0 %5524, %v3468_v25   ;;  %v2740_v4 = vor.u32 %v2739_v45, %v2738_v52  ;;  %v2746_v25 = vrot.slane %v6881_v34, 2  ;;  %v6883_v52 = vld [vmem:[#allocation10_spill] sm:$0xff] }
  0xeb   : > { %v2750_v45 = vrot.slane %v6883_v52, 2 }
  0xec   : > { %5165 = vmatpush3.bf16.msra.mxu0 %v5593_v36  ;;  %v3474_v36 = vld [vmem:[%s6317_s29 + $0xd0] sm:$0xff] }
  0xed   : > { %5166 = vmatprep.subr.bf16.mxu0 %v5594_v53  ;;  %3591 = vperm.xlu1 %5525, %v3469_v57  }
  0xee   : > { %4887 = vmatmul.mubr.bf16.gmra.mrb[24].mxu1 %v6442_v22  ;;  %3596 = vperm.xlu0 %5524, %v3470_v1   ;;  %v2745_v1 = vsel %vm2706_vm3, %v2740_v4, %v2744_v54 }
  0xef   : > { %5131 = vmatmul.mubr.bf16.gmra.mrb[8].mxu0 %v6158_v32  ;;  %4890 = vmatprep.mubr.bf16.mxu1 %v6446_v11  ;;  %v3473_v32 = vld [vmem:[%s6317_s29 + $0xc8] sm:$0xff] }
  0xf0   : > { %5134 = vmatprep.mubr.bf16.mxu0 %v6169_v21  ;;  %5167 = vmatpush3.bf16.msra.mxu0 %v5594_v53  ;;  %v2741_v21 = vsel %vm2706_vm3, %v6165_v48, %v2740_v4  ;;  %v6882_v53 = vld [vmem:[#allocation5_spill] sm:$0xff]  ;;  %v2752_v4 = vor.u32 %v2751_v6, %v2750_v45 }
  0xf1   : > { %5168 = vmatprep.subr.bf16.mxu0 %v5595_v33  ;;  %3601 = vperm.xlu1 %5525, %v3471_v17   ;;  %v2747_v57 = vrot.slane %v6882_v53, 3  ;;  %v5597_v48 = vld [vmem:[%s6820_s1 + $0x238] sm:$0xff]  }
  0xf2   : > { %3606 = vperm.xlu0 %5524, %v3472_v10   ;;  %v3479_v6 = vld [vmem:[%s6317_s29 + $0xf8] sm:$0xff] }
  0xf3   : > { %v2748_v10 = vor.u32 %v2747_v57, %v2746_v25  ;;  %v6888_v25 = vld [vmem:[#allocation15_spill] sm:$0xff] }
  0xf4   : > { %5169 = vmatpush3.bf16.msra.mxu0 %v5595_v33  ;;  %v6885_v33 = vld [vmem:[#allocation19_spill] sm:$0xff]  ;;  %v2758_v57 = vrot.slane %v6888_v25, 2  ;;  %v6890_v25 = vld [vmem:[#allocation17_spill] sm:$0xff] }
  0xf5   : > { %5170 = vmatprep.subr.bf16.mxu0 %v5596_v5  ;;  %3611 = vperm.xlu1 %5525, %v3473_v32   ;;  %v1116_v17 = vrot.slane %v6885_v33, 1  ;;  %v3477_v32 = vld [vmem:[%s6317_s29 + $0xe8] sm:$0xff]  ;;  %v6887_v33 = vld [vmem:[#allocation9_spill] sm:$0xff] }
  0xf6   : > { %4891 = vmatmul.mubr.bf16.gmra.mrb[28].mxu1 %v6470_v2  ;;  %3616 = vperm.xlu0 %5524, %v3474_v36   ;;  %v2755_v52 = vrot.slane %v6887_v33, 3 }
  0xf7   : > { %5135 = vmatmul.mubr.bf16.gmra.mrb[12].mxu0 %v2741_v21  ;;  %4894 = vmatprep.mubr.bf16.mxu1 %v6477_v12  ;;  %v1117_v36 = vsel %vm1080_vm4, %v6463_v18, %v1116_v17  ;;  %v2749_v21 = vsel %vm2706_vm3, %v2744_v54, %v2748_v10  ;;  %v3480_v54 = vld [vmem:[%s6317_s29 + $0x100] sm:$0xff]  ;;  %v3481_v17 = vld [vmem:[%s6317_s29 + $0x108] sm:$0xff] }
  0xf8   : > { %5138 = vmatprep.mubr.bf16.mxu0 %v2745_v1  ;;  %5171 = vmatpush3.bf16.msra.mxu0 %v5596_v5  ;;  %v2753_v5 = vsel %vm2706_vm3, %v2748_v10, %v2752_v4  ;;  %v6889_v1 = vld [vmem:[#allocation12_spill] sm:$0xff] }
  0xf9   : > { %5172 = vmatprep.subr.bf16.mxu0 %v5597_v48  ;;  %3621 = vperm.xlu1 %5525, %v3475_v19   ;;  %v2759_v45 = vrot.slane %v6889_v1, 3  ;;  %v2756_v19 = vor.u32 %v2755_v52, %v2754_v27  ;;  %v2762_v1 = vrot.slane %v6890_v25, 2  ;;  %v3483_v52 = vld [vmem:[%s6317_s29 + $0x118] sm:$0xff] }
  0xfa   : > { %3626 = vperm.xlu0 %5524, %v3476_v7   ;;  %v3482_v7 = vld [vmem:[%s6317_s29 + $0x110] sm:$0xff] }
  0xfb   : > { %v2757_v10 = vsel %vm2706_vm3, %v2752_v4, %v2756_v19  ;;  %v1771_v4 = vshrl.u32 %v6068_v63, 16 }
  0xfc   : > { %5173 = vmatpush3.bf16.msra.mxu0 %v5597_v48  ;;  %v2760_v48 = vor.u32 %v2759_v45, %v2758_v57  ;;  %v5599_v57 = vld [vmem:[%s6820_s1 + $0x108] sm:$0xff]  }
  0xfd   : > { %3631 = vperm.xlu1 %5525, %v3477_v32   ;;  %v6891_v32 = vld [vmem:[#allocation16_spill] sm:$0xff] }
  0xfe   : > { %4895 = vmatmul.mubr.bf16.gmra.mrb[32].mxu1 %v1117_v36  ;;  %3636 = vperm.xlu0 %5524, %v3478_v49   ;;  %v2763_v36 = vrot.slane %v6891_v32, 3  ;;  %v2761_v49 = vsel %vm2706_vm3, %v2756_v19, %v2760_v48 }
  0xff   : > { %5139 = vmatmul.mubr.bf16.gmra.mrb[16].mxu0 %v2749_v21  ;;  %4914 = vmatprep.mubr.bf16.mxu1 %v6294_v9  ;;  %v2766_v21 = vrot.slane %v6085_v51, 2  ;;  %v6892_v9 = vld [vmem:[#allocation18_spill] sm:$0xff] }
 0x100   : > { %5142 = vmatprep.mubr.bf16.mxu0 %v2753_v5  ;;  %v2767_v33 = vrot.slane %v6892_v9, 3  ;;  %v2764_v27 = vor.u32 %v2763_v36, %v2762_v1  ;;  %v1774_v5 = vshll.u32 %v6068_v63, 16 }
 0x101   : > { %3641 = vperm.xlu1 %5525, %v3479_v6   ;;  %v2778_v6 = vshll.u32 %v6089_v23, 16 }
 0x102   : > { %3646 = vperm.xlu0 %5524, %v3480_v54   ;;  %v2768_v45 = vor.u32 %v2767_v33, %v2766_v21  ;;  %v2771_v1 = vrot.slane %v1774_v5, 3  ;;  %v5600_v54 = vld [vmem:[%s6820_s1 + $0x110] sm:$0xff]  }
 0x104   : > { %v2769_v33 = vsel %vm2706_vm3, %v2764_v27, %v2768_v45 }
 0x105   : > { %3651 = vperm.xlu1 %5525, %v3481_v17   ;;  %v2780_v17 = vrot.slane %v2778_v6, 3  ;;  %v5603_v6 = vld [vmem:[%s6820_s1 + $0x128] sm:$0xff]  }
 0x106   : > { %4915 = vmatmul.mubr.bf16.vlgmr.msra.gmra.mrb[0].mxu1 %v6297_v56  ;;  %3656 = vperm.xlu0 %5524, %v3482_v7   ;;  %v2775_v56 = vshrl.u32 %v6089_v23, 16  ;;  %v2784_v7 = vshrl.u32 %v6351_v26, 16 }
 0x107   : > { %5143 = vmatmul.mubr.bf16.gmra.mrb[20].mxu0 %v2757_v10  ;;  %5218 = vmatpush3.bf16.msra.mxu1 %v6403_v38  ;;  %v2770_v38 = vrot.slane %v1771_v4, 2  ;;  %v2787_v10 = vshll.u32 %v6351_v26, 16 }
 0x108   : > { %4918 = vmatprep.mubr.bf16.mxu1 %v6322_v62  ;;  %5146 = vmatprep.mubr.bf16.mxu0 %v2761_v49  ;;  %v2765_v62 = vsel %vm2706_vm3, %v2760_v48, %v2764_v27  ;;  %v2777_v19 = vrot.slane %v2775_v56, 2  ;;  %v5601_v49 = vld [vmem:[%s6820_s1 + $0x118] sm:$0xff]   ;;  %v5602_v27 = vld [vmem:[%s6820_s1 + $0x120] sm:$0xff]   ;;  %v3090_v56 = vrot.slane %v5742_v42, 3  ;;  %v3094_v42 = vrot.slane %v5780_v16, 3 }
 0x109   : > { %5211 = vmatprep.subr.bf16.mxu1 %v5599_v57  ;;  %3661 = vperm.xlu1 %5525, %v3483_v52   ;;  %v2772_v48 = vor.u32 %v2771_v1, %v2770_v38  ;;  %v2786_v52 = vrot.slane %v2784_v7, 2  ;;  %v5605_v38 = vld [vmem:[%s6820_s1 + $0x138] sm:$0xff]   ;;  %v3098_v16 = vrot.slane %v5804_v35, 3  ;;  %v3104_v35 = vrot.slane %v5887_v58, 3 }
 0x10a   : > { %v2781_v36 = vor.u32 %v2780_v17, %v2777_v19  ;;  %v1738_v19 = vrot.slane %v5918_v20, 1  ;;  %v1739_v17 = vrot.slane %v6878_v30, 2  ;;  %v1420_v58 = vrot.slane %v6212_v43, 1 }
 0x10b   : > { %5219 = vmatpush3.bf16.msra.mxu1 %v5599_v57  ;;  %v2773_v21 = vsel %vm2706_vm3, %v2768_v45, %v2772_v48  ;;  %v3089_v45 = vrot.slane %v5720_v28, 3  ;;  %v3092_v28 = vrot.slane %v5774_v13, 3  ;;  %v3096_v13 = vrot.slane %v5799_v31, 3 }
 0x10c   : > { %5212 = vmatprep.subr.bf16.mxu1 %v5600_v54  ;;  %v1742_v20 = vrot.slane %v6879_v29, 1  ;;  %v1743_v30 = vrot.slane %v6880_v61, 2  ;;  %v3112_v29 = vrot.slane %v5980_v41, 3  ;;  %v3114_v61 = vrot.slane %v5994_v59, 3  ;;  %v6897_v59 = vld [vmem:[#allocation13_spill] sm:$0xff] }
 0x10d   : > { %v3093_v1 = vsel %vm3088_vm5, %v3090_v56, %v3092_v28 }
 0x10e   : > { %4919 = vmatmul.mubr.bf16.gmra.mrb[4].mxu1 %v6326_v39  ;;  %v2789_v39 = vrot.slane %v2787_v10, 3  ;;  %v6893_v10 = vld [vmem:[#allocation2_spill] sm:$0xff] }
 0x10f   : > { %5147 = vmatmul.mubr.bf16.gmra.mrb[24].mxu0 %v2765_v62  ;;  %4922 = vmatprep.mubr.bf16.mxu1 %v6345_v50  ;;  %v2782_v50 = vsel %vm2706_vm3, %v2772_v48, %v2781_v36  ;;  %v3110_v48 = vrot.slane %v5945_v60, 3  ;;  %v1744_v60 = vor.u32 %v1743_v30, %v1742_v20 }
 0x110   : > { %5150 = vmatprep.mubr.bf16.mxu0 %v2769_v33  ;;  %5220 = vmatpush3.bf16.msra.mxu1 %v5600_v54  ;;  %v2790_v57 = vor.u32 %v2789_v39, %v2786_v52  ;;  %v3095_v54 = vsel %vm3088_vm5, %v3092_v28, %v3094_v42  ;;  %v3102_v33 = vrot.slane %v5853_v15, 3  ;;  %v6894_v39 = vld [vmem:[#allocation10_spill] sm:$0xff] }
 0x111   : > { %5213 = vmatprep.subr.bf16.mxu1 %v5601_v49  ;;  %v6898_v28 = vld [vmem:[#allocation14_spill] sm:$0xff] }
 0x112   : > { %v2791_v62 = vsel %vm2706_vm3, %v2781_v36, %v2790_v57  ;;  %v1746_v36 = vrot.slane %v6881_v34, 1 }
 0x114   : > { %5221 = vmatpush3.bf16.msra.mxu1 %v5601_v49  ;;  %v1747_v49 = vrot.slane %v6882_v53, 2  ;;  %v3113_v53 = vsel %vm3088_vm5, %v3110_v48, %v3112_v29 }
 0x115   : > { %5214 = vmatprep.subr.bf16.mxu1 %v5602_v27 }
 0x116   : > { %4923 = vmatmul.mubr.bf16.gmra.mrb[8].mxu1 %v6349_v24  ;;  %v3091_v24 = vsel %vm3088_vm5, %v3089_v45, %v3090_v56  ;;  %v1754_v45 = vrot.slane %v6886_v44, 1  ;;  %v6896_v56 = vld [vmem:[#allocation9_spill] sm:$0xff] }
 0x117   : > { %5151 = vmatmul.mubr.bf16.gmra.mrb[28].mxu0 %v2773_v21  ;;  %4926 = vmatprep.mubr.bf16.mxu1 %v6370_v40  ;;  %v5604_v40 = vld [vmem:[%s6820_s1 + $0x130] sm:$0xff]   ;;  %v1748_v21 = vor.u32 %v1747_v49, %v1746_v36 }
 0x118   : > { %5154 = vmatprep.mubr.bf16.mxu0 %v2782_v50  ;;  %5222 = vmatpush3.bf16.msra.mxu1 %v5602_v27  ;;  %v1750_v50 = vrot.slane %v6894_v39, 1  ;;  %v6895_v27 = vld [vmem:[#allocation8_spill] sm:$0xff] }
 0x119   : > { %5215 = vmatprep.subr.bf16.mxu1 %v5603_v6  ;;  %v1751_v34 = vrot.slane %v6895_v27, 2  ;;  %v1749_v57 = vsel %vm1702_vm1, %v1744_v60, %v1748_v21 }
 0x11b   : > { %v1752_v41 = vor.u32 %v1751_v34, %v1750_v50 }
 0x11c   : > { %5223 = vmatpush3.bf16.msra.mxu1 %v5603_v6  ;;  %v1755_v6 = vrot.slane %v6896_v56, 2 }
 0x11d   : > { %5216 = vmatprep.subr.bf16.mxu1 %v5604_v40 }
 0x11e   : > { %4927 = vmatmul.mubr.bf16.gmra.mrb[12].mxu1 %v6377_v3  ;;  %v3097_v3 = vsel %vm3088_vm5, %v3094_v42, %v3096_v13  ;;  %v3118_v42 = vrot.slane %v6898_v28, 3 }
 0x11f   : > { %5155 = vmatmul.mubr.bf16.gmra.mrb[32].mxu0 %v2791_v62  ;;  %4930 = vmatprep.mubr.bf16.mxu1 %v6391_v55  ;;  %v3099_v55 = vsel %vm3088_vm5, %v3096_v13, %v3098_v16  ;;  %v3115_v62 = vsel %vm3088_vm5, %v3112_v29, %v3114_v61  ;;  %v6900_v13 = vld [vmem:[#allocation12_spill] sm:$0xff] }
 0x120   : > { %5174 = vmatprep.mubr.bf16.mxu0 %v3091_v24  ;;  %5224 = vmatpush3.bf16.msra.mxu1 %v5604_v40  ;;  %v3116_v24 = vrot.slane %v6897_v59, 3  ;;  %v1756_v40 = vor.u32 %v1755_v6, %v1754_v45  ;;  %v1759_v44 = vrot.slane %v6900_v13, 2 }
 0x121   : > { %5217 = vmatprep.subr.bf16.mxu1 %v5605_v38 }
 0x124   : > { %5225 = vmatpush3.bf16.msra.mxu1 %v5605_v38  ;;  %v1753_v38 = vsel %vm1702_vm1, %v1748_v21, %v1752_v41 }
 0x126   : > { %4931 = vmatmul.mubr.bf16.gmra.mrb[16].mxu1 %v6395_v8  ;;  %v3100_v8 = vrot.slane %v5851_v14, 3  ;;  %v3105_v14 = vsel %vm3088_vm5, %v3102_v33, %v3104_v35 }
 0x127   : > { %5175 = vmatmul.mubr.bf16.vlgmr.msra.gmra.mrb[0].mxu0 %v3093_v1  ;;  %4934 = vmatprep.mubr.bf16.mxu1 %v6420_v37  ;;  %v6899_v1 = vld [vmem:[#allocation15_spill] sm:$0xff] }
 0x128   : > { %5178 = vmatprep.mubr.bf16.mxu0 %v3095_v54  ;;  %v3101_v37 = vsel %vm3088_vm5, %v3098_v16, %v3100_v8  ;;  %v3103_v31 = vsel %vm3088_vm5, %v3100_v8, %v3102_v33  ;;  %v1758_v54 = vrot.slane %v6899_v1, 1  ;;  %v3117_v16 = vsel %vm3088_vm5, %v3114_v61, %v3116_v24 }
 0x129   : > { %v1763_v8 = vrot.slane %v6891_v32, 2  ;;  %v3119_v33 = vsel %vm3088_vm5, %v3116_v24, %v3118_v42 }
 0x12e   : > { %4935 = vmatmul.mubr.bf16.gmra.mrb[20].mxu1 %v6424_v47  ;;  %v1418_v47 = vrot.slane %v6068_v63, 1 }
 0x12f   : > { %5179 = vmatmul.mubr.bf16.gmra.mrb[4].mxu0 %v3097_v3  ;;  %4938 = vmatprep.mubr.bf16.mxu1 %v6442_v22  ;;  %v3106_v22 = vrot.slane %v5895_v0, 3  ;;  %v3108_v0 = vrot.slane %v5931_v46, 3  ;;  %v1757_v3 = vsel %vm1702_vm1, %v1752_v41, %v1756_v40 }
 0x130   : > { %5182 = vmatprep.mubr.bf16.mxu0 %v3099_v55  ;;  %v1419_v15 = vsel %vm1080_vm4, %v6463_v18, %v1418_v47  ;;  %v1421_v18 = vsel %vm1080_vm4, %v1418_v47, %v1420_v58  ;;  %v1762_v55 = vrot.slane %v6890_v25, 1  ;;  %v3122_v47 = vrot.slane %v6089_v23, 3 }
 0x131   : > { %v3109_v7 = vsel %vm3088_vm5, %v3106_v22, %v3108_v0  ;;  %v3111_v46 = vsel %vm3088_vm5, %v3108_v0, %v3110_v48  ;;  %v1767_v25 = vrot.slane %v6892_v9, 2  ;;  %v1783_v9 = vshll.u32 %v6212_v43, 16 }
 0x132   : > { %v3124_v58 = vrot.slane %v6351_v26, 3 }
 0x133   : > { %v1785_v48 = vrot.slane %v1783_v9, 2 }
 0x136   : > { %4939 = vmatmul.mubr.bf16.gmra.mrb[24].mxu1 %v6446_v11  ;;  %v3107_v11 = vsel %vm3088_vm5, %v3104_v35, %v3106_v22  ;;  %v1764_v35 = vor.u32 %v1763_v8, %v1762_v55 }
 0x137   : > { %5183 = vmatmul.mubr.bf16.gmra.mrb[8].mxu0 %v3101_v37  ;;  %4942 = vmatprep.mubr.bf16.mxu1 %v6470_v2  ;;  %v1740_v2 = vor.u32 %v1739_v17, %v1738_v19  ;;  %v1760_v37 = vor.u32 %v1759_v44, %v1758_v54  ;;  %v1773_v19 = vrot.slane %v1771_v4, 1  ;;  %v1776_v17 = vrot.slane %v1774_v5, 2 }
 0x138   : > { %5186 = vmatprep.mubr.bf16.mxu0 %v3103_v31  ;;  %v3120_v31 = vrot.slane %v6068_v63, 3  ;;  %v3125_v63 = vsel %vm3088_vm5, %v3122_v47, %v3124_v58 }
 0x139   : > { %v1745_v52 = vsel %vm1702_vm1, %v1740_v2, %v1744_v60  ;;  %v1761_v22 = vsel %vm1702_vm1, %v1756_v40, %v1760_v37  ;;  %v1777_v0 = vor.u32 %v1776_v17, %v1773_v19 }
 0x13a   : > { %v3121_v32 = vsel %vm3088_vm5, %v3118_v42, %v3120_v31  ;;  %v6676_v42 = vld [vmem:[%s6821_s2] ss:$0 sm:$0xff] }
 0x13e   : > { %4943 = vmatmul.mubr.bf16.gmra.mrb[28].mxu1 %v6477_v12  ;;  %v1741_v12 = vsel %vm1702_vm1, %v6893_v10, %v1740_v2 }
 0x13f   : > { %5187 = vmatmul.mubr.bf16.gmra.mrb[12].mxu0 %v3105_v14  ;;  %4946 = vmatprep.mubr.bf16.mxu1 %v1419_v15  ;;  %v1766_v14 = vrot.slane %v6085_v51, 1  ;;  %v1765_v15 = vsel %vm1702_vm1, %v1760_v37, %v1764_v35  ;;  %v1780_v51 = vshrl.u32 %v6212_v43, 16 }
 0x140   : > { %5190 = vmatprep.mubr.bf16.mxu0 %v3107_v11  ;;  %v3123_v11 = vsel %vm3088_vm5, %v3120_v31, %v3122_v47 }
 0x141   : > { %v1768_v23 = vor.u32 %v1767_v25, %v1766_v14  ;;  %v1782_v4 = vrot.slane %v1780_v51, 1  ;;  %v3487_v43 = vpop.permute.xlu0 %3486 }
 0x142   : > { %v3497_v30 = vpop.permute.xlu1 %3496 }
 0x143   : > { %v1769_v2 = vsel %vm1702_vm1, %v1764_v35, %v1768_v23  ;;  %v1778_v5 = vsel %vm1702_vm1, %v1768_v23, %v1777_v0 }
 0x145   : > { %v3492_v36 = vpop.permute.xlu0 %3491 }
 0x146   : > { %4947 = vmatmul.mubr.bf16.gmra.mrb[32].mxu1 %v1421_v18  ;;  %v1786_v18 = vor.u32 %v1785_v48, %v1782_v4 }
 0x147   : > { %5191 = vmatmul.mubr.bf16.gmra.mrb[16].mxu0 %v3109_v7  ;;  %4982 = vmatprep.mubr.bf16.mxu1 %v1741_v12 }
 0x148   : > { %5194 = vmatprep.mubr.bf16.mxu0 %v3111_v46  ;;  %v1787_v20 = vsel %vm1702_vm1, %v1777_v0, %v1786_v18  ;;  %v3502_v49 = vpop.permute.xlu1 %3501 }
 0x149   : > { %v6641_v21 = vpop.permute.xlu0 %3506 }
 0x14d   : > { %v6647_v50 = vpop.permute.xlu0 %3516 }
 0x14e   : > { %4983 = vmatmul.mubr.bf16.vlgmr.msra.gmra.mrb[16].mxu1 %v1745_v52  ;;  %v6643_v52 = vpop.permute.xlu1 %3511 }
 0x14f   : > { %5195 = vmatmul.mubr.bf16.gmra.mrb[20].mxu0 %v3113_v53  ;;  %4986 = vmatprep.mubr.bf16.mxu1 %v1749_v57 }
 0x150   : > { %5198 = vmatprep.mubr.bf16.mxu0 %v3115_v62 }
 0x151   : > { %v6657_v45 = vpop.permute.xlu0 %3526 }
 0x152   : > { %v6651_v34 = vpop.permute.xlu1 %3521 }
 0x155   : > { %v6669_v24 = vpop.permute.xlu0 %3536 }
 0x156   : > { %4987 = vmatmul.mubr.bf16.gmra.mrb[20].mxu1 %v1753_v38  ;;  %v6659_v56 = vpop.permute.xlu1 %3531 }
 0x157   : > { %5199 = vmatmul.mubr.bf16.gmra.mrb[24].mxu0 %v3117_v16  ;;  %4990 = vmatprep.mubr.bf16.mxu1 %v1757_v3 }
 0x158   : > { %5202 = vmatprep.mubr.bf16.mxu0 %v3119_v33 }
 0x159   : > { %v6678_v54 = vpop.permute.xlu0 %3546 }
 0x15a   : > { %v6671_v40 = vpop.permute.xlu1 %3541 }
 0x15d   : > { %v6687_v25 = vpop.permute.xlu0 %3556 }
 0x15e   : > { %4991 = vmatmul.mubr.bf16.gmra.mrb[24].mxu1 %v1761_v22  ;;  %v6680_v16 = vpop.permute.xlu1 %3551 }
 0x15f   : > { %5203 = vmatmul.mubr.bf16.gmra.mrb[28].mxu0 %v3121_v32  ;;  %4994 = vmatprep.mubr.bf16.mxu1 %v1765_v15 }
 0x160   : > { %5206 = vmatprep.mubr.bf16.mxu0 %v3123_v11 }
 0x162   : > { %v6694_v19 = vpop.permute.xlu1 %3561 }
 0x166   : > { %4995 = vmatmul.mubr.bf16.gmra.mrb[28].mxu1 %v1769_v2 }
 0x167   : > { %5207 = vmatmul.mubr.bf16.gmra.mrb[32].mxu0 %v3125_v63  ;;  %4998 = vmatprep.mubr.bf16.mxu1 %v1778_v5 }
 0x16e   : > { %4999 = vmatmul.mubr.bf16.gmra.mrb[32].mxu1 %v1787_v20 }
 0x1d9   : > { %v4916_v7 = vpop.f32.mrb[0].mxu1 }
 0x1da   : > { %v1506_v26 = vpop.f32.mrb[1].mxu1 }
 0x1db   : > { %v4917_v10 = vpop.f32.mrb[2].mxu1 }
 0x1dc   : > { %v1509_v12 = vpop.f32.mrb[3].mxu1 }
 0x1e1   : > { %v4920_v46 = vpop.f32.mrb[4].mxu1 }
 0x1e2   : > { %v1522_v60 = vpop.f32.mrb[5].mxu1 }
 0x1e3   : > { %v4921_v29 = vpop.f32.mrb[6].mxu1 }
 0x1e4   : > { %v1525_v61 = vpop.f32.mrb[7].mxu1 }
 0x1e9   : > { %v6645_v39 = vpop.f32.mrb[8].mxu1 }
 0x1ea   : > { %v6649_v27 = vpop.f32.mrb[9].mxu1 }
 0x1eb   : > { %v6653_v53 = vpop.f32.mrb[10].mxu1 }
 0x1ec   : > { %v6655_v57 = vpop.f32.mrb[11].mxu1 }
 0x1f1   : > { %v6661_v6 = vpop.f32.mrb[12].mxu1 }
 0x1f2   : > { %v6663_v62 = vpop.f32.mrb[13].mxu1 }
 0x1f3   : > { %v6665_v41 = vpop.f32.mrb[14].mxu1 }
 0x1f4   : > { %v6667_v59 = vpop.f32.mrb[15].mxu1 }
 0x1fa   : > { %v5176_v28 = vpop.f32.mrb[0].mxu0 }
 0x1fb   : > { %v5226_v38 = vadd.f32 %v5176_v28, %v4916_v7  ;;  %v3226_v1 = vpop.f32.mrb[1].mxu0  ;;  %v6705_v28 = vpop.permute.xlu1 %3571 }
 0x1fc   : > { %v5227_v13 = vadd.f32 %v3226_v1, %v1506_v26  ;;  %v5177_v44 = vpop.f32.mrb[2].mxu0 }
 0x1fd   : > { %v3414_v3 = vadd.f32 %v5226_v38, %v6676_v42  ;;  %v5228_v55 = vadd.f32 %v5177_v44, %v4917_v10  ;;  %v3229_v8 = vpop.f32.mrb[3].mxu0 }
 0x1fe   : > { %v3412_v33 = vadd.f32 %v5227_v13, %v6676_v42  ;;  %v5229_v37 = vadd.f32 %v3229_v8, %v1509_v12  ;;  %v6701_v12 = vpop.permute.xlu0 %3566 }
 0x1ff   : > { %v3415_v31 = vadd.f32 %v5228_v55, %v6676_v42  ;;  %v3666_v22 = vmul.f32 %v3497_v30, %v3414_v3 }
 0x200   : > { %v3664_v35 = vmul.f32 %v3487_v43, %v3412_v33  ;;  %v3413_v47 = vadd.f32 %v5229_v37, %v6676_v42 }
 0x201   : > { %v3667_v14 = vmul.f32 %v3502_v49, %v3415_v31  ;;  %v3924_v48 = vmul.f32 %v3666_v22, %v3666_v22 }
 0x202   : > { %v3665_v32 = vmul.f32 %v3492_v36, %v3413_v47  ;;  %v5180_v15 = vpop.f32.mrb[4].mxu0  ;;  %v3922_v17 = vmul.f32 %v3664_v35, %v3664_v35 }
 0x203   : > { %v4409_v11 = vpack.c.bf16 %v3667_v14, %v3666_v22  ;;  %v5230_v23 = vadd.f32 %v5180_v15, %v4920_v46  ;;  %v3242_v51 = vpop.f32.mrb[5].mxu0  ;;  %v3925_v26 = vmul.f32 %v3667_v14, %v3667_v14 }
 0x204   : > { %v4404_v9 = vpack.c.bf16 %v3665_v32, %v3664_v35  ;;  %v3880_v58 = vadd.f32 %v3665_v32, %v3664_v35  ;;  %v3923_v0 = vmul.f32 %v3665_v32, %v3665_v32  ;;  %v5231_v2 = vadd.f32 %v3242_v51, %v1522_v60  ;;  %v5181_v4 = vpop.f32.mrb[6].mxu0 }
 0x205   : > { %4491 = vst [vmem:[%s6692_s9 + $0x8] sm:$0xff] %v4409_v11   ;;  %v3418_v63 = vadd.f32 %v5230_v23, %v6676_v42  ;;  %v5232_v5 = vadd.f32 %v5181_v4, %v4921_v29  ;;  %v3245_v18 = vpop.f32.mrb[7].mxu0  ;;  %v6719_v11 = vpop.permute.xlu1 %3581 }
 0x206   : > { %4405 = vst [vmem:[%s6692_s9] sm:$0xff] %v4404_v9   ;;  %v3881_v20 = vadd.f32 %v3880_v58, %v3666_v22  ;;  %v3958_v43 = vadd.f32 %v3923_v0, %v3922_v17  ;;  %v3416_v30 = vadd.f32 %v5231_v2, %v6676_v42  ;;  %v5233_v7 = vadd.f32 %v3245_v18, %v1525_v61 }
 0x207   : > { %v3419_v10 = vadd.f32 %v5232_v5, %v6676_v42  ;;  %v3670_v29 = vmul.f32 %v6647_v50, %v3418_v63 }
 0x208   : > { %v3959_v36 = vadd.f32 %v3958_v43, %v3924_v48  ;;  %v3668_v49 = vmul.f32 %v6641_v21, %v3416_v30  ;;  %v3882_v46 = vadd.f32 %v3881_v20, %v3667_v14  ;;  %v3417_v60 = vadd.f32 %v5233_v7, %v6676_v42 }
 0x209   : > { %v3671_v38 = vmul.f32 %v6651_v34, %v3419_v10  ;;  %v3928_v32 = vmul.f32 %v3670_v29, %v3670_v29 }
 0x20a   : > { %v3883_v1 = vadd.f32 %v3882_v46, %v3668_v49  ;;  %v3926_v61 = vmul.f32 %v3668_v49, %v3668_v49  ;;  %v3960_v13 = vadd.f32 %v3959_v36, %v3925_v26  ;;  %v3669_v44 = vmul.f32 %v6643_v52, %v3417_v60  ;;  %v5184_v3 = vpop.f32.mrb[8].mxu0  ;;  %v6715_v52 = vpop.permute.xlu0 %3576 }
 0x20b   : > { %v4419_v55 = vpack.c.bf16 %v3671_v38, %v3670_v29  ;;  %v5234_v21 = vadd.f32 %v5184_v3, %v6645_v39  ;;  %v3258_v8 = vpop.f32.mrb[9].mxu0  ;;  %v3929_v9 = vmul.f32 %v3671_v38, %v3671_v38 }
 0x20c   : > { %v3961_v33 = vadd.f32 %v3960_v13, %v3926_v61  ;;  %v4414_v37 = vpack.c.bf16 %v3669_v44, %v3668_v49  ;;  %v3884_v31 = vadd.f32 %v3883_v1, %v3669_v44  ;;  %v3927_v35 = vmul.f32 %v3669_v44, %v3669_v44  ;;  %v5185_v47 = vpop.f32.mrb[10].mxu0 }
 0x20d   : > { %4493 = vst [vmem:[%s6692_s9 + $0x18] sm:$0xff] %v4419_v55   ;;  %v3422_v50 = vadd.f32 %v5234_v21, %v6676_v42  ;;  %v5235_v34 = vadd.f32 %v3258_v8, %v6649_v27  ;;  %v5236_v22 = vadd.f32 %v5185_v47, %v6653_v53  ;;  %v3261_v14 = vpop.f32.mrb[11].mxu0 }
 0x20e   : > { %4492 = vst [vmem:[%s6692_s9 + $0x10] sm:$0xff] %v4414_v37   ;;  %v3885_v15 = vadd.f32 %v3884_v31, %v3670_v29  ;;  %v3962_v39 = vadd.f32 %v3961_v33, %v3927_v35  ;;  %v5237_v17 = vadd.f32 %v3261_v14, %v6655_v57  ;;  %v6728_v30 = vpop.permute.xlu0 %3586 }
 0x20f   : > { %v3420_v23 = vadd.f32 %v5235_v34, %v6676_v42  ;;  %v3423_v51 = vadd.f32 %v5236_v22, %v6676_v42  ;;  %v3674_v0 = vmul.f32 %v6669_v24, %v3422_v50 }
 0x210   : > { %v3963_v58 = vadd.f32 %v3962_v39, %v3928_v32  ;;  %v3886_v27 = vadd.f32 %v3885_v15, %v3671_v38  ;;  %v3421_v53 = vadd.f32 %v5237_v17, %v6676_v42 }
 0x211   : > { %v3672_v2 = vmul.f32 %v6657_v45, %v3420_v23  ;;  %v3675_v4 = vmul.f32 %v6671_v40, %v3423_v51  ;;  %v6732_v40 = vpop.permute.xlu1 %3591  ;;  %v3932_v1 = vmul.f32 %v3674_v0, %v3674_v0 }
 0x212   : > { %v3964_v48 = vadd.f32 %v3963_v58, %v3929_v9  ;;  %v3673_v57 = vmul.f32 %v6659_v56, %v3421_v53  ;;  %v5188_v63 = vpop.f32.mrb[12].mxu0  ;;  %v6745_v33 = vpop.permute.xlu0 %3596 }
 0x213   : > { %v3887_v5 = vadd.f32 %v3886_v27, %v3672_v2  ;;  %v3930_v18 = vmul.f32 %v3672_v2, %v3672_v2  ;;  %v4429_v20 = vpack.c.bf16 %v3675_v4, %v3674_v0  ;;  %v3274_v43 = vpop.f32.mrb[13].mxu0  ;;  %v5238_v24 = vadd.f32 %v5188_v63, %v6661_v6 }
 0x214   : > { %v4424_v7 = vpack.c.bf16 %v3673_v57, %v3672_v2  ;;  %v3931_v26 = vmul.f32 %v3673_v57, %v3673_v57  ;;  %v5239_v45 = vadd.f32 %v3274_v43, %v6663_v62  ;;  %v5189_v10 = vpop.f32.mrb[14].mxu0  ;;  %v3933_v13 = vmul.f32 %v3675_v4, %v3675_v4 }
 0x215   : > { %v3965_v36 = vadd.f32 %v3964_v48, %v3930_v18  ;;  %4495 = vst [vmem:[%s6692_s9 + $0x28] sm:$0xff] %v4429_v20   ;;  %v3888_v56 = vadd.f32 %v3887_v5, %v3673_v57  ;;  %v5240_v49 = vadd.f32 %v5189_v10, %v6665_v41  ;;  %v3277_v46 = vpop.f32.mrb[15].mxu0  ;;  %v3426_v60 = vadd.f32 %v5238_v24, %v6676_v42  ;;  %v6748_v35 = vpop.permute.xlu1 %3601 }
 0x216   : > { %4494 = vst [vmem:[%s6692_s9 + $0x20] sm:$0xff] %v4424_v7   ;;  %v3424_v29 = vadd.f32 %v5239_v45, %v6676_v42  ;;  %v5241_v38 = vadd.f32 %v3277_v46, %v6667_v59  ;;  %v6752_v51 = vpop.permute.xlu0 %3606 }
 0x217   : > { %v3889_v6 = vadd.f32 %v3888_v56, %v3674_v0  ;;  %v3966_v61 = vadd.f32 %v3965_v36, %v3931_v26  ;;  %v3427_v62 = vadd.f32 %v5240_v49, %v6676_v42  ;;  %v3678_v41 = vmul.f32 %v6687_v25, %v3426_v60 }
 0x218   : > { %v3676_v44 = vmul.f32 %v6678_v54, %v3424_v29  ;;  %v3425_v3 = vadd.f32 %v5241_v38, %v6676_v42 }
 0x219   : > { %v3967_v55 = vadd.f32 %v3966_v61, %v3932_v1  ;;  %v3890_v21 = vadd.f32 %v3889_v6, %v3675_v4  ;;  %v3679_v8 = vmul.f32 %v6694_v19, %v3427_v62  ;;  %v3936_v39 = vmul.f32 %v3678_v41, %v3678_v41 }
 0x21a   : > { %v3934_v59 = vmul.f32 %v3676_v44, %v3676_v44  ;;  %v3677_v37 = vmul.f32 %v6680_v16, %v3425_v3  ;;  %v5192_v31 = vpop.f32.mrb[16].mxu0  ;;  %v6754_v16 = vpop.permute.xlu1 %3611 }
 0x21b   : > { %v3891_v47 = vadd.f32 %v3890_v21, %v3676_v44  ;;  %v3968_v54 = vadd.f32 %v3967_v55, %v3933_v13  ;;  %v4439_v50 = vpack.c.bf16 %v3679_v8, %v3678_v41  ;;  %v3290_v34 = vpop.f32.mrb[17].mxu0  ;;  %v3937_v9 = vmul.f32 %v3679_v8, %v3679_v8  ;;  %v6761_v49 = vpop.permute.xlu0 %3616 }
 0x21c   : > { %v4434_v22 = vpack.c.bf16 %v3677_v37, %v3676_v44  ;;  %v3935_v14 = vmul.f32 %v3677_v37, %v3677_v37  ;;  %v5193_v25 = vpop.f32.mrb[18].mxu0 }
 0x21d   : > { %v3969_v32 = vadd.f32 %v3968_v54, %v3934_v59  ;;  %4497 = vst [vmem:[%s6692_s9 + $0x38] sm:$0xff] %v4439_v50   ;;  %v3892_v15 = vadd.f32 %v3891_v47, %v3677_v37  ;;  %v3293_v19 = vpop.f32.mrb[19].mxu0 }
 0x21e   : > { %4496 = vst [vmem:[%s6692_s9 + $0x30] sm:$0xff] %v4434_v22   ;;  %v6765_v29 = vpop.permute.xlu1 %3621 }
 0x21f   : > { %v3893_v17 = vadd.f32 %v3892_v15, %v3678_v41  ;;  %v3970_v23 = vadd.f32 %v3969_v32, %v3935_v14 }
 0x221   : > { %v3971_v58 = vadd.f32 %v3970_v23, %v3936_v39  ;;  %v4984_v27 = vpop.f32.mrb[16].mxu1  ;;  %v3894_v53 = vadd.f32 %v3893_v17, %v3679_v8  ;;  %v6774_v17 = vpop.permute.xlu0 %3626 }
 0x222   : > { %v5242_v0 = vadd.f32 %v5192_v31, %v4984_v27  ;;  %v5196_v2 = vpop.f32.mrb[20].mxu0  ;;  %v1952_v4 = vpop.f32.mrb[17].mxu1 }
 0x223   : > { %v5243_v48 = vadd.f32 %v3290_v34, %v1952_v4  ;;  %v3972_v57 = vadd.f32 %v3971_v58, %v3937_v9  ;;  %v3306_v63 = vpop.f32.mrb[21].mxu0  ;;  %v4985_v5 = vpop.f32.mrb[18].mxu1 }
 0x224   : > { %v3430_v18 = vadd.f32 %v5242_v0, %v6676_v42  ;;  %v5244_v20 = vadd.f32 %v5193_v25, %v4985_v5  ;;  %v5197_v43 = vpop.f32.mrb[22].mxu0  ;;  %v1955_v7 = vpop.f32.mrb[19].mxu1 }
 0x225   : > { %v3428_v26 = vadd.f32 %v5243_v48, %v6676_v42  ;;  %v5245_v24 = vadd.f32 %v3293_v19, %v1955_v7  ;;  %v3309_v45 = vpop.f32.mrb[23].mxu0  ;;  %v6779_v27 = vpop.permute.xlu1 %3631 }
 0x226   : > { %v3431_v10 = vadd.f32 %v5244_v20, %v6676_v42  ;;  %v3682_v46 = vmul.f32 %v6715_v52, %v3430_v18 }
 0x227   : > { %v3680_v36 = vmul.f32 %v6701_v12, %v3428_v26  ;;  %v3429_v56 = vadd.f32 %v5245_v24, %v6676_v42 }
 0x228   : > { %v3683_v60 = vmul.f32 %v6719_v11, %v3431_v10 }
 0x229   : > { %v3895_v38 = vadd.f32 %v3894_v53, %v3680_v36  ;;  %v3938_v1 = vmul.f32 %v3680_v36, %v3680_v36  ;;  %v3681_v6 = vmul.f32 %v6705_v28, %v3429_v56  ;;  %v4988_v61 = vpop.f32.mrb[20].mxu1  ;;  %v3940_v28 = vmul.f32 %v3682_v46, %v3682_v46 }
 0x22a   : > { %v4449_v62 = vpack.c.bf16 %v3683_v60, %v3682_v46  ;;  %v5246_v13 = vadd.f32 %v5196_v2, %v4988_v61  ;;  %v5200_v12 = vpop.f32.mrb[24].mxu0  ;;  %v1968_v44 = vpop.f32.mrb[21].mxu1  ;;  %v3941_v32 = vmul.f32 %v3683_v60, %v3683_v60 }
 0x22b   : > { %v3973_v3 = vadd.f32 %v3972_v57, %v3938_v1  ;;  %v4444_v55 = vpack.c.bf16 %v3681_v6, %v3680_v36  ;;  %v3896_v41 = vadd.f32 %v3895_v38, %v3681_v6  ;;  %v3939_v21 = vmul.f32 %v3681_v6, %v3681_v6  ;;  %v3322_v52 = vpop.f32.mrb[25].mxu0  ;;  %v4989_v8 = vpop.f32.mrb[22].mxu1 }
 0x22c   : > { %4499 = vst [vmem:[%s6692_s9 + $0x48] sm:$0xff] %v4449_v62   ;;  %v3434_v11 = vadd.f32 %v5246_v13, %v6676_v42  ;;  %v5247_v59 = vadd.f32 %v3306_v63, %v1968_v44  ;;  %v5248_v37 = vadd.f32 %v5197_v43, %v4989_v8  ;;  %v5201_v31 = vpop.f32.mrb[26].mxu0  ;;  %v1971_v47 = vpop.f32.mrb[23].mxu1 }
 0x22d   : > { %4498 = vst [vmem:[%s6692_s9 + $0x40] sm:$0xff] %v4444_v55   ;;  %v3897_v54 = vadd.f32 %v3896_v41, %v3682_v46  ;;  %v3974_v50 = vadd.f32 %v3973_v3, %v3939_v21  ;;  %v5249_v34 = vadd.f32 %v3309_v45, %v1971_v47  ;;  %v3325_v22 = vpop.f32.mrb[27].mxu0  ;;  %v3642_v21 = vpop.permute.xlu1 %3641 }
 0x22e   : > { %v3432_v14 = vadd.f32 %v5247_v59, %v6676_v42  ;;  %v3435_v25 = vadd.f32 %v5248_v37, %v6676_v42  ;;  %v3686_v23 = vmul.f32 %v6745_v33, %v3434_v11 }
 0x22f   : > { %v3975_v15 = vadd.f32 %v3974_v50, %v3940_v28  ;;  %v3898_v19 = vadd.f32 %v3897_v54, %v3683_v60  ;;  %v3433_v39 = vadd.f32 %v5249_v34, %v6676_v42 }
 0x230   : > { %v3684_v9 = vmul.f32 %v6728_v30, %v3432_v14  ;;  %v3687_v58 = vmul.f32 %v6748_v35, %v3435_v25  ;;  %v3944_v60 = vmul.f32 %v3686_v23, %v3686_v23 }
 0x231   : > { %v3976_v53 = vadd.f32 %v3975_v15, %v3941_v32  ;;  %v3685_v0 = vmul.f32 %v6732_v40, %v3433_v39  ;;  %v4992_v2 = vpop.f32.mrb[24].mxu1 }
 0x232   : > { %v3899_v4 = vadd.f32 %v3898_v19, %v3684_v9  ;;  %v3942_v48 = vmul.f32 %v3684_v9, %v3684_v9  ;;  %v4459_v57 = vpack.c.bf16 %v3687_v58, %v3686_v23  ;;  %v5204_v63 = vpop.f32.mrb[28].mxu0  ;;  %v1984_v5 = vpop.f32.mrb[25].mxu1  ;;  %v5250_v33 = vadd.f32 %v5200_v12, %v4992_v2 }
 0x233   : > { %v4454_v18 = vpack.c.bf16 %v3685_v0, %v3684_v9  ;;  %v3943_v20 = vmul.f32 %v3685_v0, %v3685_v0  ;;  %v5251_v43 = vadd.f32 %v3322_v52, %v1984_v5  ;;  %v3338_v30 = vpop.f32.mrb[29].mxu0  ;;  %v4993_v7 = vpop.f32.mrb[26].mxu1  ;;  %v3945_v61 = vmul.f32 %v3687_v58, %v3687_v58 }
 0x234   : > { %v3977_v35 = vadd.f32 %v3976_v53, %v3942_v48  ;;  %4501 = vst [vmem:[%s6692_s9 + $0x58] sm:$0xff] %v4459_v57   ;;  %v3900_v26 = vadd.f32 %v3899_v4, %v3685_v0  ;;  %v5252_v24 = vadd.f32 %v5201_v31, %v4993_v7  ;;  %v5205_v45 = vpop.f32.mrb[30].mxu0  ;;  %v1987_v10 = vpop.f32.mrb[27].mxu1  ;;  %v3438_v40 = vadd.f32 %v5250_v33, %v6676_v42 }
 0x235   : > { %4500 = vst [vmem:[%s6692_s9 + $0x50] sm:$0xff] %v4454_v18   ;;  %v3436_v36 = vadd.f32 %v5251_v43, %v6676_v42  ;;  %v5253_v56 = vadd.f32 %v3325_v22, %v1987_v10  ;;  %v3341_v46 = vpop.f32.mrb[31].mxu0  ;;  %v3637_v12 = vpop.permute.xlu0 %3636 }
 0x236   : > { %v3901_v38 = vadd.f32 %v3900_v26, %v3686_v23  ;;  %v3978_v1 = vadd.f32 %v3977_v35, %v3943_v20  ;;  %v3439_v6 = vadd.f32 %v5252_v24, %v6676_v42  ;;  %v3690_v3 = vmul.f32 %v6761_v49, %v3438_v40  ;;  %v3652_v33 = vpop.permute.xlu1 %3651 }
 0x237   : > { %v3688_v62 = vmul.f32 %v6752_v51, %v3436_v36  ;;  %v3437_v13 = vadd.f32 %v5253_v56, %v6676_v42 }
 0x238   : > { %v3979_v44 = vadd.f32 %v3978_v1, %v3944_v60  ;;  %v3902_v55 = vadd.f32 %v3901_v38, %v3687_v58  ;;  %v3691_v41 = vmul.f32 %v6765_v29, %v3439_v6  ;;  %v3948_v9 = vmul.f32 %v3690_v3, %v3690_v3 }
 0x239   : > { %v3946_v52 = vmul.f32 %v3688_v62, %v3688_v62  ;;  %v3689_v8 = vmul.f32 %v6754_v16, %v3437_v13  ;;  %v4996_v11 = vpop.f32.mrb[28].mxu1  ;;  %v3647_v57 = vpop.permute.xlu0 %3646 }
 0x23a   : > { %v3903_v59 = vadd.f32 %v3902_v55, %v3688_v62  ;;  %v3980_v37 = vadd.f32 %v3979_v44, %v3945_v61  ;;  %v4469_v31 = vpack.c.bf16 %v3691_v41, %v3690_v3  ;;  %v5208_v51 = vpop.f32.mrb[32].mxu0  ;;  %v2000_v47 = vpop.f32.mrb[29].mxu1  ;;  %v5254_v50 = vadd.f32 %v5204_v63, %v4996_v11 }
 0x23b   : > { %v4464_v28 = vpack.c.bf16 %v3689_v8, %v3688_v62  ;;  %v3947_v54 = vmul.f32 %v3689_v8, %v3689_v8  ;;  %v5255_v34 = vadd.f32 %v3338_v30, %v2000_v47  ;;  %v3354_v49 = vpop.f32.mrb[33].mxu0  ;;  %v4997_v22 = vpop.f32.mrb[30].mxu1  ;;  %v3949_v2 = vmul.f32 %v3691_v41, %v3691_v41 }
 0x23c   : > { %v3981_v14 = vadd.f32 %v3980_v37, %v3946_v52  ;;  %4503 = vst [vmem:[%s6692_s9 + $0x68] sm:$0xff] %v4469_v31   ;;  %v3904_v29 = vadd.f32 %v3903_v59, %v3689_v8  ;;  %v5256_v25 = vadd.f32 %v5205_v45, %v4997_v22  ;;  %v5209_v32 = vpop.f32.mrb[34].mxu0  ;;  %v2003_v15 = vpop.f32.mrb[31].mxu1  ;;  %v3442_v16 = vadd.f32 %v5254_v50, %v6676_v42 }
 0x23d   : > { %4502 = vst [vmem:[%s6692_s9 + $0x60] sm:$0xff] %v4464_v28   ;;  %v3440_v19 = vadd.f32 %v5255_v34, %v6676_v42  ;;  %v5257_v39 = vadd.f32 %v3341_v46, %v2003_v15  ;;  %v3357_v23 = vpop.f32.mrb[35].mxu0  ;;  %v3662_v55 = vpop.permute.xlu1 %3661 }
 0x23e   : > { %v3905_v58 = vadd.f32 %v3904_v29, %v3690_v3  ;;  %v3982_v53 = vadd.f32 %v3981_v14, %v3947_v54  ;;  %v3443_v0 = vadd.f32 %v5256_v25, %v6676_v42  ;;  %v3694_v5 = vmul.f32 %v3637_v12, %v3442_v16  ;;  %v3657_v3 = vpop.permute.xlu0 %3656 }
 0x23f   : > { %v3692_v4 = vmul.f32 %v6774_v17, %v3440_v19  ;;  %v3441_v48 = vadd.f32 %v5257_v39, %v6676_v42 }
 0x240   : > { %v3983_v63 = vadd.f32 %v3982_v53, %v3948_v9  ;;  %v3906_v18 = vadd.f32 %v3905_v58, %v3691_v41  ;;  %v3695_v20 = vmul.f32 %v3642_v21, %v3443_v0  ;;  %v3952_v62 = vmul.f32 %v3694_v5, %v3694_v5 }
 0x241   : > { %v3950_v43 = vmul.f32 %v3692_v4, %v3692_v4  ;;  %v3693_v30 = vmul.f32 %v6779_v27, %v3441_v48  ;;  %v5000_v7 = vpop.f32.mrb[32].mxu1 }
 0x242   : > { %v3907_v35 = vadd.f32 %v3906_v18, %v3692_v4  ;;  %v3984_v26 = vadd.f32 %v3983_v63, %v3949_v2  ;;  %v4479_v24 = vpack.c.bf16 %v3695_v20, %v3694_v5  ;;  %v2016_v45 = vpop.f32.mrb[33].mxu1  ;;  %v5258_v40 = vadd.f32 %v5208_v51, %v5000_v7 }
 0x243   : > { %v4474_v10 = vpack.c.bf16 %v3693_v30, %v3692_v4  ;;  %v3951_v17 = vmul.f32 %v3693_v30, %v3693_v30  ;;  %v5259_v36 = vadd.f32 %v3354_v49, %v2016_v45  ;;  %v5001_v56 = vpop.f32.mrb[34].mxu1  ;;  %v3953_v41 = vmul.f32 %v3695_v20, %v3695_v20 }
 0x244   : > { %v3985_v46 = vadd.f32 %v3984_v26, %v3950_v43  ;;  %4505 = vst [vmem:[%s6692_s9 + $0x78] sm:$0xff] %v4479_v24   ;;  %v3908_v60 = vadd.f32 %v3907_v35, %v3693_v30  ;;  %v5260_v38 = vadd.f32 %v5209_v32, %v5001_v56  ;;  %v2019_v1 = vpop.f32.mrb[35].mxu1  ;;  %v3446_v6 = vadd.f32 %v5258_v40, %v6676_v42 }
 0x245   : > { %4504 = vst [vmem:[%s6692_s9 + $0x70] sm:$0xff] %v4474_v10   ;;  %v3444_v27 = vadd.f32 %v5259_v36, %v6676_v42  ;;  %v5261_v61 = vadd.f32 %v3357_v23, %v2019_v1 }
 0x246   : > { %v3909_v13 = vadd.f32 %v3908_v60, %v3694_v5  ;;  %v3986_v12 = vadd.f32 %v3985_v46, %v3951_v17  ;;  %v3447_v44 = vadd.f32 %v5260_v38, %v6676_v42  ;;  %v3698_v11 = vmul.f32 %v3657_v3, %v3446_v6 }
 0x247   : > { %v3696_v21 = vmul.f32 %v3647_v57, %v3444_v27  ;;  %v3445_v52 = vadd.f32 %v5261_v61, %v6676_v42 }
 0x248   : > { %v3987_v8 = vadd.f32 %v3986_v12, %v3952_v62  ;;  %v3910_v59 = vadd.f32 %v3909_v13, %v3695_v20  ;;  %v3699_v37 = vmul.f32 %v3662_v55, %v3447_v44  ;;  %v3956_v14 = vmul.f32 %v3698_v11, %v3698_v11 }
 0x249   : > { %v3954_v31 = vmul.f32 %v3696_v21, %v3696_v21  ;;  %v3697_v51 = vmul.f32 %v3652_v33, %v3445_v52 }
 0x24a   : > { %v3911_v47 = vadd.f32 %v3910_v59, %v3696_v21  ;;  %v3988_v28 = vadd.f32 %v3987_v8, %v3953_v41  ;;  %v4489_v54 = vpack.c.bf16 %v3699_v37, %v3698_v11  ;;  %v3957_v42 = vmul.f32 %v3699_v37, %v3699_v37 }
 0x24b   : > { %v4484_v50 = vpack.c.bf16 %v3697_v51, %v3696_v21  ;;  %v3955_v34 = vmul.f32 %v3697_v51, %v3697_v51 }
 0x24c   : > { %v3989_v49 = vadd.f32 %v3988_v28, %v3954_v31  ;;  %4507 = vst [vmem:[%s6692_s9 + $0x88] sm:$0xff] %v4489_v54   ;;  %v3912_v22 = vadd.f32 %v3911_v47, %v3697_v51 }
 0x24d   : > { %4506 = vst [vmem:[%s6692_s9 + $0x80] sm:$0xff] %v4484_v50  }
 0x24e   : > { %v3913_v29 = vadd.f32 %v3912_v22, %v3698_v11  ;;  %v3990_v25 = vadd.f32 %v3989_v49, %v3955_v34 }
 0x250   : > { %v3914_v32 = vadd.f32 %v3913_v29, %v3699_v37  ;;  %v3991_v15 = vadd.f32 %v3990_v25, %v3956_v14 }
 0x252   : > { %v3915_v16 = vrot.slane %v3914_v32, 4  ;;  %v3992_v19 = vadd.f32 %v3991_v15, %v3957_v42 }
 0x254   : > { %v3916_v39 = vadd.f32 %v3915_v16, %v3914_v32  ;;  %v3993_v23 = vrot.slane %v3992_v19, 4 }
 0x256   : > { %v3917_v9 = vrot.slane %v3916_v39, 2  ;;  %v3994_v58 = vadd.f32 %v3993_v23, %v3992_v19 }
 0x258   : > { %v3918_v53 = vadd.f32 %v3917_v9, %v3916_v39  ;;  %v3995_v0 = vrot.slane %v3994_v58, 2 }
 0x25a   : > { %v3919_v2 = vrot.slane %v3918_v53, 1  ;;  %v3996_v4 = vadd.f32 %v3995_v0, %v3994_v58 }
 0x25c   : > { %v3920_v48 = vadd.f32 %v3919_v2, %v3918_v53  ;;  %v3997_v57 = vrot.slane %v3996_v4, 1 }
 0x25e   : > { %3921 = vst [vmem:[%s288_s12] sm:$0x1] %v3920_v48  ;;  %v3998_v63 = vadd.f32 %v3997_v57, %v3996_v4 }
 0x260   : > { %3999 = vst [vmem:[%s291_s14] sm:$0x1] %v3998_v63 }
 0x261 PF: > { %s17_s21 = sadd.s32 1, %s5612_s21  }
 0x262   : > { %p14_p5 = scmp.ge.s32.totalorder %s17_s21, 4  }
 0x264   :  { %16 = sbr.rel (!%p14_p5) target bundleno = 1 (0x1), region = 101 }

// kernel: res_block_batchnorm.5
= control target key start
LH: loop header
LB: loop body
LE: loop exit
PB: predicated region body
PF: predicated region fallthrough
CT: control target
= control target key end

     0   :  { %s502_s15 = smov 0   ;;  %s658_s0 = inlined_call_operand.vmem [shape: f32[576,128], index: 0, kind: input, shape index: {}]   ;;  %s659_s1 = inlined_call_operand.vmem [shape: f32[576,128], index: 1, kind: input, shape index: {}]   ;;  %s660_s2 = inlined_call_operand.vmem [shape: f32[1,128], index: 2, kind: input, shape index: {}]   ;;  %s661_s3 = inlined_call_operand.vmem [shape: f32[1,128], index: 3, kind: input, shape index: {}]   ;;  %s662_s4 = inlined_call_operand.vmem [shape: f32[576,128], index: 4, kind: output, shape index: {}]  }
   0x1 LB: > { %s449_s16 = sadd.s32 4294967295, %s475_s15   ;;  %p453_p0 = scmp.ge.s32.totalorder %s475_s15, 1  ;;  %s475_s15 = sphi %s502_s15, %s14_s15  }
   0x2   : > { %p174_p1 = scmp.lt.s32.totalorder %s475_s15, 4 }
   0x4   : > { %p175_p2 = pnand %p453_p0, %p174_p1 }
   0x5   : > { %s205_s17 = smul.u32 (!%p175_p2), 24, %s449_s16  ;;  %v513_v0 = vld [vmem:[%s660_s2] ss:$0 sm:$0xff] (!%p175_p2) }
   0x6   : > { %178 = sbr.rel (%p175_p2) target bundleno = 43 (0x2b), region = 36  ;;  %v530_v3 = vld [vmem:[%s661_s3] ss:$0 sm:$0xff] (!%p175_p2) }
   0x7   : > { %p206_p3 = scmp.lt.s32.totalorder (!%p175_p2), %s205_s17, 71 }
   0xd   : > { %s664_s17 = smov (!%p206_p3, %s205_s17), 71 }
   0xe   : > { %s454_s18 = sshll.u32 %s664_s17, 3 }
   0xf   : > { %s518_s23 = scalar_lea.vmem %s658_s0, %s454_s18  ;;  %s523_s26 = scalar_lea.vmem %s659_s1, %s454_s18 }
  0x10   : > { %v223_v1 = vld [vmem:[%s523_s26] sm:$0xff]  ;;  %v224_v4 = vld [vmem:[%s523_s26 + $0x8] sm:$0xff]  ;;  %v225_v7 = vld [vmem:[%s523_s26 + $0x10] sm:$0xff]  ;;  %s549_s5 = scalar_lea.vmem %s662_s4, %s454_s18 }
  0x11   : > { %v247_v2 = vld [vmem:[%s518_s23] sm:$0xff]  ;;  %v248_v6 = vld [vmem:[%s518_s23 + $0x8] sm:$0xff]  ;;  %v249_v8 = vld [vmem:[%s518_s23 + $0x10] sm:$0xff] }
  0x12   : > { %v278_v5 = vmul.f32 %v513_v0, %v247_v2  ;;  %v279_v9 = vmul.f32 %v513_v0, %v248_v6  ;;  %v280_v10 = vmul.f32 %v513_v0, %v249_v8  ;;  %v226_v11 = vld [vmem:[%s523_s26 + $0x18] sm:$0xff]  ;;  %v227_v13 = vld [vmem:[%s523_s26 + $0x20] sm:$0xff]  ;;  %v228_v17 = vld [vmem:[%s523_s26 + $0x28] sm:$0xff] }
  0x13   : > { %v250_v12 = vld [vmem:[%s518_s23 + $0x18] sm:$0xff]  ;;  %v251_v16 = vld [vmem:[%s518_s23 + $0x20] sm:$0xff]  ;;  %v252_v18 = vld [vmem:[%s518_s23 + $0x28] sm:$0xff] }
  0x14   : > { %v302_v14 = vadd.f32 %v278_v5, %v223_v1  ;;  %v281_v15 = vmul.f32 %v513_v0, %v250_v12  ;;  %v303_v19 = vadd.f32 %v279_v9, %v224_v4  ;;  %v304_v20 = vadd.f32 %v280_v10, %v225_v7  ;;  %v229_v23 = vld [vmem:[%s523_s26 + $0x30] sm:$0xff]  ;;  %v230_v28 = vld [vmem:[%s523_s26 + $0x38] sm:$0xff]  ;;  %v255_v30 = vld [vmem:[%s518_s23 + $0x40] sm:$0xff] }
  0x15   : > { %v282_v21 = vmul.f32 %v513_v0, %v251_v16  ;;  %v283_v22 = vmul.f32 %v513_v0, %v252_v18  ;;  %v253_v24 = vld [vmem:[%s518_s23 + $0x30] sm:$0xff]  ;;  %v254_v29 = vld [vmem:[%s518_s23 + $0x38] sm:$0xff]  ;;  %v231_v35 = vld [vmem:[%s523_s26 + $0x40] sm:$0xff]  ;;  %v286_v41 = vmul.f32 %v513_v0, %v255_v30 }
  0x16   : > { %v333_v25 = vadd.f32 %v530_v3, %v302_v14  ;;  %v305_v26 = vadd.f32 %v281_v15, %v226_v11  ;;  %v284_v27 = vmul.f32 %v513_v0, %v253_v24  ;;  %v334_v31 = vadd.f32 %v530_v3, %v303_v19  ;;  %v232_v36 = vld [vmem:[%s523_s26 + $0x48] sm:$0xff]  ;;  %v233_v42 = vld [vmem:[%s523_s26 + $0x50] sm:$0xff]  ;;  %v258_v44 = vld [vmem:[%s518_s23 + $0x58] sm:$0xff] }
  0x17   : > { %v335_v32 = vadd.f32 %v530_v3, %v304_v20  ;;  %v306_v33 = vadd.f32 %v282_v21, %v227_v13  ;;  %v307_v34 = vadd.f32 %v283_v22, %v228_v17  ;;  %v256_v37 = vld [vmem:[%s518_s23 + $0x48] sm:$0xff]  ;;  %v285_v40 = vmul.f32 %v513_v0, %v254_v29  ;;  %v257_v43 = vld [vmem:[%s518_s23 + $0x50] sm:$0xff]  ;;  %v234_v49 = vld [vmem:[%s523_s26 + $0x58] sm:$0xff] }
  0x18   : > { %357 = vst [vmem:[%s549_s5] sm:$0xff] %v333_v25  ;;  %v336_v38 = vadd.f32 %v530_v3, %v305_v26  ;;  %v308_v39 = vadd.f32 %v284_v27, %v229_v23  ;;  %358 = vst [vmem:[%s549_s5 + $0x8] sm:$0xff] %v334_v31  ;;  %v287_v47 = vmul.f32 %v513_v0, %v256_v37  ;;  %v235_v50 = vld [vmem:[%s523_s26 + $0x60] sm:$0xff]  ;;  %v236_v56 = vld [vmem:[%s523_s26 + $0x68] sm:$0xff] }
  0x19   : > { %359 = vst [vmem:[%s549_s5 + $0x10] sm:$0xff] %v335_v32  ;;  %v337_v45 = vadd.f32 %v530_v3, %v306_v33  ;;  %v338_v46 = vadd.f32 %v530_v3, %v307_v34  ;;  %v288_v48 = vmul.f32 %v513_v0, %v257_v43  ;;  %v259_v51 = vld [vmem:[%s518_s23 + $0x60] sm:$0xff]  ;;  %v309_v53 = vadd.f32 %v285_v40, %v230_v28  ;;  %v260_v57 = vld [vmem:[%s518_s23 + $0x68] sm:$0xff]  ;;  %v261_v58 = vld [vmem:[%s518_s23 + $0x70] sm:$0xff] }
  0x1a   : > { %360 = vst [vmem:[%s549_s5 + $0x18] sm:$0xff] %v336_v38  ;;  %v339_v52 = vadd.f32 %v530_v3, %v308_v39  ;;  %v310_v54 = vadd.f32 %v286_v41, %v231_v35  ;;  %v289_v55 = vmul.f32 %v513_v0, %v258_v44  ;;  %v311_v59 = vadd.f32 %v287_v47, %v232_v36  ;;  %v237_v63 = vld [vmem:[%s523_s26 + $0x70] sm:$0xff]  ;;  %v262_v1 = vld [vmem:[%s518_s23 + $0x78] sm:$0xff]  ;;  %v263_v8 = vld [vmem:[%s518_s23 + $0x80] sm:$0xff] }
  0x1b   : > { %361 = vst [vmem:[%s549_s5 + $0x20] sm:$0xff] %v337_v45  ;;  %362 = vst [vmem:[%s549_s5 + $0x28] sm:$0xff] %v338_v46  ;;  %v312_v60 = vadd.f32 %v288_v48, %v233_v42  ;;  %v290_v61 = vmul.f32 %v513_v0, %v259_v51  ;;  %v291_v62 = vmul.f32 %v513_v0, %v260_v57  ;;  %v238_v7 = vld [vmem:[%s523_s26 + $0x78] sm:$0xff]  ;;  %v264_v9 = vld [vmem:[%s518_s23 + $0x88] sm:$0xff] }
  0x1c   : > { %363 = vst [vmem:[%s549_s5 + $0x30] sm:$0xff] %v339_v52  ;;  %v340_v2 = vadd.f32 %v530_v3, %v309_v53  ;;  %v341_v4 = vadd.f32 %v530_v3, %v310_v54  ;;  %v313_v5 = vadd.f32 %v289_v55, %v234_v49  ;;  %v292_v6 = vmul.f32 %v513_v0, %v261_v58  ;;  %v239_v14 = vld [vmem:[%s523_s26 + $0x80] sm:$0xff]  ;;  %v240_v15 = vld [vmem:[%s523_s26 + $0x88] sm:$0xff]  ;;  %v265_v16 = vld [vmem:[%s518_s23 + $0x90] sm:$0xff] }
  0x1d   : > { %v342_v10 = vadd.f32 %v530_v3, %v311_v59  ;;  %v343_v11 = vadd.f32 %v530_v3, %v312_v60  ;;  %v314_v12 = vadd.f32 %v290_v61, %v235_v50  ;;  %v315_v13 = vadd.f32 %v291_v62, %v236_v56  ;;  %v241_v21 = vld [vmem:[%s523_s26 + $0x90] sm:$0xff]  ;;  %v266_v22 = vld [vmem:[%s518_s23 + $0x98] sm:$0xff]  ;;  %v267_v23 = vld [vmem:[%s518_s23 + $0xa0] sm:$0xff] }
  0x1e   : > { %364 = vst [vmem:[%s549_s5 + $0x38] sm:$0xff] %v340_v2  ;;  %365 = vst [vmem:[%s549_s5 + $0x40] sm:$0xff] %v341_v4  ;;  %v344_v17 = vadd.f32 %v530_v3, %v313_v5  ;;  %v316_v18 = vadd.f32 %v292_v6, %v237_v63  ;;  %v293_v19 = vmul.f32 %v513_v0, %v262_v1  ;;  %v242_v28 = vld [vmem:[%s523_s26 + $0x98] sm:$0xff]  ;;  %v268_v29 = vld [vmem:[%s518_s23 + $0xa8] sm:$0xff] }
  0x1f   : > { %v294_v20 = vmul.f32 %v513_v0, %v263_v8  ;;  %366 = vst [vmem:[%s549_s5 + $0x48] sm:$0xff] %v342_v10  ;;  %367 = vst [vmem:[%s549_s5 + $0x50] sm:$0xff] %v343_v11  ;;  %v345_v24 = vadd.f32 %v530_v3, %v314_v12  ;;  %v346_v25 = vadd.f32 %v530_v3, %v315_v13  ;;  %v243_v34 = vld [vmem:[%s523_s26 + $0xa0] sm:$0xff]  ;;  %v244_v35 = vld [vmem:[%s523_s26 + $0xa8] sm:$0xff] }
  0x20   : > { %v295_v26 = vmul.f32 %v513_v0, %v264_v9  ;;  %v296_v27 = vmul.f32 %v513_v0, %v265_v16  ;;  %368 = vst [vmem:[%s549_s5 + $0x58] sm:$0xff] %v344_v17  ;;  %v347_v30 = vadd.f32 %v530_v3, %v316_v18  ;;  %v317_v31 = vadd.f32 %v293_v19, %v238_v7  ;;  %v269_v36 = vld [vmem:[%s518_s23 + $0xb0] sm:$0xff]  ;;  %v270_v42 = vld [vmem:[%s518_s23 + $0xb8] sm:$0xff] }
  0x21   : > { %v318_v32 = vadd.f32 %v294_v20, %v239_v14  ;;  %v297_v33 = vmul.f32 %v513_v0, %v266_v22  ;;  %369 = vst [vmem:[%s549_s5 + $0x60] sm:$0xff] %v345_v24  ;;  %370 = vst [vmem:[%s549_s5 + $0x68] sm:$0xff] %v346_v25  ;;  %v298_v39 = vmul.f32 %v513_v0, %v267_v23  ;;  %v245_v41 = vld [vmem:[%s523_s26 + $0xb0] sm:$0xff]  ;;  %v246_v51 = vld [vmem:[%s523_s26 + $0xb8] sm:$0xff] }
  0x22   : > { %v319_v37 = vadd.f32 %v295_v26, %v240_v15  ;;  %v320_v38 = vadd.f32 %v296_v27, %v241_v21  ;;  %v299_v40 = vmul.f32 %v513_v0, %v268_v29  ;;  %371 = vst [vmem:[%s549_s5 + $0x70] sm:$0xff] %v347_v30  ;;  %v348_v43 = vadd.f32 %v530_v3, %v317_v31 }
  0x23   : > { %v349_v44 = vadd.f32 %v530_v3, %v318_v32  ;;  %v321_v45 = vadd.f32 %v297_v33, %v242_v28  ;;  %v300_v46 = vmul.f32 %v513_v0, %v269_v36  ;;  %v322_v49 = vadd.f32 %v298_v39, %v243_v34 }
  0x24   : > { %v350_v47 = vadd.f32 %v530_v3, %v319_v37  ;;  %v351_v48 = vadd.f32 %v530_v3, %v320_v38  ;;  %v323_v50 = vadd.f32 %v299_v40, %v244_v35  ;;  %372 = vst [vmem:[%s549_s5 + $0x78] sm:$0xff] %v348_v43  ;;  %v301_v54 = vmul.f32 %v513_v0, %v270_v42 }
  0x25   : > { %373 = vst [vmem:[%s549_s5 + $0x80] sm:$0xff] %v349_v44  ;;  %v352_v52 = vadd.f32 %v530_v3, %v321_v45  ;;  %v324_v53 = vadd.f32 %v300_v46, %v245_v41  ;;  %v353_v55 = vadd.f32 %v530_v3, %v322_v49 }
  0x26   : > { %374 = vst [vmem:[%s549_s5 + $0x88] sm:$0xff] %v350_v47  ;;  %375 = vst [vmem:[%s549_s5 + $0x90] sm:$0xff] %v351_v48  ;;  %v354_v56 = vadd.f32 %v530_v3, %v323_v50  ;;  %v325_v58 = vadd.f32 %v301_v54, %v246_v51 }
  0x27   : > { %376 = vst [vmem:[%s549_s5 + $0x98] sm:$0xff] %v352_v52  ;;  %v355_v57 = vadd.f32 %v530_v3, %v324_v53  ;;  %377 = vst [vmem:[%s549_s5 + $0xa0] sm:$0xff] %v353_v55 }
  0x28   : > { %378 = vst [vmem:[%s549_s5 + $0xa8] sm:$0xff] %v354_v56  ;;  %v356_v59 = vadd.f32 %v530_v3, %v325_v58 }
  0x29   : > { %379 = vst [vmem:[%s549_s5 + $0xb0] sm:$0xff] %v355_v57 }
  0x2a   : > { %380 = vst [vmem:[%s549_s5 + $0xb8] sm:$0xff] %v356_v59 }
  0x2b PF: > { %s14_s15 = sadd.s32 1, %s475_s15  }
  0x2c   : > { %p11_p4 = scmp.ge.s32.totalorder %s14_s15, 5  }
  0x2e   :  { %13 = sbr.rel (!%p11_p4) target bundleno = 1 (0x1), region = 69 }

</bundles_post_ra>
